<compile_context>
chip_gen: v5e
topology: v5e:2x2
jax: 0.10.0
libtpu: 0.0.40
codegen_flags: <defaults>
</compile_context>

<pallas_src>
import functools
import numpy as np
import jax
import jax.numpy as jnp
from jax import lax
from jax.experimental import pallas as pl
from jax.experimental.pallas import tpu as pltpu

# ----------------------------- small config ---------------------------------
NUM_NODES = 100
NUM_RELS = 11
D_MODEL = 32          # == d_embd (encoder applies layers directly)
D_K = 16
D_V = 16
D_INNER = 64
N_HEAD = 8
HEAD_FIRST = 12       # hard-coded in MultiHeadAttention.__init__
BATCH = 4
EPS_BN = 1e-5
EPS_LN = 1e-5
GRP = N_HEAD * D_K    # 128 fused-projection columns per head_first group


# ------------------------------ fused kernel ---------------------------------
def _sattle_fused_kernel(
    h0_ref, r0_ref, ebs_ref, ebb_ref, rbs_ref, rbb_ref,
    wq_ref, bq_ref, wk_ref, bk_ref,
    tile_ref, seg_ref, t2w_ref, t2b_ref, fc2w_ref, fc2b_ref,
    lng_ref, lnb_ref, w1_ref, b1_ref, w2_ref, b2_ref, embt_ref, nb_ref,
    o_ref,
    q2_ref, k2_ref, o2_ref,
):
    f32 = jnp.float32
    B = h0_ref.shape[0]

    # eval-mode BatchNorm1d folded to per-feature affine (running mean=0, var=1)
    h_bn = h0_ref[...] * ebs_ref[...] + ebb_ref[...]                    # [B, 32]
    r_bn = r0_ref[...] * rbs_ref[...] + rbb_ref[...]                    # [B, 32]

    # fused (w_qs -> w_qs2) projections; positional/index table folded in bias
    q_all = jnp.dot(h_bn, wq_ref[...], preferred_element_type=f32) + bq_ref[...]   # [B, 1536]
    k_all = jnp.dot(r_bn, wk_ref[...], preferred_element_type=f32) + bk_ref[...]   # [B, 1536]

    # relayout [B, 12*128] -> [12B, 128] (group-major rows) via VMEM scratch.
    # Slices of q_all/k_all are whole-vreg (128-lane aligned) selects.
    for g in range(HEAD_FIRST):
        q2_ref[g * B:(g + 1) * B, :] = q_all[:, g * GRP:(g + 1) * GRP]
        k2_ref[g * B:(g + 1) * B, :] = k_all[:, g * GRP:(g + 1) * GRP]

    q2 = q2_ref[...]                 # [12B, 128]   columns = h*16 + d
    tilemat = tile_ref[...]          # [16, 128]    lane-tiling constant
    seg = seg_ref[...]               # [128, 8]     16-lane segment-sum constant

    # attention2 (k @ q^T per row) fused with tline2 (BN2 scale folded into it).
    acc2 = jnp.zeros((HEAD_FIRST * B, D_MODEL), f32)
    for h in range(N_HEAD):
        k_h = k2_ref[:, h * D_K:(h + 1) * D_K]                                # [12B, 16]
        k_t = jnp.dot(k_h, tilemat, preferred_element_type=f32)               # [12B, 128]
        s_h = jnp.dot(q2 * k_t, seg, preferred_element_type=f32)              # [12B, 8]
        acc2 = acc2 + jnp.dot(s_h, t2w_ref[h], preferred_element_type=f32)    # [12B, 32]
    o2_ref[...] = acc2 + t2b_ref[...]        # + (tline2_b*bn_scale + bn_shift)

    # fc2 (head-first transpose folded into per-group weights, -a_r folded),
    # plus the residual r_bn:  t = -a_r * fc2(out2_flat) + r_bn
    t = r_bn + fc2b_ref[...]
    for g in range(HEAD_FIRST):
        t = t + jnp.dot(o2_ref[g * B:(g + 1) * B, :], fc2w_ref[g],
                        preferred_element_type=f32)

    # LayerNorm with the b_r gate folded into gamma/beta
    mu = jnp.mean(t, axis=-1, keepdims=True)
    var = jnp.mean(jnp.square(t - mu), axis=-1, keepdims=True)
    mha = (t - mu) * lax.rsqrt(var + EPS_LN) * lng_ref[...] + lnb_ref[...]

    # PositionwiseFeedForwardUseConv (two 1x1 convs == linears) + residual
    hid = jnp.maximum(
        jnp.dot(mha, w1_ref[...], preferred_element_type=f32) + b1_ref[...], 0.0)
    ff = jnp.dot(hid, w2_ref[...], preferred_element_type=f32) + b2_ref[...] + mha

    # scoring against all entities (pre-transposed ent_emb) + node bias
    o_ref[...] = jnp.dot(ff, embt_ref[...], preferred_element_type=f32) + nb_ref[...]


# ------------------------------ parameters -----------------------------------
def sinusoid_table(n_position, d_hid):
    pos = np.arange(n_position)[:, None].astype(np.float64)
    j = np.arange(d_hid)[None, :]
    angle = pos / np.power(10000.0, 2.0 * (j // 2) / d_hid)
    table = np.zeros((n_position, d_hid), dtype=np.float32)
    table[:, 0::2] = np.sin(angle[:, 0::2])
    table[:, 1::2] = np.cos(angle[:, 1::2])
    return jnp.asarray(table)


def init_params(key):
    ks = jax.random.split(key, 32)

    def normal(k, shape, std=0.05):
        return (std * jax.random.normal(k, shape, dtype=jnp.float32)).astype(jnp.float32)

    p = {}
    # SAttLE embeddings / node bias
    p["ent_emb"] = normal(ks[0], (NUM_NODES, D_MODEL), 0.1)
    p["rel_emb"] = normal(ks[1], (2 * NUM_RELS, D_MODEL), 0.1)
    p["node_bias"] = normal(ks[2], (NUM_NODES,), 0.01)
    # ent_bn / rel_bn (BatchNorm1d, eval)
    p["ent_bn_g"] = 1.0 + normal(ks[3], (D_MODEL,), 0.05)
    p["ent_bn_b"] = normal(ks[4], (D_MODEL,), 0.05)
    p["rel_bn_g"] = 1.0 + normal(ks[5], (D_MODEL,), 0.05)
    p["rel_bn_b"] = normal(ks[6], (D_MODEL,), 0.05)
    # MultiHeadAttention
    p["w_qs"] = normal(ks[7], (D_MODEL, HEAD_FIRST * D_MODEL))
    p["b_qs"] = normal(ks[8], (HEAD_FIRST * D_MODEL,), 0.02)
    p["w_ks"] = normal(ks[9], (D_MODEL, HEAD_FIRST * D_MODEL))
    p["b_ks"] = normal(ks[10], (HEAD_FIRST * D_MODEL,), 0.02)
    p["w_qs2"] = normal(ks[11], (D_MODEL, N_HEAD * D_K))
    p["b_qs2"] = normal(ks[12], (N_HEAD * D_K,), 0.02)
    p["w_ks2"] = normal(ks[13], (D_MODEL, N_HEAD * D_K))
    p["b_ks2"] = normal(ks[14], (N_HEAD * D_K,), 0.02)
    p["src_word_emb"] = normal(ks[15], (201, D_K), 1.0)
    p["pos_table"] = sinusoid_table(201, D_K)
    # attention2 (ScaledDotProductAttention): tline + bn (eval)
    p["tline2_w"] = normal(ks[16], (N_HEAD * N_HEAD, D_MODEL))
    p["tline2_b"] = normal(ks[17], (D_MODEL,), 0.02)
    p["bn2_g"] = 1.0 + normal(ks[18], (D_MODEL,), 0.05)
    p["bn2_b"] = normal(ks[19], (D_MODEL,), 0.05)
    # fc2, layer_norm
    p["fc2_w"] = normal(ks[20], (HEAD_FIRST * D_MODEL, D_MODEL))
    p["fc2_b"] = normal(ks[21], (D_MODEL,), 0.02)
    p["ln_g"] = 1.0 + normal(ks[22], (D_MODEL,), 0.05)
    p["ln_b"] = normal(ks[23], (D_MODEL,), 0.05)
    # PositionwiseFeedForwardUseConv (1x1 convs -> linears)
    p["ffn_w1"] = normal(ks[24], (D_MODEL, D_INNER))
    p["ffn_b1"] = normal(ks[25], (D_INNER,), 0.02)
    p["ffn_w2"] = normal(ks[26], (D_INNER, D_MODEL))
    p["ffn_b2"] = normal(ks[27], (D_MODEL,), 0.02)
    # gate scalars (module inits a_r=0, b_r=1 which would zero the attention
    # contribution; use non-trivial deterministic values so the kernel matters)
    p["a_r"] = 0.5
    p["b_r"] = 1.25
    return p


def prepare_params(p):
    """One-time host-side folding of weights for the fused kernel."""
    hp = jax.lax.Precision.HIGHEST
    inv = float(1.0 / np.sqrt(1.0 + EPS_BN))     # eval BN: running mean=0, var=1
    D = D_MODEL

    # positional index table (src_word_emb rows 1..8 + sinusoid positions 0..7)
    idx = p["src_word_emb"][1:N_HEAD + 1] + p["pos_table"][:N_HEAD]   # [8, 16]
    idx_flat = idx.reshape(1, GRP)                                    # [1, 128]

    def fuse_proj(w1, b1, w2, b2):
        # (x @ w1 + b1).reshape(., 12, 32) @ w2 + b2 + idx  ->  x @ wf + bf
        w1_3 = w1.reshape(D, HEAD_FIRST, D)
        wf = jnp.einsum("kgj,jc->kgc", w1_3, w2,
                        precision=hp).reshape(D, HEAD_FIRST * GRP)
        bf = (jnp.einsum("gj,jc->gc", b1.reshape(HEAD_FIRST, D), w2, precision=hp)
              + b2[None, :] + idx_flat).reshape(1, HEAD_FIRST * GRP)
        return wf, bf

    wq_f, bq_f = fuse_proj(p["w_qs"], p["b_qs"], p["w_qs2"], p["b_qs2"])
    wk_f, bk_f = fuse_proj(p["w_ks"], p["b_ks"], p["w_ks2"], p["b_ks2"])

    # attention2 output linear with its eval-BatchNorm folded in
    bn2s = p["bn2_g"] * inv
    t2w3 = (p["tline2_w"] * bn2s[None, :]).reshape(N_HEAD, N_HEAD, D)   # [8,8,32]
    t2b = (p["tline2_b"] * bn2s + p["bn2_b"]).reshape(1, D)

    # fc2 with the head-first transpose folded into a per-group weight and the
    # -a_r gate folded in; b_r gate folded into LayerNorm affine.
    a_r, b_r = p["a_r"], p["b_r"]
    fc2w = (-a_r) * jnp.transpose(p["fc2_w"].reshape(D, HEAD_FIRST, D), (1, 0, 2))
    fc2b = ((-a_r) * p["fc2_b"]).reshape(1, D)
    lng = (b_r * p["ln_g"]).reshape(1, D)
    lnb = (b_r * p["ln_b"]).reshape(1, D)

    # constant 0/1 matrices: lane-tile ([16,128]) and 16-lane segment sum ([128,8])
    c = np.arange(GRP)
    seg = (c[:, None] // D_K == np.arange(N_HEAD)[None, :]).astype(np.float32)
    tilemat = (np.arange(D_K)[:, None] == (c[None, :] % D_K)).astype(np.float32)

    return {
        "ent_emb": p["ent_emb"],
        "rel_emb": p["rel_emb"],
        "ebs": (p["ent_bn_g"] * inv).reshape(1, D),
        "ebb": p["ent_bn_b"].reshape(1, D),
        "rbs": (p["rel_bn_g"] * inv).reshape(1, D),
        "rbb": p["rel_bn_b"].reshape(1, D),
        "wq_f": wq_f, "bq_f": bq_f, "wk_f": wk_f, "bk_f": bk_f,
        "tilemat": jnp.asarray(tilemat), "seg": jnp.asarray(seg),
        "t2w3": t2w3, "t2b": t2b, "fc2w": fc2w, "fc2b": fc2b,
        "lng": lng, "lnb": lnb,
        "w1": p["ffn_w1"], "b1": p["ffn_b1"].reshape(1, D_INNER),
        "w2": p["ffn_w2"], "b2": p["ffn_b2"].reshape(1, D),
        "embt": p["ent_emb"].T,                       # one-time transpose
        "nb": p["node_bias"].reshape(1, NUM_NODES),
    }


# ------------------------------ forward pass ----------------------------------
def sattle_forward(prepared, edges):
    B = edges.shape[0]
    # embedding gathers (wrapper glue)
    h0 = prepared["ent_emb"][edges[:, 0]]                 # [B, D]
    r0 = prepared["rel_emb"][edges[:, 1]]                 # [B, D]

    inputs = (
        h0, r0,
        prepared["ebs"], prepared["ebb"], prepared["rbs"], prepared["rbb"],
        prepared["wq_f"], prepared["bq_f"], prepared["wk_f"], prepared["bk_f"],
        prepared["tilemat"], prepared["seg"],
        prepared["t2w3"], prepared["t2b"], prepared["fc2w"], prepared["fc2b"],
        prepared["lng"], prepared["lnb"],
        prepared["w1"], prepared["b1"], prepared["w2"], prepared["b2"],
        prepared["embt"], prepared["nb"],
    )

    def full_spec(arr):
        nd = arr.ndim
        return pl.BlockSpec(arr.shape, lambda i, _nd=nd: (0,) * _nd)

    return pl.pallas_call(
        _sattle_fused_kernel,
        grid=(1,),
        in_specs=[full_spec(x) for x in inputs],
        out_specs=pl.BlockSpec((B, NUM_NODES), lambda i: (0, 0)),
        out_shape=jax.ShapeDtypeStruct((B, NUM_NODES), jnp.float32),
        scratch_shapes=[
            pltpu.VMEM((HEAD_FIRST * B, GRP), jnp.float32),     # q relayout
            pltpu.VMEM((HEAD_FIRST * B, GRP), jnp.float32),     # k relayout
            pltpu.VMEM((HEAD_FIRST * B, D_MODEL), jnp.float32), # attention2 out
        ],
        compiler_params=pltpu.CompilerParams(
            dimension_semantics=("arbitrary",)),
    )(*inputs)


# ------------------------------ pure-JAX reference ----------------------------
def sattle_forward_ref(params, edges):
    hp = lax.Precision.HIGHEST
    inv = 1.0 / np.sqrt(1.0 + EPS_BN)
    B = edges.shape[0]
    h = params["ent_emb"][edges[:, 0]] * (params["ent_bn_g"] * inv) + params["ent_bn_b"]
    r = params["rel_emb"][edges[:, 1]] * (params["rel_bn_g"] * inv) + params["rel_bn_b"]
    re_q = (jnp.dot(h, params["w_qs"], precision=hp) + params["b_qs"]).reshape(-1, D_MODEL)
    re_k = (jnp.dot(r, params["w_ks"], precision=hp) + params["b_ks"]).reshape(-1, D_MODEL)
    qa = (jnp.dot(re_q, params["w_qs2"], precision=hp) + params["b_qs2"]).reshape(
        -1, N_HEAD, D_K
    )
    ka = (jnp.dot(re_k, params["w_ks2"], precision=hp) + params["b_ks2"]).reshape(
        -1, N_HEAD, D_K
    )
    idx = params["src_word_emb"][1 : N_HEAD + 1] + params["pos_table"][:N_HEAD]
    qa = qa + idx
    ka = ka + idx
    s2 = jnp.einsum("bhd,bgd->bhg", ka, qa, precision=hp)          # k @ q^T
    flat = s2.reshape(-1, N_HEAD * N_HEAD)
    out2 = jnp.dot(flat, params["tline2_w"], precision=hp) + params["tline2_b"]
    out2 = out2 * (params["bn2_g"] * inv) + params["bn2_b"]
    out2_flat = out2.reshape(B, HEAD_FIRST, D_MODEL).transpose(0, 2, 1).reshape(B, -1)
    out2_fc = jnp.dot(out2_flat, params["fc2_w"], precision=hp) + params["fc2_b"]
    t = -params["a_r"] * out2_fc + r
    mu = t.mean(-1, keepdims=True)
    var = ((t - mu) ** 2).mean(-1, keepdims=True)
    y = (t - mu) / jnp.sqrt(var + EPS_LN) * params["ln_g"] + params["ln_b"]
    mha = params["b_r"] * y
    hid = jnp.maximum(jnp.dot(mha, params["ffn_w1"], precision=hp) + params["ffn_b1"], 0.0)
    ff = jnp.dot(hid, params["ffn_w2"], precision=hp) + params["ffn_b2"] + mha
    return jnp.dot(ff, params["ent_emb"].T, precision=hp) + params["node_bias"]


# ------------------------------------ main ------------------------------------
if __name__ == "__main__":
    key = jax.random.PRNGKey(0)
    k_params, k_h, k_r, k_t = jax.random.split(key, 4)
    params = init_params(k_params)
    prepared = prepare_params(params)

    # edges: [B, 3] int32 = (head entity, relation, tail entity)
    edges = jnp.stack(
        [
            jax.random.randint(k_h, (BATCH,), 0, NUM_NODES),
            jax.random.randint(k_r, (BATCH,), 0, 2 * NUM_RELS),
            jax.random.randint(k_t, (BATCH,), 0, NUM_NODES),
        ],
        axis=1,
    ).astype(jnp.int32)

    fwd = jax.jit(functools.partial(sattle_forward, prepared))
    scores = fwd(edges)
    jax.block_until_ready(scores)

    ref = sattle_forward_ref(params, edges)
    np.testing.assert_allclose(
        np.asarray(scores), np.asarray(ref), rtol=5e-2, atol=2e-2
    )
    assert scores.shape == (BATCH, NUM_NODES)
    print("KERNEL_OK")
</pallas_src>

<mosaic_0001>
module attributes {stable_mosaic.version = 11 : i64} {
  func.func @_sattle_fused_kernel(%arg0: i32, %arg1: memref<4x32xf32, #tpu.memory_space<vmem>>, %arg2: memref<4x32xf32, #tpu.memory_space<vmem>>, %arg3: memref<1x32xf32, #tpu.memory_space<vmem>>, %arg4: memref<1x32xf32, #tpu.memory_space<vmem>>, %arg5: memref<1x32xf32, #tpu.memory_space<vmem>>, %arg6: memref<1x32xf32, #tpu.memory_space<vmem>>, %arg7: memref<32x1536xf32, #tpu.memory_space<vmem>>, %arg8: memref<1x1536xf32, #tpu.memory_space<vmem>>, %arg9: memref<32x1536xf32, #tpu.memory_space<vmem>>, %arg10: memref<1x1536xf32, #tpu.memory_space<vmem>>, %arg11: memref<16x128xf32, #tpu.memory_space<vmem>>, %arg12: memref<128x8xf32, #tpu.memory_space<vmem>>, %arg13: memref<8x8x32xf32, #tpu.memory_space<vmem>>, %arg14: memref<1x32xf32, #tpu.memory_space<vmem>>, %arg15: memref<12x32x32xf32, #tpu.memory_space<vmem>>, %arg16: memref<1x32xf32, #tpu.memory_space<vmem>>, %arg17: memref<1x32xf32, #tpu.memory_space<vmem>>, %arg18: memref<1x32xf32, #tpu.memory_space<vmem>>, %arg19: memref<32x64xf32, #tpu.memory_space<vmem>>, %arg20: memref<1x64xf32, #tpu.memory_space<vmem>>, %arg21: memref<64x32xf32, #tpu.memory_space<vmem>>, %arg22: memref<1x32xf32, #tpu.memory_space<vmem>>, %arg23: memref<32x100xf32, #tpu.memory_space<vmem>>, %arg24: memref<1x100xf32, #tpu.memory_space<vmem>>, %arg25: memref<4x100xf32, #tpu.memory_space<vmem>>, %arg26: memref<48x128xf32, #tpu.memory_space<vmem>>, %arg27: memref<48x128xf32, #tpu.memory_space<vmem>>, %arg28: memref<48x32xf32, #tpu.memory_space<vmem>>) attributes {dimension_semantics = [#tpu.dimension_semantics<arbitrary>], iteration_bounds = array<i64: 1>, scalar_prefetch = 0 : i64, scratch_operands = 3 : i64, tpu.core_type = #tpu.core_type<tc>, window_params = [{pipeline_mode = #tpu.pipeline_mode<synchronous>, transform_indices = @transform_0, window_bounds = array<i64: 4, 32>}, {pipeline_mode = #tpu.pipeline_mode<synchronous>, transform_indices = @transform_1, window_bounds = array<i64: 4, 32>}, {pipeline_mode = #tpu.pipeline_mode<synchronous>, transform_indices = @transform_2, window_bounds = array<i64: 1, 32>}, {pipeline_mode = #tpu.pipeline_mode<synchronous>, transform_indices = @transform_3, window_bounds = array<i64: 1, 32>}, {pipeline_mode = #tpu.pipeline_mode<synchronous>, transform_indices = @transform_4, window_bounds = array<i64: 1, 32>}, {pipeline_mode = #tpu.pipeline_mode<synchronous>, transform_indices = @transform_5, window_bounds = array<i64: 1, 32>}, {pipeline_mode = #tpu.pipeline_mode<synchronous>, transform_indices = @transform_6, window_bounds = array<i64: 32, 1536>}, {pipeline_mode = #tpu.pipeline_mode<synchronous>, transform_indices = @transform_7, window_bounds = array<i64: 1, 1536>}, {pipeline_mode = #tpu.pipeline_mode<synchronous>, transform_indices = @transform_8, window_bounds = array<i64: 32, 1536>}, {pipeline_mode = #tpu.pipeline_mode<synchronous>, transform_indices = @transform_9, window_bounds = array<i64: 1, 1536>}, {pipeline_mode = #tpu.pipeline_mode<synchronous>, transform_indices = @transform_10, window_bounds = array<i64: 16, 128>}, {pipeline_mode = #tpu.pipeline_mode<synchronous>, transform_indices = @transform_11, window_bounds = array<i64: 128, 8>}, {pipeline_mode = #tpu.pipeline_mode<synchronous>, transform_indices = @transform_12, window_bounds = array<i64: 8, 8, 32>}, {pipeline_mode = #tpu.pipeline_mode<synchronous>, transform_indices = @transform_13, window_bounds = array<i64: 1, 32>}, {pipeline_mode = #tpu.pipeline_mode<synchronous>, transform_indices = @transform_14, window_bounds = array<i64: 12, 32, 32>}, {pipeline_mode = #tpu.pipeline_mode<synchronous>, transform_indices = @transform_15, window_bounds = array<i64: 1, 32>}, {pipeline_mode = #tpu.pipeline_mode<synchronous>, transform_indices = @transform_16, window_bounds = array<i64: 1, 32>}, {pipeline_mode = #tpu.pipeline_mode<synchronous>, transform_indices = @transform_17, window_bounds = array<i64: 1, 32>}, {pipeline_mode = #tpu.pipeline_mode<synchronous>, transform_indices = @transform_18, window_bounds = array<i64: 32, 64>}, {pipeline_mode = #tpu.pipeline_mode<synchronous>, transform_indices = @transform_19, window_bounds = array<i64: 1, 64>}, {pipeline_mode = #tpu.pipeline_mode<synchronous>, transform_indices = @transform_20, window_bounds = array<i64: 64, 32>}, {pipeline_mode = #tpu.pipeline_mode<synchronous>, transform_indices = @transform_21, window_bounds = array<i64: 1, 32>}, {pipeline_mode = #tpu.pipeline_mode<synchronous>, transform_indices = @transform_22, window_bounds = array<i64: 32, 100>}, {pipeline_mode = #tpu.pipeline_mode<synchronous>, transform_indices = @transform_23, window_bounds = array<i64: 1, 100>}, {pipeline_mode = #tpu.pipeline_mode<synchronous>, transform_indices = @transform_24, window_bounds = array<i64: 4, 100>}]} {
    %c0 = arith.constant 0 : index
    %c0_0 = arith.constant 0 : index
    %0 = vector.load %arg1[%c0, %c0_0] : memref<4x32xf32, #tpu.memory_space<vmem>>, vector<4x32xf32>
    %c0_1 = arith.constant 0 : index
    %c0_2 = arith.constant 0 : index
    %1 = vector.load %arg3[%c0_1, %c0_2] : memref<1x32xf32, #tpu.memory_space<vmem>>, vector<1x32xf32>
    %2 = vector.broadcast %1 : vector<1x32xf32> to vector<4x32xf32>
    %3 = arith.mulf %0, %2 : vector<4x32xf32>
    %c0_3 = arith.constant 0 : index
    %c0_4 = arith.constant 0 : index
    %4 = vector.load %arg4[%c0_3, %c0_4] : memref<1x32xf32, #tpu.memory_space<vmem>>, vector<1x32xf32>
    %5 = vector.broadcast %4 : vector<1x32xf32> to vector<4x32xf32>
    %6 = arith.addf %3, %5 : vector<4x32xf32>
    %c0_5 = arith.constant 0 : index
    %c0_6 = arith.constant 0 : index
    %7 = vector.load %arg2[%c0_5, %c0_6] : memref<4x32xf32, #tpu.memory_space<vmem>>, vector<4x32xf32>
    %c0_7 = arith.constant 0 : index
    %c0_8 = arith.constant 0 : index
    %8 = vector.load %arg5[%c0_7, %c0_8] : memref<1x32xf32, #tpu.memory_space<vmem>>, vector<1x32xf32>
    %9 = vector.broadcast %8 : vector<1x32xf32> to vector<4x32xf32>
    %10 = arith.mulf %7, %9 : vector<4x32xf32>
    %c0_9 = arith.constant 0 : index
    %c0_10 = arith.constant 0 : index
    %11 = vector.load %arg6[%c0_9, %c0_10] : memref<1x32xf32, #tpu.memory_space<vmem>>, vector<1x32xf32>
    %12 = vector.broadcast %11 : vector<1x32xf32> to vector<4x32xf32>
    %13 = arith.addf %10, %12 : vector<4x32xf32>
    %c0_11 = arith.constant 0 : index
    %c0_12 = arith.constant 0 : index
    %14 = vector.load %arg7[%c0_11, %c0_12] : memref<32x1536xf32, #tpu.memory_space<vmem>>, vector<32x1536xf32>
    %cst = arith.constant dense<0.000000e+00> : vector<4x1536xf32>
    %15 = tpu.matmul %6, %14, %cst {dimension_numbers = #tpu.dot_dimension_numbers<[1], [0], [0], [1], [0, 0, 1, 1], [], []>} : vector<4x32xf32>, vector<32x1536xf32>, vector<4x1536xf32> -> vector<4x1536xf32>
    %c0_13 = arith.constant 0 : index
    %c0_14 = arith.constant 0 : index
    %16 = vector.load %arg8[%c0_13, %c0_14] : memref<1x1536xf32, #tpu.memory_space<vmem>>, vector<1x1536xf32>
    %17 = vector.broadcast %16 : vector<1x1536xf32> to vector<4x1536xf32>
    %18 = arith.addf %15, %17 : vector<4x1536xf32>
    %c0_15 = arith.constant 0 : index
    %c0_16 = arith.constant 0 : index
    %19 = vector.load %arg9[%c0_15, %c0_16] : memref<32x1536xf32, #tpu.memory_space<vmem>>, vector<32x1536xf32>
    %cst_17 = arith.constant dense<0.000000e+00> : vector<4x1536xf32>
    %20 = tpu.matmul %13, %19, %cst_17 {dimension_numbers = #tpu.dot_dimension_numbers<[1], [0], [0], [1], [0, 0, 1, 1], [], []>} : vector<4x32xf32>, vector<32x1536xf32>, vector<4x1536xf32> -> vector<4x1536xf32>
    %c0_18 = arith.constant 0 : index
    %c0_19 = arith.constant 0 : index
    %21 = vector.load %arg10[%c0_18, %c0_19] : memref<1x1536xf32, #tpu.memory_space<vmem>>, vector<1x1536xf32>
    %22 = vector.broadcast %21 : vector<1x1536xf32> to vector<4x1536xf32>
    %23 = arith.addf %20, %22 : vector<4x1536xf32>
    %24 = vector.extract_strided_slice %18 {offsets = [0, 0], sizes = [4, 128], strides = [1, 1]} : vector<4x1536xf32> to vector<4x128xf32>
    %c0_20 = arith.constant 0 : index
    %c0_21 = arith.constant 0 : index
    %25 = vector.load %arg26[%c0_20, %c0_21] : memref<48x128xf32, #tpu.memory_space<vmem>>, vector<4x128xf32>
    tpu.vector_store %arg26[%c0_20, %c0_21], %24 {strides = array<i32>} : memref<48x128xf32, #tpu.memory_space<vmem>>, vector<4x128xf32>,
    %26 = vector.extract_strided_slice %23 {offsets = [0, 0], sizes = [4, 128], strides = [1, 1]} : vector<4x1536xf32> to vector<4x128xf32>
    %c0_22 = arith.constant 0 : index
    %c0_23 = arith.constant 0 : index
    %27 = vector.load %arg27[%c0_22, %c0_23] : memref<48x128xf32, #tpu.memory_space<vmem>>, vector<4x128xf32>
    tpu.vector_store %arg27[%c0_22, %c0_23], %26 {strides = array<i32>} : memref<48x128xf32, #tpu.memory_space<vmem>>, vector<4x128xf32>,
    %28 = vector.extract_strided_slice %18 {offsets = [0, 128], sizes = [4, 128], strides = [1, 1]} : vector<4x1536xf32> to vector<4x128xf32>
    %c4 = arith.constant 4 : index
    %c0_24 = arith.constant 0 : index
    %29 = vector.load %arg26[%c4, %c0_24] : memref<48x128xf32, #tpu.memory_space<vmem>>, vector<4x128xf32>
    tpu.vector_store %arg26[%c4, %c0_24], %28 {strides = array<i32>} : memref<48x128xf32, #tpu.memory_space<vmem>>, vector<4x128xf32>,
    %30 = vector.extract_strided_slice %23 {offsets = [0, 128], sizes = [4, 128], strides = [1, 1]} : vector<4x1536xf32> to vector<4x128xf32>
    %c4_25 = arith.constant 4 : index
    %c0_26 = arith.constant 0 : index
    %31 = vector.load %arg27[%c4_25, %c0_26] : memref<48x128xf32, #tpu.memory_space<vmem>>, vector<4x128xf32>
    tpu.vector_store %arg27[%c4_25, %c0_26], %30 {strides = array<i32>} : memref<48x128xf32, #tpu.memory_space<vmem>>, vector<4x128xf32>,
    %32 = vector.extract_strided_slice %18 {offsets = [0, 256], sizes = [4, 128], strides = [1, 1]} : vector<4x1536xf32> to vector<4x128xf32>
    %c8 = arith.constant 8 : index
    %c0_27 = arith.constant 0 : index
    %33 = vector.load %arg26[%c8, %c0_27] : memref<48x128xf32, #tpu.memory_space<vmem>>, vector<4x128xf32>
    tpu.vector_store %arg26[%c8, %c0_27], %32 {strides = array<i32>} : memref<48x128xf32, #tpu.memory_space<vmem>>, vector<4x128xf32>,
    %34 = vector.extract_strided_slice %23 {offsets = [0, 256], sizes = [4, 128], strides = [1, 1]} : vector<4x1536xf32> to vector<4x128xf32>
    %c8_28 = arith.constant 8 : index
    %c0_29 = arith.constant 0 : index
    %35 = vector.load %arg27[%c8_28, %c0_29] : memref<48x128xf32, #tpu.memory_space<vmem>>, vector<4x128xf32>
    tpu.vector_store %arg27[%c8_28, %c0_29], %34 {strides = array<i32>} : memref<48x128xf32, #tpu.memory_space<vmem>>, vector<4x128xf32>,
    %36 = vector.extract_strided_slice %18 {offsets = [0, 384], sizes = [4, 128], strides = [1, 1]} : vector<4x1536xf32> to vector<4x128xf32>
    %c12 = arith.constant 12 : index
    %c0_30 = arith.constant 0 : index
    %37 = vector.load %arg26[%c12, %c0_30] : memref<48x128xf32, #tpu.memory_space<vmem>>, vector<4x128xf32>
    tpu.vector_store %arg26[%c12, %c0_30], %36 {strides = array<i32>} : memref<48x128xf32, #tpu.memory_space<vmem>>, vector<4x128xf32>,
    %38 = vector.extract_strided_slice %23 {offsets = [0, 384], sizes = [4, 128], strides = [1, 1]} : vector<4x1536xf32> to vector<4x128xf32>
    %c12_31 = arith.constant 12 : index
    %c0_32 = arith.constant 0 : index
    %39 = vector.load %arg27[%c12_31, %c0_32] : memref<48x128xf32, #tpu.memory_space<vmem>>, vector<4x128xf32>
    tpu.vector_store %arg27[%c12_31, %c0_32], %38 {strides = array<i32>} : memref<48x128xf32, #tpu.memory_space<vmem>>, vector<4x128xf32>,
    %40 = vector.extract_strided_slice %18 {offsets = [0, 512], sizes = [4, 128], strides = [1, 1]} : vector<4x1536xf32> to vector<4x128xf32>
    %c16 = arith.constant 16 : index
    %c0_33 = arith.constant 0 : index
    %41 = vector.load %arg26[%c16, %c0_33] : memref<48x128xf32, #tpu.memory_space<vmem>>, vector<4x128xf32>
    tpu.vector_store %arg26[%c16, %c0_33], %40 {strides = array<i32>} : memref<48x128xf32, #tpu.memory_space<vmem>>, vector<4x128xf32>,
    %42 = vector.extract_strided_slice %23 {offsets = [0, 512], sizes = [4, 128], strides = [1, 1]} : vector<4x1536xf32> to vector<4x128xf32>
    %c16_34 = arith.constant 16 : index
    %c0_35 = arith.constant 0 : index
    %43 = vector.load %arg27[%c16_34, %c0_35] : memref<48x128xf32, #tpu.memory_space<vmem>>, vector<4x128xf32>
    tpu.vector_store %arg27[%c16_34, %c0_35], %42 {strides = array<i32>} : memref<48x128xf32, #tpu.memory_space<vmem>>, vector<4x128xf32>,
    %44 = vector.extract_strided_slice %18 {offsets = [0, 640], sizes = [4, 128], strides = [1, 1]} : vector<4x1536xf32> to vector<4x128xf32>
    %c20 = arith.constant 20 : index
    %c0_36 = arith.constant 0 : index
    %45 = vector.load %arg26[%c20, %c0_36] : memref<48x128xf32, #tpu.memory_space<vmem>>, vector<4x128xf32>
    tpu.vector_store %arg26[%c20, %c0_36], %44 {strides = array<i32>} : memref<48x128xf32, #tpu.memory_space<vmem>>, vector<4x128xf32>,
    %46 = vector.extract_strided_slice %23 {offsets = [0, 640], sizes = [4, 128], strides = [1, 1]} : vector<4x1536xf32> to vector<4x128xf32>
    %c20_37 = arith.constant 20 : index
    %c0_38 = arith.constant 0 : index
    %47 = vector.load %arg27[%c20_37, %c0_38] : memref<48x128xf32, #tpu.memory_space<vmem>>, vector<4x128xf32>
    tpu.vector_store %arg27[%c20_37, %c0_38], %46 {strides = array<i32>} : memref<48x128xf32, #tpu.memory_space<vmem>>, vector<4x128xf32>,
    %48 = vector.extract_strided_slice %18 {offsets = [0, 768], sizes = [4, 128], strides = [1, 1]} : vector<4x1536xf32> to vector<4x128xf32>
    %c24 = arith.constant 24 : index
    %c0_39 = arith.constant 0 : index
    %49 = vector.load %arg26[%c24, %c0_39] : memref<48x128xf32, #tpu.memory_space<vmem>>, vector<4x128xf32>
    tpu.vector_store %arg26[%c24, %c0_39], %48 {strides = array<i32>} : memref<48x128xf32, #tpu.memory_space<vmem>>, vector<4x128xf32>,
    %50 = vector.extract_strided_slice %23 {offsets = [0, 768], sizes = [4, 128], strides = [1, 1]} : vector<4x1536xf32> to vector<4x128xf32>
    %c24_40 = arith.constant 24 : index
    %c0_41 = arith.constant 0 : index
    %51 = vector.load %arg27[%c24_40, %c0_41] : memref<48x128xf32, #tpu.memory_space<vmem>>, vector<4x128xf32>
    tpu.vector_store %arg27[%c24_40, %c0_41], %50 {strides = array<i32>} : memref<48x128xf32, #tpu.memory_space<vmem>>, vector<4x128xf32>,
    %52 = vector.extract_strided_slice %18 {offsets = [0, 896], sizes = [4, 128], strides = [1, 1]} : vector<4x1536xf32> to vector<4x128xf32>
    %c28 = arith.constant 28 : index
    %c0_42 = arith.constant 0 : index
    %53 = vector.load %arg26[%c28, %c0_42] : memref<48x128xf32, #tpu.memory_space<vmem>>, vector<4x128xf32>
    tpu.vector_store %arg26[%c28, %c0_42], %52 {strides = array<i32>} : memref<48x128xf32, #tpu.memory_space<vmem>>, vector<4x128xf32>,
    %54 = vector.extract_strided_slice %23 {offsets = [0, 896], sizes = [4, 128], strides = [1, 1]} : vector<4x1536xf32> to vector<4x128xf32>
    %c28_43 = arith.constant 28 : index
    %c0_44 = arith.constant 0 : index
    %55 = vector.load %arg27[%c28_43, %c0_44] : memref<48x128xf32, #tpu.memory_space<vmem>>, vector<4x128xf32>
    tpu.vector_store %arg27[%c28_43, %c0_44], %54 {strides = array<i32>} : memref<48x128xf32, #tpu.memory_space<vmem>>, vector<4x128xf32>,
    %56 = vector.extract_strided_slice %18 {offsets = [0, 1024], sizes = [4, 128], strides = [1, 1]} : vector<4x1536xf32> to vector<4x128xf32>
    %c32 = arith.constant 32 : index
    %c0_45 = arith.constant 0 : index
    %57 = vector.load %arg26[%c32, %c0_45] : memref<48x128xf32, #tpu.memory_space<vmem>>, vector<4x128xf32>
    tpu.vector_store %arg26[%c32, %c0_45], %56 {strides = array<i32>} : memref<48x128xf32, #tpu.memory_space<vmem>>, vector<4x128xf32>,
    %58 = vector.extract_strided_slice %23 {offsets = [0, 1024], sizes = [4, 128], strides = [1, 1]} : vector<4x1536xf32> to vector<4x128xf32>
    %c32_46 = arith.constant 32 : index
    %c0_47 = arith.constant 0 : index
    %59 = vector.load %arg27[%c32_46, %c0_47] : memref<48x128xf32, #tpu.memory_space<vmem>>, vector<4x128xf32>
    tpu.vector_store %arg27[%c32_46, %c0_47], %58 {strides = array<i32>} : memref<48x128xf32, #tpu.memory_space<vmem>>, vector<4x128xf32>,
    %60 = vector.extract_strided_slice %18 {offsets = [0, 1152], sizes = [4, 128], strides = [1, 1]} : vector<4x1536xf32> to vector<4x128xf32>
    %c36 = arith.constant 36 : index
    %c0_48 = arith.constant 0 : index
    %61 = vector.load %arg26[%c36, %c0_48] : memref<48x128xf32, #tpu.memory_space<vmem>>, vector<4x128xf32>
    tpu.vector_store %arg26[%c36, %c0_48], %60 {strides = array<i32>} : memref<48x128xf32, #tpu.memory_space<vmem>>, vector<4x128xf32>,
    %62 = vector.extract_strided_slice %23 {offsets = [0, 1152], sizes = [4, 128], strides = [1, 1]} : vector<4x1536xf32> to vector<4x128xf32>
    %c36_49 = arith.constant 36 : index
    %c0_50 = arith.constant 0 : index
    %63 = vector.load %arg27[%c36_49, %c0_50] : memref<48x128xf32, #tpu.memory_space<vmem>>, vector<4x128xf32>
    tpu.vector_store %arg27[%c36_49, %c0_50], %62 {strides = array<i32>} : memref<48x128xf32, #tpu.memory_space<vmem>>, vector<4x128xf32>,
    %64 = vector.extract_strided_slice %18 {offsets = [0, 1280], sizes = [4, 128], strides = [1, 1]} : vector<4x1536xf32> to vector<4x128xf32>
    %c40 = arith.constant 40 : index
    %c0_51 = arith.constant 0 : index
    %65 = vector.load %arg26[%c40, %c0_51] : memref<48x128xf32, #tpu.memory_space<vmem>>, vector<4x128xf32>
    tpu.vector_store %arg26[%c40, %c0_51], %64 {strides = array<i32>} : memref<48x128xf32, #tpu.memory_space<vmem>>, vector<4x128xf32>,
    %66 = vector.extract_strided_slice %23 {offsets = [0, 1280], sizes = [4, 128], strides = [1, 1]} : vector<4x1536xf32> to vector<4x128xf32>
    %c40_52 = arith.constant 40 : index
    %c0_53 = arith.constant 0 : index
    %67 = vector.load %arg27[%c40_52, %c0_53] : memref<48x128xf32, #tpu.memory_space<vmem>>, vector<4x128xf32>
    tpu.vector_store %arg27[%c40_52, %c0_53], %66 {strides = array<i32>} : memref<48x128xf32, #tpu.memory_space<vmem>>, vector<4x128xf32>,
    %68 = vector.extract_strided_slice %18 {offsets = [0, 1408], sizes = [4, 128], strides = [1, 1]} : vector<4x1536xf32> to vector<4x128xf32>
    %c44 = arith.constant 44 : index
    %c0_54 = arith.constant 0 : index
    %69 = vector.load %arg26[%c44, %c0_54] : memref<48x128xf32, #tpu.memory_space<vmem>>, vector<4x128xf32>
    tpu.vector_store %arg26[%c44, %c0_54], %68 {strides = array<i32>} : memref<48x128xf32, #tpu.memory_space<vmem>>, vector<4x128xf32>,
    %70 = vector.extract_strided_slice %23 {offsets = [0, 1408], sizes = [4, 128], strides = [1, 1]} : vector<4x1536xf32> to vector<4x128xf32>
    %c44_55 = arith.constant 44 : index
    %c0_56 = arith.constant 0 : index
    %71 = vector.load %arg27[%c44_55, %c0_56] : memref<48x128xf32, #tpu.memory_space<vmem>>, vector<4x128xf32>
    tpu.vector_store %arg27[%c44_55, %c0_56], %70 {strides = array<i32>} : memref<48x128xf32, #tpu.memory_space<vmem>>, vector<4x128xf32>,
    %c0_57 = arith.constant 0 : index
    %c0_58 = arith.constant 0 : index
    %72 = vector.load %arg26[%c0_57, %c0_58] : memref<48x128xf32, #tpu.memory_space<vmem>>, vector<48x128xf32>
    %c0_59 = arith.constant 0 : index
    %c0_60 = arith.constant 0 : index
    %73 = vector.load %arg11[%c0_59, %c0_60] : memref<16x128xf32, #tpu.memory_space<vmem>>, vector<16x128xf32>
    %c0_61 = arith.constant 0 : index
    %c0_62 = arith.constant 0 : index
    %74 = vector.load %arg12[%c0_61, %c0_62] : memref<128x8xf32, #tpu.memory_space<vmem>>, vector<128x8xf32>
    %cst_63 = arith.constant 0.000000e+00 : f32
    %75 = vector.broadcast %cst_63 : f32 to vector<48x32xf32>
    %c0_64 = arith.constant 0 : index
    %c0_65 = arith.constant 0 : index
    %76 = vector.load %arg27[%c0_64, %c0_65] : memref<48x128xf32, #tpu.memory_space<vmem>>, vector<48x16xf32>
    %cst_66 = arith.constant dense<0.000000e+00> : vector<48x128xf32>
    %77 = tpu.matmul %76, %73, %cst_66 {dimension_numbers = #tpu.dot_dimension_numbers<[1], [0], [0], [1], [0, 0, 1, 1], [], []>} : vector<48x16xf32>, vector<16x128xf32>, vector<48x128xf32> -> vector<48x128xf32>
    %78 = arith.mulf %72, %77 : vector<48x128xf32>
    %cst_67 = arith.constant dense<0.000000e+00> : vector<48x8xf32>
    %79 = tpu.matmul %78, %74, %cst_67 {dimension_numbers = #tpu.dot_dimension_numbers<[1], [0], [0], [1], [0, 0, 1, 1], [], []>} : vector<48x128xf32>, vector<128x8xf32>, vector<48x8xf32> -> vector<48x8xf32>
    %c0_68 = arith.constant 0 : index
    %c0_69 = arith.constant 0 : index
    %c0_70 = arith.constant 0 : index
    %80 = vector.load %arg13[%c0_68, %c0_69, %c0_70] : memref<8x8x32xf32, #tpu.memory_space<vmem>>, vector<1x8x32xf32>
    %81 = vector.shape_cast %80 : vector<1x8x32xf32> to vector<8x32xf32>
    %cst_71 = arith.constant dense<0.000000e+00> : vector<48x32xf32>
    %82 = tpu.matmul %79, %81, %cst_71 {dimension_numbers = #tpu.dot_dimension_numbers<[1], [0], [0], [1], [0, 0, 1, 1], [], []>} : vector<48x8xf32>, vector<8x32xf32>, vector<48x32xf32> -> vector<48x32xf32>
    %83 = arith.addf %75, %82 : vector<48x32xf32>
    %c0_72 = arith.constant 0 : index
    %c16_73 = arith.constant 16 : index
    %84 = vector.load %arg27[%c0_72, %c16_73] : memref<48x128xf32, #tpu.memory_space<vmem>>, vector<48x16xf32>
    %cst_74 = arith.constant dense<0.000000e+00> : vector<48x128xf32>
    %85 = tpu.matmul %84, %73, %cst_74 {dimension_numbers = #tpu.dot_dimension_numbers<[1], [0], [0], [1], [0, 0, 1, 1], [], []>} : vector<48x16xf32>, vector<16x128xf32>, vector<48x128xf32> -> vector<48x128xf32>
    %86 = arith.mulf %72, %85 : vector<48x128xf32>
    %cst_75 = arith.constant dense<0.000000e+00> : vector<48x8xf32>
    %87 = tpu.matmul %86, %74, %cst_75 {dimension_numbers = #tpu.dot_dimension_numbers<[1], [0], [0], [1], [0, 0, 1, 1], [], []>} : vector<48x128xf32>, vector<128x8xf32>, vector<48x8xf32> -> vector<48x8xf32>
    %c1 = arith.constant 1 : index
    %c0_76 = arith.constant 0 : index
    %c0_77 = arith.constant 0 : index
    %88 = vector.load %arg13[%c1, %c0_76, %c0_77] : memref<8x8x32xf32, #tpu.memory_space<vmem>>, vector<1x8x32xf32>
    %89 = vector.shape_cast %88 : vector<1x8x32xf32> to vector<8x32xf32>
    %cst_78 = arith.constant dense<0.000000e+00> : vector<48x32xf32>
    %90 = tpu.matmul %87, %89, %cst_78 {dimension_numbers = #tpu.dot_dimension_numbers<[1], [0], [0], [1], [0, 0, 1, 1], [], []>} : vector<48x8xf32>, vector<8x32xf32>, vector<48x32xf32> -> vector<48x32xf32>
    %91 = arith.addf %83, %90 : vector<48x32xf32>
    %c0_79 = arith.constant 0 : index
    %c32_80 = arith.constant 32 : index
    %92 = vector.load %arg27[%c0_79, %c32_80] : memref<48x128xf32, #tpu.memory_space<vmem>>, vector<48x16xf32>
    %cst_81 = arith.constant dense<0.000000e+00> : vector<48x128xf32>
    %93 = tpu.matmul %92, %73, %cst_81 {dimension_numbers = #tpu.dot_dimension_numbers<[1], [0], [0], [1], [0, 0, 1, 1], [], []>} : vector<48x16xf32>, vector<16x128xf32>, vector<48x128xf32> -> vector<48x128xf32>
    %94 = arith.mulf %72, %93 : vector<48x128xf32>
    %cst_82 = arith.constant dense<0.000000e+00> : vector<48x8xf32>
    %95 = tpu.matmul %94, %74, %cst_82 {dimension_numbers = #tpu.dot_dimension_numbers<[1], [0], [0], [1], [0, 0, 1, 1], [], []>} : vector<48x128xf32>, vector<128x8xf32>, vector<48x8xf32> -> vector<48x8xf32>
    %c2 = arith.constant 2 : index
    %c0_83 = arith.constant 0 : index
    %c0_84 = arith.constant 0 : index
    %96 = vector.load %arg13[%c2, %c0_83, %c0_84] : memref<8x8x32xf32, #tpu.memory_space<vmem>>, vector<1x8x32xf32>
    %97 = vector.shape_cast %96 : vector<1x8x32xf32> to vector<8x32xf32>
    %cst_85 = arith.constant dense<0.000000e+00> : vector<48x32xf32>
    %98 = tpu.matmul %95, %97, %cst_85 {dimension_numbers = #tpu.dot_dimension_numbers<[1], [0], [0], [1], [0, 0, 1, 1], [], []>} : vector<48x8xf32>, vector<8x32xf32>, vector<48x32xf32> -> vector<48x32xf32>
    %99 = arith.addf %91, %98 : vector<48x32xf32>
    %c0_86 = arith.constant 0 : index
    %c48 = arith.constant 48 : index
    %100 = vector.load %arg27[%c0_86, %c48] : memref<48x128xf32, #tpu.memory_space<vmem>>, vector<48x16xf32>
    %cst_87 = arith.constant dense<0.000000e+00> : vector<48x128xf32>
    %101 = tpu.matmul %100, %73, %cst_87 {dimension_numbers = #tpu.dot_dimension_numbers<[1], [0], [0], [1], [0, 0, 1, 1], [], []>} : vector<48x16xf32>, vector<16x128xf32>, vector<48x128xf32> -> vector<48x128xf32>
    %102 = arith.mulf %72, %101 : vector<48x128xf32>
    %cst_88 = arith.constant dense<0.000000e+00> : vector<48x8xf32>
    %103 = tpu.matmul %102, %74, %cst_88 {dimension_numbers = #tpu.dot_dimension_numbers<[1], [0], [0], [1], [0, 0, 1, 1], [], []>} : vector<48x128xf32>, vector<128x8xf32>, vector<48x8xf32> -> vector<48x8xf32>
    %c3 = arith.constant 3 : index
    %c0_89 = arith.constant 0 : index
    %c0_90 = arith.constant 0 : index
    %104 = vector.load %arg13[%c3, %c0_89, %c0_90] : memref<8x8x32xf32, #tpu.memory_space<vmem>>, vector<1x8x32xf32>
    %105 = vector.shape_cast %104 : vector<1x8x32xf32> to vector<8x32xf32>
    %cst_91 = arith.constant dense<0.000000e+00> : vector<48x32xf32>
    %106 = tpu.matmul %103, %105, %cst_91 {dimension_numbers = #tpu.dot_dimension_numbers<[1], [0], [0], [1], [0, 0, 1, 1], [], []>} : vector<48x8xf32>, vector<8x32xf32>, vector<48x32xf32> -> vector<48x32xf32>
    %107 = arith.addf %99, %106 : vector<48x32xf32>
    %c0_92 = arith.constant 0 : index
    %c64 = arith.constant 64 : index
    %108 = vector.load %arg27[%c0_92, %c64] : memref<48x128xf32, #tpu.memory_space<vmem>>, vector<48x16xf32>
    %cst_93 = arith.constant dense<0.000000e+00> : vector<48x128xf32>
    %109 = tpu.matmul %108, %73, %cst_93 {dimension_numbers = #tpu.dot_dimension_numbers<[1], [0], [0], [1], [0, 0, 1, 1], [], []>} : vector<48x16xf32>, vector<16x128xf32>, vector<48x128xf32> -> vector<48x128xf32>
    %110 = arith.mulf %72, %109 : vector<48x128xf32>
    %cst_94 = arith.constant dense<0.000000e+00> : vector<48x8xf32>
    %111 = tpu.matmul %110, %74, %cst_94 {dimension_numbers = #tpu.dot_dimension_numbers<[1], [0], [0], [1], [0, 0, 1, 1], [], []>} : vector<48x128xf32>, vector<128x8xf32>, vector<48x8xf32> -> vector<48x8xf32>
    %c4_95 = arith.constant 4 : index
    %c0_96 = arith.constant 0 : index
    %c0_97 = arith.constant 0 : index
    %112 = vector.load %arg13[%c4_95, %c0_96, %c0_97] : memref<8x8x32xf32, #tpu.memory_space<vmem>>, vector<1x8x32xf32>
    %113 = vector.shape_cast %112 : vector<1x8x32xf32> to vector<8x32xf32>
    %cst_98 = arith.constant dense<0.000000e+00> : vector<48x32xf32>
    %114 = tpu.matmul %111, %113, %cst_98 {dimension_numbers = #tpu.dot_dimension_numbers<[1], [0], [0], [1], [0, 0, 1, 1], [], []>} : vector<48x8xf32>, vector<8x32xf32>, vector<48x32xf32> -> vector<48x32xf32>
    %115 = arith.addf %107, %114 : vector<48x32xf32>
    %c0_99 = arith.constant 0 : index
    %c80 = arith.constant 80 : index
    %116 = vector.load %arg27[%c0_99, %c80] : memref<48x128xf32, #tpu.memory_space<vmem>>, vector<48x16xf32>
    %cst_100 = arith.constant dense<0.000000e+00> : vector<48x128xf32>
    %117 = tpu.matmul %116, %73, %cst_100 {dimension_numbers = #tpu.dot_dimension_numbers<[1], [0], [0], [1], [0, 0, 1, 1], [], []>} : vector<48x16xf32>, vector<16x128xf32>, vector<48x128xf32> -> vector<48x128xf32>
    %118 = arith.mulf %72, %117 : vector<48x128xf32>
    %cst_101 = arith.constant dense<0.000000e+00> : vector<48x8xf32>
    %119 = tpu.matmul %118, %74, %cst_101 {dimension_numbers = #tpu.dot_dimension_numbers<[1], [0], [0], [1], [0, 0, 1, 1], [], []>} : vector<48x128xf32>, vector<128x8xf32>, vector<48x8xf32> -> vector<48x8xf32>
    %c5 = arith.constant 5 : index
    %c0_102 = arith.constant 0 : index
    %c0_103 = arith.constant 0 : index
    %120 = vector.load %arg13[%c5, %c0_102, %c0_103] : memref<8x8x32xf32, #tpu.memory_space<vmem>>, vector<1x8x32xf32>
    %121 = vector.shape_cast %120 : vector<1x8x32xf32> to vector<8x32xf32>
    %cst_104 = arith.constant dense<0.000000e+00> : vector<48x32xf32>
    %122 = tpu.matmul %119, %121, %cst_104 {dimension_numbers = #tpu.dot_dimension_numbers<[1], [0], [0], [1], [0, 0, 1, 1], [], []>} : vector<48x8xf32>, vector<8x32xf32>, vector<48x32xf32> -> vector<48x32xf32>
    %123 = arith.addf %115, %122 : vector<48x32xf32>
    %c0_105 = arith.constant 0 : index
    %c96 = arith.constant 96 : index
    %124 = vector.load %arg27[%c0_105, %c96] : memref<48x128xf32, #tpu.memory_space<vmem>>, vector<48x16xf32>
    %cst_106 = arith.constant dense<0.000000e+00> : vector<48x128xf32>
    %125 = tpu.matmul %124, %73, %cst_106 {dimension_numbers = #tpu.dot_dimension_numbers<[1], [0], [0], [1], [0, 0, 1, 1], [], []>} : vector<48x16xf32>, vector<16x128xf32>, vector<48x128xf32> -> vector<48x128xf32>
    %126 = arith.mulf %72, %125 : vector<48x128xf32>
    %cst_107 = arith.constant dense<0.000000e+00> : vector<48x8xf32>
    %127 = tpu.matmul %126, %74, %cst_107 {dimension_numbers = #tpu.dot_dimension_numbers<[1], [0], [0], [1], [0, 0, 1, 1], [], []>} : vector<48x128xf32>, vector<128x8xf32>, vector<48x8xf32> -> vector<48x8xf32>
    %c6 = arith.constant 6 : index
    %c0_108 = arith.constant 0 : index
    %c0_109 = arith.constant 0 : index
    %128 = vector.load %arg13[%c6, %c0_108, %c0_109] : memref<8x8x32xf32, #tpu.memory_space<vmem>>, vector<1x8x32xf32>
    %129 = vector.shape_cast %128 : vector<1x8x32xf32> to vector<8x32xf32>
    %cst_110 = arith.constant dense<0.000000e+00> : vector<48x32xf32>
    %130 = tpu.matmul %127, %129, %cst_110 {dimension_numbers = #tpu.dot_dimension_numbers<[1], [0], [0], [1], [0, 0, 1, 1], [], []>} : vector<48x8xf32>, vector<8x32xf32>, vector<48x32xf32> -> vector<48x32xf32>
    %131 = arith.addf %123, %130 : vector<48x32xf32>
    %c0_111 = arith.constant 0 : index
    %c112 = arith.constant 112 : index
    %132 = vector.load %arg27[%c0_111, %c112] : memref<48x128xf32, #tpu.memory_space<vmem>>, vector<48x16xf32>
    %cst_112 = arith.constant dense<0.000000e+00> : vector<48x128xf32>
    %133 = tpu.matmul %132, %73, %cst_112 {dimension_numbers = #tpu.dot_dimension_numbers<[1], [0], [0], [1], [0, 0, 1, 1], [], []>} : vector<48x16xf32>, vector<16x128xf32>, vector<48x128xf32> -> vector<48x128xf32>
    %134 = arith.mulf %72, %133 : vector<48x128xf32>
    %cst_113 = arith.constant dense<0.000000e+00> : vector<48x8xf32>
    %135 = tpu.matmul %134, %74, %cst_113 {dimension_numbers = #tpu.dot_dimension_numbers<[1], [0], [0], [1], [0, 0, 1, 1], [], []>} : vector<48x128xf32>, vector<128x8xf32>, vector<48x8xf32> -> vector<48x8xf32>
    %c7 = arith.constant 7 : index
    %c0_114 = arith.constant 0 : index
    %c0_115 = arith.constant 0 : index
    %136 = vector.load %arg13[%c7, %c0_114, %c0_115] : memref<8x8x32xf32, #tpu.memory_space<vmem>>, vector<1x8x32xf32>
    %137 = vector.shape_cast %136 : vector<1x8x32xf32> to vector<8x32xf32>
    %cst_116 = arith.constant dense<0.000000e+00> : vector<48x32xf32>
    %138 = tpu.matmul %135, %137, %cst_116 {dimension_numbers = #tpu.dot_dimension_numbers<[1], [0], [0], [1], [0, 0, 1, 1], [], []>} : vector<48x8xf32>, vector<8x32xf32>, vector<48x32xf32> -> vector<48x32xf32>
    %139 = arith.addf %131, %138 : vector<48x32xf32>
    %c0_117 = arith.constant 0 : index
    %c0_118 = arith.constant 0 : index
    %140 = vector.load %arg14[%c0_117, %c0_118] : memref<1x32xf32, #tpu.memory_space<vmem>>, vector<1x32xf32>
    %141 = vector.broadcast %140 : vector<1x32xf32> to vector<48x32xf32>
    %142 = arith.addf %139, %141 : vector<48x32xf32>
    %c0_119 = arith.constant 0 : index
    %c0_120 = arith.constant 0 : index
    %143 = vector.load %arg28[%c0_119, %c0_120] : memref<48x32xf32, #tpu.memory_space<vmem>>, vector<48x32xf32>
    tpu.vector_store %arg28[%c0_119, %c0_120], %142 {strides = array<i32>} : memref<48x32xf32, #tpu.memory_space<vmem>>, vector<48x32xf32>,
    %c0_121 = arith.constant 0 : index
    %c0_122 = arith.constant 0 : index
    %144 = vector.load %arg16[%c0_121, %c0_122] : memref<1x32xf32, #tpu.memory_space<vmem>>, vector<1x32xf32>
    %145 = vector.broadcast %144 : vector<1x32xf32> to vector<4x32xf32>
    %146 = arith.addf %13, %145 : vector<4x32xf32>
    %c0_123 = arith.constant 0 : index
    %c0_124 = arith.constant 0 : index
    %147 = vector.load %arg28[%c0_123, %c0_124] : memref<48x32xf32, #tpu.memory_space<vmem>>, vector<4x32xf32>
    %c0_125 = arith.constant 0 : index
    %c0_126 = arith.constant 0 : index
    %c0_127 = arith.constant 0 : index
    %148 = vector.load %arg15[%c0_125, %c0_126, %c0_127] : memref<12x32x32xf32, #tpu.memory_space<vmem>>, vector<1x32x32xf32>
    %149 = vector.shape_cast %148 : vector<1x32x32xf32> to vector<32x32xf32>
    %cst_128 = arith.constant dense<0.000000e+00> : vector<4x32xf32>
    %150 = tpu.matmul %147, %149, %cst_128 {dimension_numbers = #tpu.dot_dimension_numbers<[1], [0], [0], [1], [0, 0, 1, 1], [], []>} : vector<4x32xf32>, vector<32x32xf32>, vector<4x32xf32> -> vector<4x32xf32>
    %151 = arith.addf %146, %150 : vector<4x32xf32>
    %c4_129 = arith.constant 4 : index
    %c0_130 = arith.constant 0 : index
    %152 = vector.load %arg28[%c4_129, %c0_130] : memref<48x32xf32, #tpu.memory_space<vmem>>, vector<4x32xf32>
    %c1_131 = arith.constant 1 : index
    %c0_132 = arith.constant 0 : index
    %c0_133 = arith.constant 0 : index
    %153 = vector.load %arg15[%c1_131, %c0_132, %c0_133] : memref<12x32x32xf32, #tpu.memory_space<vmem>>, vector<1x32x32xf32>
    %154 = vector.shape_cast %153 : vector<1x32x32xf32> to vector<32x32xf32>
    %cst_134 = arith.constant dense<0.000000e+00> : vector<4x32xf32>
    %155 = tpu.matmul %152, %154, %cst_134 {dimension_numbers = #tpu.dot_dimension_numbers<[1], [0], [0], [1], [0, 0, 1, 1], [], []>} : vector<4x32xf32>, vector<32x32xf32>, vector<4x32xf32> -> vector<4x32xf32>
    %156 = arith.addf %151, %155 : vector<4x32xf32>
    %c8_135 = arith.constant 8 : index
    %c0_136 = arith.constant 0 : index
    %157 = vector.load %arg28[%c8_135, %c0_136] : memref<48x32xf32, #tpu.memory_space<vmem>>, vector<4x32xf32>
    %c2_137 = arith.constant 2 : index
    %c0_138 = arith.constant 0 : index
    %c0_139 = arith.constant 0 : index
    %158 = vector.load %arg15[%c2_137, %c0_138, %c0_139] : memref<12x32x32xf32, #tpu.memory_space<vmem>>, vector<1x32x32xf32>
    %159 = vector.shape_cast %158 : vector<1x32x32xf32> to vector<32x32xf32>
    %cst_140 = arith.constant dense<0.000000e+00> : vector<4x32xf32>
    %160 = tpu.matmul %157, %159, %cst_140 {dimension_numbers = #tpu.dot_dimension_numbers<[1], [0], [0], [1], [0, 0, 1, 1], [], []>} : vector<4x32xf32>, vector<32x32xf32>, vector<4x32xf32> -> vector<4x32xf32>
    %161 = arith.addf %156, %160 : vector<4x32xf32>
    %c12_141 = arith.constant 12 : index
    %c0_142 = arith.constant 0 : index
    %162 = vector.load %arg28[%c12_141, %c0_142] : memref<48x32xf32, #tpu.memory_space<vmem>>, vector<4x32xf32>
    %c3_143 = arith.constant 3 : index
    %c0_144 = arith.constant 0 : index
    %c0_145 = arith.constant 0 : index
    %163 = vector.load %arg15[%c3_143, %c0_144, %c0_145] : memref<12x32x32xf32, #tpu.memory_space<vmem>>, vector<1x32x32xf32>
    %164 = vector.shape_cast %163 : vector<1x32x32xf32> to vector<32x32xf32>
    %cst_146 = arith.constant dense<0.000000e+00> : vector<4x32xf32>
    %165 = tpu.matmul %162, %164, %cst_146 {dimension_numbers = #tpu.dot_dimension_numbers<[1], [0], [0], [1], [0, 0, 1, 1], [], []>} : vector<4x32xf32>, vector<32x32xf32>, vector<4x32xf32> -> vector<4x32xf32>
    %166 = arith.addf %161, %165 : vector<4x32xf32>
    %c16_147 = arith.constant 16 : index
    %c0_148 = arith.constant 0 : index
    %167 = vector.load %arg28[%c16_147, %c0_148] : memref<48x32xf32, #tpu.memory_space<vmem>>, vector<4x32xf32>
    %c4_149 = arith.constant 4 : index
    %c0_150 = arith.constant 0 : index
    %c0_151 = arith.constant 0 : index
    %168 = vector.load %arg15[%c4_149, %c0_150, %c0_151] : memref<12x32x32xf32, #tpu.memory_space<vmem>>, vector<1x32x32xf32>
    %169 = vector.shape_cast %168 : vector<1x32x32xf32> to vector<32x32xf32>
    %cst_152 = arith.constant dense<0.000000e+00> : vector<4x32xf32>
    %170 = tpu.matmul %167, %169, %cst_152 {dimension_numbers = #tpu.dot_dimension_numbers<[1], [0], [0], [1], [0, 0, 1, 1], [], []>} : vector<4x32xf32>, vector<32x32xf32>, vector<4x32xf32> -> vector<4x32xf32>
    %171 = arith.addf %166, %170 : vector<4x32xf32>
    %c20_153 = arith.constant 20 : index
    %c0_154 = arith.constant 0 : index
    %172 = vector.load %arg28[%c20_153, %c0_154] : memref<48x32xf32, #tpu.memory_space<vmem>>, vector<4x32xf32>
    %c5_155 = arith.constant 5 : index
    %c0_156 = arith.constant 0 : index
    %c0_157 = arith.constant 0 : index
    %173 = vector.load %arg15[%c5_155, %c0_156, %c0_157] : memref<12x32x32xf32, #tpu.memory_space<vmem>>, vector<1x32x32xf32>
    %174 = vector.shape_cast %173 : vector<1x32x32xf32> to vector<32x32xf32>
    %cst_158 = arith.constant dense<0.000000e+00> : vector<4x32xf32>
    %175 = tpu.matmul %172, %174, %cst_158 {dimension_numbers = #tpu.dot_dimension_numbers<[1], [0], [0], [1], [0, 0, 1, 1], [], []>} : vector<4x32xf32>, vector<32x32xf32>, vector<4x32xf32> -> vector<4x32xf32>
    %176 = arith.addf %171, %175 : vector<4x32xf32>
    %c24_159 = arith.constant 24 : index
    %c0_160 = arith.constant 0 : index
    %177 = vector.load %arg28[%c24_159, %c0_160] : memref<48x32xf32, #tpu.memory_space<vmem>>, vector<4x32xf32>
    %c6_161 = arith.constant 6 : index
    %c0_162 = arith.constant 0 : index
    %c0_163 = arith.constant 0 : index
    %178 = vector.load %arg15[%c6_161, %c0_162, %c0_163] : memref<12x32x32xf32, #tpu.memory_space<vmem>>, vector<1x32x32xf32>
    %179 = vector.shape_cast %178 : vector<1x32x32xf32> to vector<32x32xf32>
    %cst_164 = arith.constant dense<0.000000e+00> : vector<4x32xf32>
    %180 = tpu.matmul %177, %179, %cst_164 {dimension_numbers = #tpu.dot_dimension_numbers<[1], [0], [0], [1], [0, 0, 1, 1], [], []>} : vector<4x32xf32>, vector<32x32xf32>, vector<4x32xf32> -> vector<4x32xf32>
    %181 = arith.addf %176, %180 : vector<4x32xf32>
    %c28_165 = arith.constant 28 : index
    %c0_166 = arith.constant 0 : index
    %182 = vector.load %arg28[%c28_165, %c0_166] : memref<48x32xf32, #tpu.memory_space<vmem>>, vector<4x32xf32>
    %c7_167 = arith.constant 7 : index
    %c0_168 = arith.constant 0 : index
    %c0_169 = arith.constant 0 : index
    %183 = vector.load %arg15[%c7_167, %c0_168, %c0_169] : memref<12x32x32xf32, #tpu.memory_space<vmem>>, vector<1x32x32xf32>
    %184 = vector.shape_cast %183 : vector<1x32x32xf32> to vector<32x32xf32>
    %cst_170 = arith.constant dense<0.000000e+00> : vector<4x32xf32>
    %185 = tpu.matmul %182, %184, %cst_170 {dimension_numbers = #tpu.dot_dimension_numbers<[1], [0], [0], [1], [0, 0, 1, 1], [], []>} : vector<4x32xf32>, vector<32x32xf32>, vector<4x32xf32> -> vector<4x32xf32>
    %186 = arith.addf %181, %185 : vector<4x32xf32>
    %c32_171 = arith.constant 32 : index
    %c0_172 = arith.constant 0 : index
    %187 = vector.load %arg28[%c32_171, %c0_172] : memref<48x32xf32, #tpu.memory_space<vmem>>, vector<4x32xf32>
    %c8_173 = arith.constant 8 : index
    %c0_174 = arith.constant 0 : index
    %c0_175 = arith.constant 0 : index
    %188 = vector.load %arg15[%c8_173, %c0_174, %c0_175] : memref<12x32x32xf32, #tpu.memory_space<vmem>>, vector<1x32x32xf32>
    %189 = vector.shape_cast %188 : vector<1x32x32xf32> to vector<32x32xf32>
    %cst_176 = arith.constant dense<0.000000e+00> : vector<4x32xf32>
    %190 = tpu.matmul %187, %189, %cst_176 {dimension_numbers = #tpu.dot_dimension_numbers<[1], [0], [0], [1], [0, 0, 1, 1], [], []>} : vector<4x32xf32>, vector<32x32xf32>, vector<4x32xf32> -> vector<4x32xf32>
    %191 = arith.addf %186, %190 : vector<4x32xf32>
    %c36_177 = arith.constant 36 : index
    %c0_178 = arith.constant 0 : index
    %192 = vector.load %arg28[%c36_177, %c0_178] : memref<48x32xf32, #tpu.memory_space<vmem>>, vector<4x32xf32>
    %c9 = arith.constant 9 : index
    %c0_179 = arith.constant 0 : index
    %c0_180 = arith.constant 0 : index
    %193 = vector.load %arg15[%c9, %c0_179, %c0_180] : memref<12x32x32xf32, #tpu.memory_space<vmem>>, vector<1x32x32xf32>
    %194 = vector.shape_cast %193 : vector<1x32x32xf32> to vector<32x32xf32>
    %cst_181 = arith.constant dense<0.000000e+00> : vector<4x32xf32>
    %195 = tpu.matmul %192, %194, %cst_181 {dimension_numbers = #tpu.dot_dimension_numbers<[1], [0], [0], [1], [0, 0, 1, 1], [], []>} : vector<4x32xf32>, vector<32x32xf32>, vector<4x32xf32> -> vector<4x32xf32>
    %196 = arith.addf %191, %195 : vector<4x32xf32>
    %c40_182 = arith.constant 40 : index
    %c0_183 = arith.constant 0 : index
    %197 = vector.load %arg28[%c40_182, %c0_183] : memref<48x32xf32, #tpu.memory_space<vmem>>, vector<4x32xf32>
    %c10 = arith.constant 10 : index
    %c0_184 = arith.constant 0 : index
    %c0_185 = arith.constant 0 : index
    %198 = vector.load %arg15[%c10, %c0_184, %c0_185] : memref<12x32x32xf32, #tpu.memory_space<vmem>>, vector<1x32x32xf32>
    %199 = vector.shape_cast %198 : vector<1x32x32xf32> to vector<32x32xf32>
    %cst_186 = arith.constant dense<0.000000e+00> : vector<4x32xf32>
    %200 = tpu.matmul %197, %199, %cst_186 {dimension_numbers = #tpu.dot_dimension_numbers<[1], [0], [0], [1], [0, 0, 1, 1], [], []>} : vector<4x32xf32>, vector<32x32xf32>, vector<4x32xf32> -> vector<4x32xf32>
    %201 = arith.addf %196, %200 : vector<4x32xf32>
    %c44_187 = arith.constant 44 : index
    %c0_188 = arith.constant 0 : index
    %202 = vector.load %arg28[%c44_187, %c0_188] : memref<48x32xf32, #tpu.memory_space<vmem>>, vector<4x32xf32>
    %c11 = arith.constant 11 : index
    %c0_189 = arith.constant 0 : index
    %c0_190 = arith.constant 0 : index
    %203 = vector.load %arg15[%c11, %c0_189, %c0_190] : memref<12x32x32xf32, #tpu.memory_space<vmem>>, vector<1x32x32xf32>
    %204 = vector.shape_cast %203 : vector<1x32x32xf32> to vector<32x32xf32>
    %cst_191 = arith.constant dense<0.000000e+00> : vector<4x32xf32>
    %205 = tpu.matmul %202, %204, %cst_191 {dimension_numbers = #tpu.dot_dimension_numbers<[1], [0], [0], [1], [0, 0, 1, 1], [], []>} : vector<4x32xf32>, vector<32x32xf32>, vector<4x32xf32> -> vector<4x32xf32>
    %206 = arith.addf %201, %205 : vector<4x32xf32>
    %cst_192 = arith.constant dense<0.000000e+00> : vector<4xf32>
    %207 = vector.multi_reduction <add>, %206, %cst_192 [1] : vector<4x32xf32> to vector<4xf32>
    %208 = vector.shape_cast %207 : vector<4xf32> to vector<4x1xf32>
    %cst_193 = arith.constant 3.200000e+01 : f32
    %209 = vector.broadcast %cst_193 : f32 to vector<4x1xf32>
    %210 = arith.divf %208, %209 : vector<4x1xf32>
    %211 = vector.broadcast %210 : vector<4x1xf32> to vector<4x32xf32>
    %212 = arith.subf %206, %211 : vector<4x32xf32>
    %213 = arith.mulf %212, %212 : vector<4x32xf32>
    %cst_194 = arith.constant dense<0.000000e+00> : vector<4xf32>
    %214 = vector.multi_reduction <add>, %213, %cst_194 [1] : vector<4x32xf32> to vector<4xf32>
    %215 = vector.shape_cast %214 : vector<4xf32> to vector<4x1xf32>
    %cst_195 = arith.constant 3.200000e+01 : f32
    %216 = vector.broadcast %cst_195 : f32 to vector<4x1xf32>
    %217 = arith.divf %215, %216 : vector<4x1xf32>
    %218 = vector.broadcast %210 : vector<4x1xf32> to vector<4x32xf32>
    %219 = arith.subf %206, %218 : vector<4x32xf32>
    %cst_196 = arith.constant 9.99999974E-6 : f32
    %220 = vector.broadcast %cst_196 : f32 to vector<4x1xf32>
    %221 = arith.addf %217, %220 : vector<4x1xf32>
    %222 = math.rsqrt %221 : vector<4x1xf32>
    %223 = vector.broadcast %222 : vector<4x1xf32> to vector<4x32xf32>
    %224 = arith.mulf %219, %223 : vector<4x32xf32>
    %c0_197 = arith.constant 0 : index
    %c0_198 = arith.constant 0 : index
    %225 = vector.load %arg17[%c0_197, %c0_198] : memref<1x32xf32, #tpu.memory_space<vmem>>, vector<1x32xf32>
    %226 = vector.broadcast %225 : vector<1x32xf32> to vector<4x32xf32>
    %227 = arith.mulf %224, %226 : vector<4x32xf32>
    %c0_199 = arith.constant 0 : index
    %c0_200 = arith.constant 0 : index
    %228 = vector.load %arg18[%c0_199, %c0_200] : memref<1x32xf32, #tpu.memory_space<vmem>>, vector<1x32xf32>
    %229 = vector.broadcast %228 : vector<1x32xf32> to vector<4x32xf32>
    %230 = arith.addf %227, %229 : vector<4x32xf32>
    %c0_201 = arith.constant 0 : index
    %c0_202 = arith.constant 0 : index
    %231 = vector.load %arg19[%c0_201, %c0_202] : memref<32x64xf32, #tpu.memory_space<vmem>>, vector<32x64xf32>
    %cst_203 = arith.constant dense<0.000000e+00> : vector<4x64xf32>
    %232 = tpu.matmul %230, %231, %cst_203 {dimension_numbers = #tpu.dot_dimension_numbers<[1], [0], [0], [1], [0, 0, 1, 1], [], []>} : vector<4x32xf32>, vector<32x64xf32>, vector<4x64xf32> -> vector<4x64xf32>
    %c0_204 = arith.constant 0 : index
    %c0_205 = arith.constant 0 : index
    %233 = vector.load %arg20[%c0_204, %c0_205] : memref<1x64xf32, #tpu.memory_space<vmem>>, vector<1x64xf32>
    %234 = vector.broadcast %233 : vector<1x64xf32> to vector<4x64xf32>
    %235 = arith.addf %232, %234 : vector<4x64xf32>
    %cst_206 = arith.constant 0.000000e+00 : f32
    %236 = vector.broadcast %cst_206 : f32 to vector<4x64xf32>
    %237 = arith.maximumf %235, %236 : vector<4x64xf32>
    %c0_207 = arith.constant 0 : index
    %c0_208 = arith.constant 0 : index
    %238 = vector.load %arg21[%c0_207, %c0_208] : memref<64x32xf32, #tpu.memory_space<vmem>>, vector<64x32xf32>
    %cst_209 = arith.constant dense<0.000000e+00> : vector<4x32xf32>
    %239 = tpu.matmul %237, %238, %cst_209 {dimension_numbers = #tpu.dot_dimension_numbers<[1], [0], [0], [1], [0, 0, 1, 1], [], []>} : vector<4x64xf32>, vector<64x32xf32>, vector<4x32xf32> -> vector<4x32xf32>
    %c0_210 = arith.constant 0 : index
    %c0_211 = arith.constant 0 : index
    %240 = vector.load %arg22[%c0_210, %c0_211] : memref<1x32xf32, #tpu.memory_space<vmem>>, vector<1x32xf32>
    %241 = vector.broadcast %240 : vector<1x32xf32> to vector<4x32xf32>
    %242 = arith.addf %239, %241 : vector<4x32xf32>
    %243 = arith.addf %242, %230 : vector<4x32xf32>
    %c0_212 = arith.constant 0 : index
    %c0_213 = arith.constant 0 : index
    %244 = vector.load %arg23[%c0_212, %c0_213] : memref<32x100xf32, #tpu.memory_space<vmem>>, vector<32x100xf32>
    %cst_214 = arith.constant dense<0.000000e+00> : vector<4x100xf32>
    %245 = tpu.matmul %243, %244, %cst_214 {dimension_numbers = #tpu.dot_dimension_numbers<[1], [0], [0], [1], [0, 0, 1, 1], [], []>} : vector<4x32xf32>, vector<32x100xf32>, vector<4x100xf32> -> vector<4x100xf32>
    %c0_215 = arith.constant 0 : index
    %c0_216 = arith.constant 0 : index
    %246 = vector.load %arg24[%c0_215, %c0_216] : memref<1x100xf32, #tpu.memory_space<vmem>>, vector<1x100xf32>
    %247 = vector.broadcast %246 : vector<1x100xf32> to vector<4x100xf32>
    %248 = arith.addf %245, %247 : vector<4x100xf32>
    %c0_217 = arith.constant 0 : index
    %c0_218 = arith.constant 0 : index
    %249 = vector.load %arg25[%c0_217, %c0_218] : memref<4x100xf32, #tpu.memory_space<vmem>>, vector<4x100xf32>
    tpu.vector_store %arg25[%c0_217, %c0_218], %248 {strides = array<i32>} : memref<4x100xf32, #tpu.memory_space<vmem>>, vector<4x100xf32>,
    return
  }
  func.func @transform_0(%arg0: i32) -> (i32, i32) {
    %c0_i32 = arith.constant 0 : i32
    %c0_i32_0 = arith.constant 0 : i32
    %c0_i32_1 = arith.constant 0 : i32
    return %c0_i32, %c0_i32_0 : i32, i32
  }
  func.func @transform_1(%arg0: i32) -> (i32, i32) {
    %c0_i32 = arith.constant 0 : i32
    %c0_i32_0 = arith.constant 0 : i32
    %c0_i32_1 = arith.constant 0 : i32
    return %c0_i32, %c0_i32_0 : i32, i32
  }
  func.func @transform_2(%arg0: i32) -> (i32, i32) {
    %c0_i32 = arith.constant 0 : i32
    %c0_i32_0 = arith.constant 0 : i32
    %c0_i32_1 = arith.constant 0 : i32
    return %c0_i32, %c0_i32_0 : i32, i32
  }
  func.func @transform_3(%arg0: i32) -> (i32, i32) {
    %c0_i32 = arith.constant 0 : i32
    %c0_i32_0 = arith.constant 0 : i32
    %c0_i32_1 = arith.constant 0 : i32
    return %c0_i32, %c0_i32_0 : i32, i32
  }
  func.func @transform_4(%arg0: i32) -> (i32, i32) {
    %c0_i32 = arith.constant 0 : i32
    %c0_i32_0 = arith.constant 0 : i32
    %c0_i32_1 = arith.constant 0 : i32
    return %c0_i32, %c0_i32_0 : i32, i32
  }
  func.func @transform_5(%arg0: i32) -> (i32, i32) {
    %c0_i32 = arith.constant 0 : i32
    %c0_i32_0 = arith.constant 0 : i32
    %c0_i32_1 = arith.constant 0 : i32
    return %c0_i32, %c0_i32_0 : i32, i32
  }
  func.func @transform_6(%arg0: i32) -> (i32, i32) {
    %c0_i32 = arith.constant 0 : i32
    %c0_i32_0 = arith.constant 0 : i32
    %c0_i32_1 = arith.constant 0 : i32
    return %c0_i32, %c0_i32_0 : i32, i32
  }
  func.func @transform_7(%arg0: i32) -> (i32, i32) {
    %c0_i32 = arith.constant 0 : i32
    %c0_i32_0 = arith.constant 0 : i32
    %c0_i32_1 = arith.constant 0 : i32
    return %c0_i32, %c0_i32_0 : i32, i32
  }
  func.func @transform_8(%arg0: i32) -> (i32, i32) {
    %c0_i32 = arith.constant 0 : i32
    %c0_i32_0 = arith.constant 0 : i32
    %c0_i32_1 = arith.constant 0 : i32
    return %c0_i32, %c0_i32_0 : i32, i32
  }
  func.func @transform_9(%arg0: i32) -> (i32, i32) {
    %c0_i32 = arith.constant 0 : i32
    %c0_i32_0 = arith.constant 0 : i32
    %c0_i32_1 = arith.constant 0 : i32
    return %c0_i32, %c0_i32_0 : i32, i32
  }
  func.func @transform_10(%arg0: i32) -> (i32, i32) {
    %c0_i32 = arith.constant 0 : i32
    %c0_i32_0 = arith.constant 0 : i32
    %c0_i32_1 = arith.constant 0 : i32
    return %c0_i32, %c0_i32_0 : i32, i32
  }
  func.func @transform_11(%arg0: i32) -> (i32, i32) {
    %c0_i32 = arith.constant 0 : i32
    %c0_i32_0 = arith.constant 0 : i32
    %c0_i32_1 = arith.constant 0 : i32
    return %c0_i32, %c0_i32_0 : i32, i32
  }
  func.func @transform_12(%arg0: i32) -> (i32, i32, i32) {
    %c0_i32 = arith.constant 0 : i32
    %c0_i32_0 = arith.constant 0 : i32
    %c0_i32_1 = arith.constant 0 : i32
    %c0_i32_2 = arith.constant 0 : i32
    return %c0_i32, %c0_i32_0, %c0_i32_1 : i32, i32, i32
  }
  func.func @transform_13(%arg0: i32) -> (i32, i32) {
    %c0_i32 = arith.constant 0 : i32
    %c0_i32_0 = arith.constant 0 : i32
    %c0_i32_1 = arith.constant 0 : i32
    return %c0_i32, %c0_i32_0 : i32, i32
  }
  func.func @transform_14(%arg0: i32) -> (i32, i32, i32) {
    %c0_i32 = arith.constant 0 : i32
    %c0_i32_0 = arith.constant 0 : i32
    %c0_i32_1 = arith.constant 0 : i32
    %c0_i32_2 = arith.constant 0 : i32
    return %c0_i32, %c0_i32_0, %c0_i32_1 : i32, i32, i32
  }
  func.func @transform_15(%arg0: i32) -> (i32, i32) {
    %c0_i32 = arith.constant 0 : i32
    %c0_i32_0 = arith.constant 0 : i32
    %c0_i32_1 = arith.constant 0 : i32
    return %c0_i32, %c0_i32_0 : i32, i32
  }
  func.func @transform_16(%arg0: i32) -> (i32, i32) {
    %c0_i32 = arith.constant 0 : i32
    %c0_i32_0 = arith.constant 0 : i32
    %c0_i32_1 = arith.constant 0 : i32
    return %c0_i32, %c0_i32_0 : i32, i32
  }
  func.func @transform_17(%arg0: i32) -> (i32, i32) {
    %c0_i32 = arith.constant 0 : i32
    %c0_i32_0 = arith.constant 0 : i32
    %c0_i32_1 = arith.constant 0 : i32
    return %c0_i32, %c0_i32_0 : i32, i32
  }
  func.func @transform_18(%arg0: i32) -> (i32, i32) {
    %c0_i32 = arith.constant 0 : i32
    %c0_i32_0 = arith.constant 0 : i32
    %c0_i32_1 = arith.constant 0 : i32
    return %c0_i32, %c0_i32_0 : i32, i32
  }
  func.func @transform_19(%arg0: i32) -> (i32, i32) {
    %c0_i32 = arith.constant 0 : i32
    %c0_i32_0 = arith.constant 0 : i32
    %c0_i32_1 = arith.constant 0 : i32
    return %c0_i32, %c0_i32_0 : i32, i32
  }
  func.func @transform_20(%arg0: i32) -> (i32, i32) {
    %c0_i32 = arith.constant 0 : i32
    %c0_i32_0 = arith.constant 0 : i32
    %c0_i32_1 = arith.constant 0 : i32
    return %c0_i32, %c0_i32_0 : i32, i32
  }
  func.func @transform_21(%arg0: i32) -> (i32, i32) {
    %c0_i32 = arith.constant 0 : i32
    %c0_i32_0 = arith.constant 0 : i32
    %c0_i32_1 = arith.constant 0 : i32
    return %c0_i32, %c0_i32_0 : i32, i32
  }
  func.func @transform_22(%arg0: i32) -> (i32, i32) {
    %c0_i32 = arith.constant 0 : i32
    %c0_i32_0 = arith.constant 0 : i32
    %c0_i32_1 = arith.constant 0 : i32
    return %c0_i32, %c0_i32_0 : i32, i32
  }
  func.func @transform_23(%arg0: i32) -> (i32, i32) {
    %c0_i32 = arith.constant 0 : i32
    %c0_i32_0 = arith.constant 0 : i32
    %c0_i32_1 = arith.constant 0 : i32
    return %c0_i32, %c0_i32_0 : i32, i32
  }
  func.func @transform_24(%arg0: i32) -> (i32, i32) {
    %c0_i32 = arith.constant 0 : i32
    %c0_i32_0 = arith.constant 0 : i32
    %c0_i32_1 = arith.constant 0 : i32
    return %c0_i32, %c0_i32_0 : i32, i32
  }
}

</mosaic_0001>

<bundles_post_ra>
// kernel: sattle_forward.1
= control target key start
LH: loop header
LB: loop body
LE: loop exit
PB: predicated region body
PF: predicated region fallthrough
CT: control target
= control target key end

     0   :  { %s4265_s0 = inlined_call_operand.vmem [shape: f32[4,32], index: 0, kind: input, shape index: {}]   ;;  %s4266_s1 = inlined_call_operand.vmem [shape: f32[4,32], index: 1, kind: input, shape index: {}]   ;;  %s4267_s2 = inlined_call_operand.hbm [shape: f32[1,32], index: 2, kind: input, shape index: {}]   ;;  %s4268_s3 = inlined_call_operand.hbm [shape: f32[1,32], index: 3, kind: input, shape index: {}]   ;;  %s4269_s4 = inlined_call_operand.hbm [shape: f32[1,32], index: 4, kind: input, shape index: {}]   ;;  %s4270_s5 = inlined_call_operand.hbm [shape: f32[1,32], index: 5, kind: input, shape index: {}]   ;;  %s4271_s6 = inlined_call_operand.hbm [shape: f32[32,1536], index: 6, kind: input, shape index: {}]   ;;  %s4272_s7 = inlined_call_operand.hbm [shape: f32[1,1536], index: 7, kind: input, shape index: {}]   ;;  %s4273_s8 = inlined_call_operand.hbm [shape: f32[32,1536], index: 8, kind: input, shape index: {}]   ;;  %s4274_s9 = inlined_call_operand.hbm [shape: f32[1,1536], index: 9, kind: input, shape index: {}]   ;;  %s4275_s10 = inlined_call_operand.hbm [shape: f32[16,128], index: 10, kind: input, shape index: {}]   ;;  %s4276_s11 = inlined_call_operand.hbm [shape: f32[128,8], index: 11, kind: input, shape index: {}]   ;;  %s4277_s12 = inlined_call_operand.hbm [shape: f32[8,8,32], index: 12, kind: input, shape index: {}]   ;;  %s4278_s13 = inlined_call_operand.hbm [shape: f32[1,32], index: 13, kind: input, shape index: {}]   ;;  %s4279_s14 = inlined_call_operand.hbm [shape: f32[12,32,32], index: 14, kind: input, shape index: {}]   ;;  %s4280_s15 = inlined_call_operand.vmem [shape: f32[1,32], index: 15, kind: input, shape index: {}]   ;;  %s4281_s16 = inlined_call_operand.vmem [shape: f32[1,32], index: 16, kind: input, shape index: {}]   ;;  %s4282_s17 = inlined_call_operand.vmem [shape: f32[1,32], index: 17, kind: input, shape index: {}]   ;;  %s4283_s18 = inlined_call_operand.hbm [shape: f32[32,64], index: 18, kind: input, shape index: {}]   ;;  %s4284_s19 = inlined_call_operand.vmem [shape: f32[1,64], index: 19, kind: input, shape index: {}]   ;;  %s4285_s20 = inlined_call_operand.vmem [shape: f32[64,32], index: 20, kind: input, shape index: {}]   ;;  %s4286_s21 = inlined_call_operand.vmem [shape: f32[1,32], index: 21, kind: input, shape index: {}]   ;;  %s4287_s22 = inlined_call_operand.vmem [shape: f32[32,100], index: 22, kind: input, shape index: {}]   ;;  %s4288_s23 = inlined_call_operand.vmem [shape: f32[1,100], index: 23, kind: input, shape index: {}]   ;;  %s4289_s24 = inlined_call_operand.hbm [shape: f32[4,100], index: 24, kind: output, shape index: {}]  }
   0x1   :  { %4290 = sst [smem:[#allocation38_spill]] %s4265_s0 }
   0x2   :  { %4291 = sst [smem:[#allocation39_spill]] %s4266_s1 }
   0x3   :  { %4292 = sst [smem:[#allocation40_spill]] %s4267_s2 }
   0x4   :  { %4293 = sst [smem:[#allocation41_spill]] %s4268_s3 }
   0x5   :  { %4294 = sst [smem:[#allocation42_spill]] %s4269_s4 }
   0x6   :  { %4295 = sst [smem:[#allocation43_spill]] %s4270_s5 }
   0x7   :  { %4296 = sst [smem:[#allocation44_spill]] %s4271_s6 }
   0x8   :  { %4297 = sst [smem:[#allocation45_spill]] %s4272_s7 }
   0x9   :  { %4298 = sst [smem:[#allocation46_spill]] %s4273_s8 }
   0xa   :  { %4299 = sst [smem:[#allocation47_spill]] %s4288_s23 }
   0xb   :  { %4300 = sst [smem:[#allocation48_spill]] %s4289_s24 }
   0xc   :  { %29 = vsyncpa [#allocation6], 0 }
   0xd   :  { %30 = vsyncpa [#allocation9], 0 }
   0xe   :  { %31 = vsyncpa [#allocation12], 0 }
   0xf   :  { %32 = vsyncpa [#allocation15], 0 }
  0x10   :  { %33 = vsyncpa [#allocation18], 0 }
  0x11   :  { %34 = vsyncpa [#allocation21], 0 }
  0x12   :  { %35 = vsyncpa [#allocation24], 0 }
  0x13   :  { %36 = vsyncpa [#allocation27], 0  ;;  %s4301_s27 = sld [smem:[#allocation41_spill]] }
  0x19   :  { %s58_s28 = sshll.u32 %s4301_s27, 4  ;;  %s59_s28 = int_to_ptr.hbm [resolvable:$true] %s58_s28 }
  0x1a   :  { %37 = vsyncpa [#allocation7], 0  ;;  %s3370_s6 = smov [#allocation8]   ;;  %s4302_s7 = sld [smem:[#allocation43_spill]] }
  0x1b   :  { %s60_s2 = sshll.u32 %s3370_s6, 4  ;;  %s3371_s3 = smov [#allocation11]   ;;  %s61_s2 = int_to_ptr.vmem [resolvable:$true] %s60_s2 }
  0x1c   :  { %63 = dma.hbm_to_vmem [thread:$0]  %s59_s28, 16, %s61_s2, [#allocation9]  }
  0x1d   :  { %s82_s25 = sshll.u32 %s3371_s3, 4  ;;  %s4303_s1 = sld [smem:[#allocation45_spill]]  ;;  %s83_s25 = int_to_ptr.vmem [resolvable:$true] %s82_s25 }
  0x1e   :  { %s128_s27 = sshll.u32 %s4274_s9, 4  ;;  %s3372_s6 = smov [#allocation14]   ;;  %s129_s27 = int_to_ptr.hbm [resolvable:$true] %s128_s27 }
  0x1f   :  { %s106_s23 = sshll.u32 %s3372_s6, 4  ;;  %s3373_s28 = smov [#allocation17]   ;;  %s107_s23 = int_to_ptr.vmem [resolvable:$true] %s106_s23 }
  0x20   :  { %s80_s30 = sshll.u32 %s4302_s7, 4  ;;  %s130_s2 = sshll.u32 %s3373_s28, 4  ;;  %s81_s30 = int_to_ptr.hbm [resolvable:$true] %s80_s30  ;;  %s131_s2 = int_to_ptr.vmem [resolvable:$true] %s130_s2 }
  0x21   :  { %85 = dma.hbm_to_vmem [thread:$0]  %s81_s30, 16, %s83_s25, [#allocation12]  }
  0x22   :  { %133 = dma.hbm_to_vmem [thread:$0]  %s129_s27, 192, %s131_s2, [#allocation18]  }
  0x23   :  { %s104_s24 = sshll.u32 %s4303_s1, 4  ;;  %s151_s7 = sshll.u32 %s4276_s11, 4  ;;  %s105_s24 = int_to_ptr.hbm [resolvable:$true] %s104_s24  ;;  %s152_s7 = int_to_ptr.hbm [resolvable:$true] %s151_s7 }
  0x24   :  { %109 = dma.hbm_to_vmem [thread:$0]  %s105_s24, 192, %s107_s23, [#allocation15]  }
  0x25   :  { %s3374_s3 = smov [#allocation20]   ;;  %s178_s9 = sshll.u32 %s4278_s13, 4  ;;  %s179_s9 = int_to_ptr.hbm [resolvable:$true] %s178_s9 }
  0x26   :  { %s153_s30 = sshll.u32 %s3374_s3, 4  ;;  %s3375_s4 = smov 128   ;;  %s154_s30 = int_to_ptr.vmem [resolvable:$true] %s153_s30 }
  0x27   :  { %s3376_s1 = smov 8   ;;  %s3377_s23 = smov [#allocation23]  }
  0x28   :  { %159 = dma.hbm_to_vmem [thread:$0]  %s152_s7, 2048, %s154_s30, [#allocation21], %s3375_s4, %s3375_s4, %s3376_s1  }
  0x29   :  { %s180_s24 = sshll.u32 %s3377_s23, 4  ;;  %s4304_s11 = sld [smem:[#allocation40_spill]]  ;;  %s181_s24 = int_to_ptr.vmem [resolvable:$true] %s180_s24 }
  0x2a   :  { %183 = dma.hbm_to_vmem [thread:$0]  %s179_s9, 16, %s181_s24, [#allocation24]  }
  0x2b   :  { %s4305_s2 = sld [smem:[#allocation42_spill]]  ;;  %s3378_s29 = smov [#allocation5]  }
  0x2c   :  { %s49_s0 = sshll.u32 %s3378_s29, 4  ;;  %s3379_s7 = smov [#allocation10]   ;;  %s50_s0 = int_to_ptr.vmem [resolvable:$true] %s49_s0 }
  0x2d   :  { %s71_s3 = sshll.u32 %s3379_s7, 4  ;;  %s4306_s8 = sld [smem:[#allocation44_spill]]  ;;  %s72_s3 = int_to_ptr.vmem [resolvable:$true] %s71_s3 }
  0x2e   :  { %s3380_s5 = smov [#allocation13]   ;;  %s3381_s28 = smov 1536  }
  0x2f   :  { %s47_s27 = sshll.u32 %s4304_s11, 4  ;;  %s92_s9 = sshll.u32 %s3380_s5, 4  ;;  %s48_s27 = int_to_ptr.hbm [resolvable:$true] %s47_s27  ;;  %s93_s9 = int_to_ptr.vmem [resolvable:$true] %s92_s9 }
  0x30   :  { %52 = dma.hbm_to_vmem [thread:$0]  %s48_s27, 16, %s50_s0, [#allocation6]  }
  0x31   :  { %s69_s13 = sshll.u32 %s4305_s2, 4  ;;  %s4307_s11 = sld [smem:[#allocation46_spill]]  ;;  %s70_s13 = int_to_ptr.hbm [resolvable:$true] %s69_s13 }
  0x32   :  { %74 = dma.hbm_to_vmem [thread:$0]  %s70_s13, 16, %s72_s3, [#allocation9]  }
  0x33   :  { %s90_s23 = sshll.u32 %s4306_s8, 4  ;;  %s3382_s2 = smov 96   ;;  %s91_s23 = int_to_ptr.hbm [resolvable:$true] %s90_s23 }
  0x34   :  { %98 = dma.hbm_to_vmem [thread:$0]  %s91_s23, 6144, %s93_s9, [#allocation12], %s3381_s28, %s3381_s28, %s3382_s2  }
  0x35   :  { %s3383_s27 = smov [#allocation16]   ;;  %s138_s30 = sshll.u32 %s4275_s10, 4  ;;  %s139_s30 = int_to_ptr.hbm [resolvable:$true] %s138_s30 }
  0x36   :  { %s116_s29 = sshll.u32 %s3383_s27, 4  ;;  %s164_s25 = sshll.u32 %s4277_s12, 4  ;;  %s117_s29 = int_to_ptr.vmem [resolvable:$true] %s116_s29  ;;  %s165_s25 = int_to_ptr.hbm [resolvable:$true] %s164_s25 }
  0x37   :  { %s114_s6 = sshll.u32 %s4307_s11, 4  ;;  %s3384_s8 = smov [#allocation19]   ;;  %s115_s6 = int_to_ptr.hbm [resolvable:$true] %s114_s6 }
  0x38   :  { %122 = dma.hbm_to_vmem [thread:$0]  %s115_s6, 6144, %s117_s29, [#allocation15], %s3381_s28, %s3381_s28, %s3382_s2  }
  0x39   :  { %s140_s5 = sshll.u32 %s3384_s8, 4  ;;  %s3385_s23 = smov [#allocation22]   ;;  %s141_s5 = int_to_ptr.vmem [resolvable:$true] %s140_s5 }
  0x3a   :  { %146 = dma.hbm_to_vmem [thread:$0]  %s139_s30, 256, %s141_s5, [#allocation18], %s3375_s4, %s3375_s4, %s3376_s1  }
  0x3b   :  { %s166_s9 = sshll.u32 %s3385_s23, 4  ;;  %s188_s26 = sshll.u32 %s4279_s14, 4  ;;  %s167_s9 = int_to_ptr.vmem [resolvable:$true] %s166_s9  ;;  %s189_s26 = int_to_ptr.hbm [resolvable:$true] %s188_s26 }
  0x3c   :  { %172 = dma.hbm_to_vmem [thread:$0]  %s165_s25, 1024, %s167_s9, [#allocation21], %s3375_s4, %s3375_s4, %s3376_s1  }
  0x3d   :  { %s207_s6 = sshll.u32 %s4283_s18, 4  ;;  %s3386_s28 = smov [#allocation25]   ;;  %s208_s6 = int_to_ptr.hbm [resolvable:$true] %s207_s6 }
  0x3e   :  { %s190_s27 = sshll.u32 %s3386_s28, 4  ;;  %s3387_s29 = smov [#allocation26]   ;;  %s191_s27 = int_to_ptr.vmem [resolvable:$true] %s190_s27 }
  0x3f   :  { %196 = dma.hbm_to_vmem [thread:$0]  %s189_s26, 6144, %s191_s27, [#allocation24], %s3375_s4, %s3375_s4, %s3376_s1  }
  0x40   :  { %s209_s14 = sshll.u32 %s3387_s29, 4  ;;  %s210_s14 = int_to_ptr.vmem [resolvable:$true] %s209_s14 }
  0x41   :  { %215 = dma.hbm_to_vmem [thread:$0]  %s208_s6, 512, %s210_s14, [#allocation27], %s3375_s4, %s3375_s4, %s3376_s1  }
  0x42   :  { %3352 = dma.done.wait [#allocation6], 16  }
  0x43   :  { %3353 = vsyncadd [#allocation6], 4294967280 }
  0x44   :  { %3354 = dma.done.wait [#allocation9], 32  }
  0x45   :  { %3355 = vsyncadd [#allocation9], 4294967264 }
  0x46   :  { %3356 = dma.done.wait [#allocation12], 6160  }
  0x47   :  { %3357 = vsyncadd [#allocation12], 4294961136 }
  0x48   :  { %3358 = dma.done.wait [#allocation15], 6336  }
  0x49   :  { %3359 = vsyncadd [#allocation15], 4294960960 }
  0x4a   :  { %3360 = dma.done.wait [#allocation18], 448  }
  0x4b   :  { %3361 = vsyncadd [#allocation18], 4294966848 }
  0x4c   :  { %3362 = dma.done.wait [#allocation21], 3072  }
  0x4d   :  { %3363 = vsyncadd [#allocation21], 4294964224 }
  0x4e   :  { %3364 = dma.done.wait [#allocation24], 6160  }
  0x4f   :  { %3365 = vsyncadd [#allocation24], 4294961136 }
  0x50   :  { %3366 = dma.done.wait [#allocation27], 512  }
  0x51   :  { %3367 = vsyncadd [#allocation27], 4294966784  ;;  %v340_v0 = vld [vmem:[#allocation13 + $0x120] sm:$0xff]  ;;  %v341_v1 = vld [vmem:[#allocation13 + $0x128] sm:$0xff]  ;;  %s4308_s1 = sld [smem:[#allocation38_spill]]  ;;  %vm380_vm0 = vcmask 261120  }
  0x52   :  { %v328_v2 = vld [vmem:[#allocation13 + $0xc0] sm:$0xff]  ;;  %396 = vmatpush.msra.mxu0 %v340_v0  ;;  %416 = vmatpush.msra.mxu1 %v341_v1  ;;  %v329_v3 = vld [vmem:[#allocation13 + $0xc8] sm:$0xff]  ;;  %v342_v4 = vld [vmem:[#allocation13 + $0x130] sm:$0xff]  ;;  %s4309_s30 = sld [smem:[#allocation39_spill]]  ;;  %vm997_vm1 = vcmask 130048   ;;  %s3388_s13 = smov 112  }
  0x53   :  { %v343_v5 = vld [vmem:[#allocation13 + $0x138] sm:$0xff]  ;;  %436 = vmatpush.msra.mxu2 %v342_v4  ;;  %v316_v6 = vld [vmem:[#allocation13 + $0x60] sm:$0xff]  ;;  %v317_v7 = vld [vmem:[#allocation13 + $0x68] sm:$0xff]  ;;  %s3389_s3 = smov 80   ;;  %s3390_s25 = smov 48   ;;  %vm1195_vm2 = vcmask 64512  }
  0x54   :  { %456 = vmatpush.msra.mxu3 %v343_v5  ;;  %v330_v8 = vld [vmem:[#allocation13 + $0xd0] sm:$0xff]  ;;  %397 = vmatpush.msra.mxu0 %v328_v2  ;;  %v331_v9 = vld [vmem:[#allocation13 + $0xd8] sm:$0xff]  ;;  %v304_v10 = vld [vmem:[#allocation13] sm:$0xff]  ;;  %s3391_s8 = smov 64   ;;  %s3393_s5 = smov 32   ;;  %vm2648_vm3 = vcmask 257024  }
  0x55   :  { %417 = vmatpush.msra.mxu1 %v329_v3  ;;  %v305_v11 = vld [vmem:[#allocation13 + $0x8] sm:$0xff]  ;;  %437 = vmatpush.msra.mxu2 %v330_v8  ;;  %v318_v12 = vld [vmem:[#allocation13 + $0x70] sm:$0xff]  ;;  %v319_v13 = vld [vmem:[#allocation13 + $0x78] sm:$0xff]  ;;  %vm2732_vm8 = vcmask 523264   ;;  %s4310_s11 = sld [smem:[#allocation47_spill]]  ;;  %s3395_s6 = smov [#allocation28]  }
  0x56   :  { %457 = vmatpush.msra.mxu3 %v331_v9  ;;  %398 = vmatpush.msra.mxu0 %v316_v6  ;;  %v2975_v15 = vld [vmem:[#allocation5] ss:$0 sm:$0xff]  ;;  %v2976_v16 = vld [vmem:[#allocation8] ss:$0 sm:$0xff]  ;;  %v344_v17 = vld [vmem:[#allocation13 + $0x140] sm:$0xff]  ;;  %s2795_s28 = sshll.u32 %s3395_s6, 4  ;;  %s2796_s28 = int_to_ptr.vmem [resolvable:$true] %s2795_s28 }
  0x57   :  { %v282_v14 = vld [vmem:[%s4308_s1] sm:$0xf]  ;;  %418 = vmatpush.msra.mxu1 %v317_v7  ;;  %438 = vmatpush.msra.mxu2 %v318_v12  ;;  %v306_v20 = vld [vmem:[#allocation13 + $0x10] sm:$0xff]  ;;  %v307_v21 = vld [vmem:[#allocation13 + $0x18] sm:$0xff]  ;;  %vm2788_vm9 = vcmask 814080  }
  0x58   :  { %458 = vmatpush.msra.mxu3 %v319_v13  ;;  %v345_v18 = vld [vmem:[#allocation13 + $0x148] sm:$0xff]  ;;  %399 = vmatpush.msra.mxu0 %v304_v10  ;;  %v287_v19 = vmul.f32 %v2975_v15, %v282_v14  ;;  %v332_v22 = vld [vmem:[#allocation13 + $0xe0] sm:$0xff]  ;;  %v346_v25 = vld [vmem:[#allocation13 + $0x150] sm:$0xff] }
  0x59   :  { %419 = vmatpush.msra.mxu1 %v305_v11  ;;  %v333_v23 = vld [vmem:[#allocation13 + $0xe8] sm:$0xff]  ;;  %439 = vmatpush.msra.mxu2 %v306_v20  ;;  %v347_v26 = vld [vmem:[#allocation13 + $0x158] sm:$0xff]  ;;  %v320_v27 = vld [vmem:[#allocation13 + $0x80] sm:$0xff] }
  0x5a   :  { %476 = vmatpush.msrb.mxu0 %v344_v17  ;;  %v3583_v24 = vadd.f32 %v2976_v16, %v287_v19  ;;  %459 = vmatpush.msra.mxu3 %v307_v21  ;;  %v321_v28 = vld [vmem:[#allocation13 + $0x88] sm:$0xff]  ;;  %v334_v29 = vld [vmem:[#allocation13 + $0xf0] sm:$0xff]  ;;  %v335_v30 = vld [vmem:[#allocation13 + $0xf8] sm:$0xff] }
  0x5b   :  { %496 = vmatpush.msrb.mxu1 %v345_v18  ;;  %516 = vmatpush.msrb.mxu2 %v346_v25  ;;  %v308_v31 = vld [vmem:[#allocation13 + $0x20] sm:$0xff]  ;;  %v309_v32 = vld [vmem:[#allocation13 + $0x28] sm:$0xff]  ;;  %v322_v33 = vld [vmem:[#allocation13 + $0x90] sm:$0xff] }
  0x5c   :  { %477 = vmatpush.msrb.mxu0 %v332_v22  ;;  %2815 = vmatmul.msk.f32.vlgmr.msra.gmra.mxu1 %vm380_vm0, %v3583_v24  ;;  %v323_v34 = vld [vmem:[#allocation13 + $0x98] sm:$0xff]  ;;  %v348_v35 = vld [vmem:[#allocation13 + $0x160] sm:$0xff]  ;;  %v349_v36 = vld [vmem:[#allocation13 + $0x168] sm:$0xff] }
  0x5d   :  { %497 = vmatpush.msrb.mxu1 %v333_v23  ;;  %2814 = vmatmul.msk.f32.vlgmr.msra.gmra.mxu0 %vm380_vm0, %v3583_v24  ;;  %v310_v37 = vld [vmem:[#allocation13 + $0x30] sm:$0xff]  ;;  %v311_v38 = vld [vmem:[#allocation13 + $0x38] sm:$0xff]  ;;  %v336_v39 = vld [vmem:[#allocation13 + $0x100] sm:$0xff] }
  0x5e   :  { %2816 = vmatmul.msk.f32.vlgmr.msra.gmra.mxu2 %vm380_vm0, %v3583_v24  ;;  %2817 = vmatmul.msk.f32.vlgmr.msra.gmra.mxu3 %vm380_vm0, %v3583_v24  ;;  %v337_v40 = vld [vmem:[#allocation13 + $0x108] sm:$0xff]  ;;  %v350_v41 = vld [vmem:[#allocation13 + $0x170] sm:$0xff]  ;;  %v351_v42 = vld [vmem:[#allocation13 + $0x178] sm:$0xff] }
  0x5f   :  { %536 = vmatpush.msrb.mxu3 %v347_v26  ;;  %478 = vmatpush.msrb.mxu0 %v320_v27  ;;  %v324_v43 = vld [vmem:[#allocation13 + $0xa0] sm:$0xff]  ;;  %v325_v44 = vld [vmem:[#allocation13 + $0xa8] sm:$0xff]  ;;  %v338_v45 = vld [vmem:[#allocation13 + $0x110] sm:$0xff] }
  0x60   :  { %498 = vmatpush.msrb.mxu1 %v321_v28  ;;  %517 = vmatpush.msrb.mxu2 %v334_v29  ;;  %v339_v46 = vld [vmem:[#allocation13 + $0x118] sm:$0xff]  ;;  %v312_v47 = vld [vmem:[#allocation13 + $0x40] sm:$0xff]  ;;  %v313_v48 = vld [vmem:[#allocation13 + $0x48] sm:$0xff] }
  0x61   :  { %537 = vmatpush.msrb.mxu3 %v335_v30  ;;  %479 = vmatpush.msrb.mxu0 %v308_v31  ;;  %v326_v49 = vld [vmem:[#allocation13 + $0xb0] sm:$0xff]  ;;  %v327_v50 = vld [vmem:[#allocation13 + $0xb8] sm:$0xff]  ;;  %v293_v56 = vld [vmem:[%s4309_s30] sm:$0xf] }
  0x62   :  { %499 = vmatpush.msrb.mxu1 %v309_v32  ;;  %518 = vmatpush.msrb.mxu2 %v322_v33  ;;  %v314_v51 = vld [vmem:[#allocation13 + $0x50] sm:$0xff]  ;;  %v315_v52 = vld [vmem:[#allocation13 + $0x58] sm:$0xff]  ;;  %v663_v60 = vld [vmem:[#allocation16 + $0x138] sm:$0xff] }
  0x63   :  { %538 = vmatpush.msrb.mxu3 %v323_v34  ;;  %556 = vmatpush.msra.mxu0 %v348_v35  ;;  %v2977_v53 = vld [vmem:[#allocation10] ss:$0 sm:$0xff]  ;;  %v660_v54 = vld [vmem:[#allocation16 + $0x120] sm:$0xff]  ;;  %v661_v55 = vld [vmem:[#allocation16 + $0x128] sm:$0xff] }
  0x64   :  { %576 = vmatpush.msra.mxu1 %v349_v36  ;;  %519 = vmatpush.msrb.mxu2 %v310_v37  ;;  %v648_v57 = vld [vmem:[#allocation16 + $0xc0] sm:$0xff]  ;;  %v649_v58 = vld [vmem:[#allocation16 + $0xc8] sm:$0xff]  ;;  %v662_v59 = vld [vmem:[#allocation16 + $0x130] sm:$0xff]  ;;  %v298_v61 = vmul.f32 %v2977_v53, %v293_v56 }
  0x65   :  { %2818 = vmatmul.msk.f32.vlgmr.msrb.gmra.mxu0 %vm380_vm0, %v3583_v24  ;;  %2819 = vmatmul.msk.f32.vlgmr.msrb.gmra.mxu1 %vm380_vm0, %v3583_v24  ;;  %v2978_v62 = vld [vmem:[#allocation11] ss:$0 sm:$0xff]  ;;  %v636_v63 = vld [vmem:[#allocation16 + $0x60] sm:$0xff]  ;;  %v637_v0 = vld [vmem:[#allocation16 + $0x68] sm:$0xff] }
  0x66   :  { %539 = vmatpush.msrb.mxu3 %v311_v38  ;;  %2820 = vmatmul.msk.f32.vlgmr.msrb.gmra.mxu2 %vm380_vm0, %v3583_v24  ;;  %v650_v1 = vld [vmem:[#allocation16 + $0xd0] sm:$0xff]  ;;  %v651_v2 = vld [vmem:[#allocation16 + $0xd8] sm:$0xff]  ;;  %v624_v3 = vld [vmem:[#allocation16] sm:$0xff]  ;;  %v3612_v7 = vadd.f32 %v2978_v62, %v298_v61 }
  0x67   :  { %2821 = vmatmul.msk.f32.vlgmr.msrb.gmra.mxu3 %vm380_vm0, %v3583_v24  ;;  %557 = vmatpush.msra.mxu0 %v336_v39  ;;  %v625_v4 = vld [vmem:[#allocation16 + $0x8] sm:$0xff]  ;;  %v638_v5 = vld [vmem:[#allocation16 + $0x70] sm:$0xff]  ;;  %v639_v6 = vld [vmem:[#allocation16 + $0x78] sm:$0xff] }
  0x68   :  { %577 = vmatpush.msra.mxu1 %v337_v40  ;;  %596 = vmatpush.msra.mxu2 %v350_v41  ;;  %v626_v8 = vld [vmem:[#allocation16 + $0x10] sm:$0xff]  ;;  %v627_v9 = vld [vmem:[#allocation16 + $0x18] sm:$0xff]  ;;  %v664_v10 = vld [vmem:[#allocation16 + $0x140] sm:$0xff] }
  0x69   :  { %616 = vmatpush.msra.mxu3 %v351_v42  ;;  %558 = vmatpush.msra.mxu0 %v324_v43  ;;  %v665_v11 = vld [vmem:[#allocation16 + $0x148] sm:$0xff]  ;;  %v652_v12 = vld [vmem:[#allocation16 + $0xe0] sm:$0xff]  ;;  %v666_v14 = vld [vmem:[#allocation16 + $0x150] sm:$0xff] }
  0x6a   :  { %578 = vmatpush.msra.mxu1 %v325_v44  ;;  %597 = vmatpush.msra.mxu2 %v338_v45  ;;  %v653_v13 = vld [vmem:[#allocation16 + $0xe8] sm:$0xff]  ;;  %v667_v15 = vld [vmem:[#allocation16 + $0x158] sm:$0xff]  ;;  %v640_v16 = vld [vmem:[#allocation16 + $0x80] sm:$0xff] }
  0x6b   :  { %617 = vmatpush.msra.mxu3 %v339_v46  ;;  %559 = vmatpush.msra.mxu0 %v312_v47  ;;  %v641_v17 = vld [vmem:[#allocation16 + $0x88] sm:$0xff]  ;;  %v654_v18 = vld [vmem:[#allocation16 + $0xf0] sm:$0xff]  ;;  %v655_v19 = vld [vmem:[#allocation16 + $0xf8] sm:$0xff] }
  0x6c   :  { %579 = vmatpush.msra.mxu1 %v313_v48  ;;  %598 = vmatpush.msra.mxu2 %v326_v49  ;;  %v628_v20 = vld [vmem:[#allocation16 + $0x20] sm:$0xff]  ;;  %v629_v21 = vld [vmem:[#allocation16 + $0x28] sm:$0xff]  ;;  %v642_v22 = vld [vmem:[#allocation16 + $0x90] sm:$0xff] }
  0x6d   :  { %618 = vmatpush.msra.mxu3 %v327_v50  ;;  %2822 = vmatmul.msk.f32.vlgmr.msra.gmra.mxu0 %vm380_vm0, %v3583_v24  ;;  %v643_v23 = vld [vmem:[#allocation16 + $0x98] sm:$0xff]  ;;  %v668_v26 = vld [vmem:[#allocation16 + $0x160] sm:$0xff]  ;;  %v669_v27 = vld [vmem:[#allocation16 + $0x168] sm:$0xff] }
  0x6e   :  { %2823 = vmatmul.msk.f32.vlgmr.msra.gmra.mxu1 %vm380_vm0, %v3583_v24  ;;  %599 = vmatpush.msra.mxu2 %v314_v51  ;;  %v631_v25 = vld [vmem:[#allocation16 + $0x38] sm:$0xff]  ;;  %v656_v28 = vld [vmem:[#allocation16 + $0x100] sm:$0xff]  ;;  %v657_v29 = vld [vmem:[#allocation16 + $0x108] sm:$0xff] }
  0x6f   :  { %619 = vmatpush.msra.mxu3 %v315_v52  ;;  %715 = vmatpush.msrb.mxu0 %v660_v54  ;;  %v670_v30 = vld [vmem:[#allocation16 + $0x170] sm:$0xff]  ;;  %v671_v31 = vld [vmem:[#allocation16 + $0x178] sm:$0xff]  ;;  %v644_v32 = vld [vmem:[#allocation16 + $0xa0] sm:$0xff] }
  0x70   :  { %735 = vmatpush.msrb.mxu1 %v661_v55  ;;  %2824 = vmatmul.msk.f32.vlgmr.msra.gmra.mxu2 %vm380_vm0, %v3583_v24  ;;  %v645_v33 = vld [vmem:[#allocation16 + $0xa8] sm:$0xff]  ;;  %v658_v34 = vld [vmem:[#allocation16 + $0x110] sm:$0xff]  ;;  %v659_v35 = vld [vmem:[#allocation16 + $0x118] sm:$0xff] }
  0x71   :  { %2825 = vmatmul.msk.f32.vlgmr.msra.gmra.mxu3 %vm380_vm0, %v3583_v24  ;;  %716 = vmatpush.msrb.mxu0 %v648_v57  ;;  %v630_v24 = vld [vmem:[#allocation16 + $0x30] sm:$0xff]  ;;  %v632_v36 = vld [vmem:[#allocation16 + $0x40] sm:$0xff]  ;;  %v633_v37 = vld [vmem:[#allocation16 + $0x48] sm:$0xff] }
  0x72   :  { %736 = vmatpush.msrb.mxu1 %v649_v58  ;;  %755 = vmatpush.msrb.mxu2 %v662_v59  ;;  %v646_v38 = vld [vmem:[#allocation16 + $0xb0] sm:$0xff]  ;;  %v647_v39 = vld [vmem:[#allocation16 + $0xb8] sm:$0xff] }
  0x73   :  { %775 = vmatpush.msrb.mxu3 %v663_v60  ;;  %717 = vmatpush.msrb.mxu0 %v636_v63  ;;  %v634_v40 = vld [vmem:[#allocation16 + $0x50] sm:$0xff]  ;;  %v635_v41 = vld [vmem:[#allocation16 + $0x58] sm:$0xff] }
  0x74   :  { %737 = vmatpush.msrb.mxu1 %v637_v0  ;;  %756 = vmatpush.msrb.mxu2 %v650_v1  ;;  %v352_v42 = vld [vmem:[#allocation14] sm:$0xff]  ;;  %v3640_v48 = vld [vmem:[#allocation19] sm:$0xff]  ;;  %v353_v63 = vld [vmem:[#allocation14 + $0x8] sm:$0xf] }
  0x75   :  { %776 = vmatpush.msrb.mxu3 %v651_v2  ;;  %718 = vmatpush.msrb.mxu0 %v624_v3  ;;  %v356_v43 = vperm.slane %v352_v42, 0  ;;  %v357_v44 = vperm.slane %v352_v42, 1  ;;  %v3638_v47 = vld [vmem:[#allocation19 + $0x8] sm:$0xff]  ;;  %v358_v51 = vperm.slane %v352_v42, 2  ;;  %v359_v52 = vperm.slane %v352_v42, 3 }
  0x76   :  { %738 = vmatpush.msrb.mxu1 %v625_v4  ;;  %757 = vmatpush.msrb.mxu2 %v638_v5  ;;  %v360_v53 = vperm.slane %v352_v42, 4  ;;  %v361_v54 = vperm.slane %v352_v42, 5  ;;  %v362_v0 = vperm.slane %v352_v42, 6  ;;  %v363_v1 = vperm.slane %v352_v42, 7 }
  0x77   :  { %777 = vmatpush.msrb.mxu3 %v639_v6  ;;  %2826 = vmatmul.msk.f32.vlgmr.msrb.gmra.mxu0 %vm380_vm0, %v3612_v7  ;;  %v364_v2 = vperm.slane %v353_v63, 0  ;;  %v365_v3 = vperm.slane %v353_v63, 1 }
  0x78   :  { %2827 = vmatmul.msk.f32.vlgmr.msrb.gmra.mxu1 %vm380_vm0, %v3612_v7  ;;  %758 = vmatpush.msrb.mxu2 %v626_v8 }
  0x79   :  { %778 = vmatpush.msrb.mxu3 %v627_v9  ;;  %795 = vmatpush.msra.mxu0 %v664_v10 }
  0x7a   :  { %815 = vmatpush.msra.mxu1 %v665_v11  ;;  %2828 = vmatmul.msk.f32.vlgmr.msrb.gmra.mxu2 %vm380_vm0, %v3612_v7 }
  0x7b   :  { %2829 = vmatmul.msk.f32.vlgmr.msrb.gmra.mxu3 %vm380_vm0, %v3612_v7  ;;  %796 = vmatpush.msra.mxu0 %v652_v12 }
  0x7c   :  { %816 = vmatpush.msra.mxu1 %v653_v13  ;;  %835 = vmatpush.msra.mxu2 %v666_v14  ;;  %v672_v13 = vld [vmem:[#allocation17] sm:$0xff]  ;;  %v366_v14 = vperm.slane %v353_v63, 2 }
  0x7d   :  { %855 = vmatpush.msra.mxu3 %v667_v15  ;;  %797 = vmatpush.msra.mxu0 %v640_v16  ;;  %v367_v15 = vperm.slane %v353_v63, 3  ;;  %v676_v16 = vperm.slane %v672_v13, 0 }
  0x7e   :  { %817 = vmatpush.msra.mxu1 %v641_v17  ;;  %836 = vmatpush.msra.mxu2 %v654_v18  ;;  %v677_v17 = vperm.slane %v672_v13, 1 }
  0x7f   :  { %856 = vmatpush.msra.mxu3 %v655_v19  ;;  %798 = vmatpush.msra.mxu0 %v628_v20 }
  0x80   :  { %818 = vmatpush.msra.mxu1 %v629_v21  ;;  %837 = vmatpush.msra.mxu2 %v642_v22 }
  0x81   :  { %857 = vmatpush.msra.mxu3 %v643_v23  ;;  %2830 = vmatmul.msk.f32.vlgmr.msra.gmra.mxu0 %vm380_vm0, %v3612_v7 }
  0x82   :  { %2831 = vmatmul.msk.f32.vlgmr.msra.gmra.mxu1 %vm380_vm0, %v3612_v7  ;;  %838 = vmatpush.msra.mxu2 %v630_v24 }
  0x83   :  { %858 = vmatpush.msra.mxu3 %v631_v25  ;;  %875 = vmatpush.msrb.mxu0 %v668_v26  ;;  %v678_v26 = vperm.slane %v672_v13, 2 }
  0x84   :  { %895 = vmatpush.msrb.mxu1 %v669_v27  ;;  %2832 = vmatmul.msk.f32.vlgmr.msra.gmra.mxu2 %vm380_vm0, %v3612_v7  ;;  %v679_v27 = vperm.slane %v672_v13, 3 }
  0x85   :  { %2833 = vmatmul.msk.f32.vlgmr.msra.gmra.mxu3 %vm380_vm0, %v3612_v7  ;;  %876 = vmatpush.msrb.mxu0 %v656_v28  ;;  %v680_v28 = vperm.slane %v672_v13, 4 }
  0x86   :  { %896 = vmatpush.msrb.mxu1 %v657_v29  ;;  %915 = vmatpush.msrb.mxu2 %v670_v30  ;;  %v681_v29 = vperm.slane %v672_v13, 5 }
  0x87   :  { %935 = vmatpush.msrb.mxu3 %v671_v31  ;;  %877 = vmatpush.msrb.mxu0 %v644_v32 }
  0x88   :  { %897 = vmatpush.msrb.mxu1 %v645_v33  ;;  %916 = vmatpush.msrb.mxu2 %v658_v34 }
  0x89   :  { %936 = vmatpush.msrb.mxu3 %v659_v35  ;;  %878 = vmatpush.msrb.mxu0 %v632_v36 }
  0x8a   :  { %898 = vmatpush.msrb.mxu1 %v633_v37  ;;  %917 = vmatpush.msrb.mxu2 %v646_v38 }
  0x8b   :  { %937 = vmatpush.msrb.mxu3 %v647_v39  ;;  %2834 = vmatmul.msk.f32.vlgmr.msrb.gmra.mxu0 %vm380_vm0, %v3612_v7  ;;  %v673_v39 = vld [vmem:[#allocation17 + $0x8] sm:$0xf] }
  0x8c   :  { %2835 = vmatmul.msk.f32.vlgmr.msrb.gmra.mxu1 %vm380_vm0, %v3612_v7  ;;  %918 = vmatpush.msrb.mxu2 %v634_v40  ;;  %v682_v40 = vperm.slane %v672_v13, 6  ;;  %v684_v42 = vperm.slane %v673_v39, 0 }
  0x8d   :  { %938 = vmatpush.msrb.mxu3 %v635_v41  ;;  %2836 = vmatmul.msk.f32.vlgmr.msrb.gmra.mxu2 %vm380_vm0, %v3612_v7  ;;  %v683_v41 = vperm.slane %v672_v13, 7  ;;  %v3768_v13 = vld [vmem:[#allocation20 + $0x20] sm:$0xff] }
  0x8e   :  { %2837 = vmatmul.msk.f32.vlgmr.msrb.gmra.mxu3 %vm380_vm0, %v3612_v7  ;;  %1030 = vmatpush.msra.mxu0 %v3638_v47 }
  0x8f   :  { %1131 = vmatpush.msra.mxu2 %v3638_v47 }
  0x90   :  { %1031 = vmatpush.msra.mxu0 %v3640_v48 }
  0x91   :  { %1132 = vmatpush.msra.mxu2 %v3640_v48 }
  0xd9   :  { %v421_v46 = vpop.f32.mrf.mxu1 }
  0xda   :  { %v401_v45 = vpop.f32.mrf.mxu0  ;;  %v422_v50 = vadd.f32 %v421_v46, %v357_v44 }
  0xdb   :  { %v402_v49 = vadd.f32 %v401_v45, %v356_v43  ;;  %v685_v43 = vperm.slane %v673_v39, 1 }
  0xdc   :  { %945 = vst [vmem:[#allocation2 + $0x4] sm:$0xf] %v422_v50 }
  0xdd   :  { %943 = vst [vmem:[#allocation2] sm:$0xf] %v402_v49 }
  0xe1   :  { %v441_v55 = vpop.f32.mrf.mxu2  ;;  %v461_v56 = vpop.f32.mrf.mxu3 }
  0xe2   :  { %v442_v57 = vadd.f32 %v441_v55, %v358_v51  ;;  %v462_v58 = vadd.f32 %v461_v56, %v359_v52  ;;  %v481_v59 = vpop.f32.mrf.mxu0  ;;  %v501_v60 = vpop.f32.mrf.mxu1  ;;  %v686_v56 = vperm.slane %v673_v39, 2 }
  0xe3   :  { %v482_v61 = vadd.f32 %v481_v59, %v360_v53  ;;  %v502_v62 = vadd.f32 %v501_v60, %v361_v54 }
  0xe4   :  { %947 = vst [vmem:[#allocation2 + $0x8] sm:$0xf] %v442_v57  ;;  %v687_v57 = vperm.slane %v673_v39, 3 }
  0xe5   :  { %949 = vst [vmem:[#allocation2 + $0xc] sm:$0xf] %v462_v58 }
  0xe6   :  { %951 = vst [vmem:[#allocation2 + $0x10] sm:$0xf] %v482_v61 }
  0xe7   :  { %953 = vst [vmem:[#allocation2 + $0x14] sm:$0xf] %v502_v62 }
  0xe9   :  { %v521_v4 = vpop.f32.mrf.mxu2 }
  0xea   :  { %v541_v5 = vpop.f32.mrf.mxu3  ;;  %v522_v6 = vadd.f32 %v521_v4, %v362_v0  ;;  %v561_v9 = vpop.f32.mrf.mxu0  ;;  %v3724_v4 = vld [vmem:[#allocation20 + $0x60] sm:$0xff] }
  0xeb   :  { %v542_v8 = vadd.f32 %v541_v5, %v363_v1  ;;  %v581_v10 = vpop.f32.mrf.mxu1  ;;  %v562_v11 = vadd.f32 %v561_v9, %v364_v2  ;;  %v3712_v1 = vld [vmem:[#allocation20 + $0x78] sm:$0xff]  ;;  %v3714_v2 = vld [vmem:[#allocation20 + $0x70] sm:$0xff]  ;;  %v3746_v9 = vld [vmem:[#allocation20 + $0x40] sm:$0xff] }
  0xec   :  { %v582_v12 = vadd.f32 %v581_v10, %v365_v3  ;;  %955 = vst [vmem:[#allocation2 + $0x18] sm:$0xf] %v522_v6  ;;  %1057 = vmatpush.msra.mxu1 %v3712_v1  ;;  %1158 = vmatpush.msra.mxu3 %v3712_v1  ;;  %v3718_v3 = vld [vmem:[#allocation20 + $0x68] sm:$0xff]  ;;  %v3734_v5 = vld [vmem:[#allocation20 + $0x58] sm:$0xff]  ;;  %v3738_v6 = vld [vmem:[#allocation20 + $0x50] sm:$0xff] }
  0xed   :  { %957 = vst [vmem:[#allocation2 + $0x1c] sm:$0xf] %v542_v8  ;;  %v3740_v8 = vld [vmem:[#allocation20 + $0x48] sm:$0xff]  ;;  %v3756_v10 = vld [vmem:[#allocation20 + $0x38] sm:$0xff] }
  0xee   :  { %959 = vst [vmem:[#allocation2 + $0x20] sm:$0xf] %v562_v11  ;;  %1058 = vmatpush.msra.mxu1 %v3714_v2  ;;  %1159 = vmatpush.msra.mxu3 %v3714_v2  ;;  %v3760_v11 = vld [vmem:[#allocation20 + $0x30] sm:$0xff] }
  0xef   :  { %961 = vst [vmem:[#allocation2 + $0x24] sm:$0xf] %v582_v12  ;;  %v3762_v12 = vld [vmem:[#allocation20 + $0x28] sm:$0xff] }
  0xf0   :  { %1059 = vmatpush.msra.mxu1 %v3718_v3  ;;  %1160 = vmatpush.msra.mxu3 %v3718_v3 }
  0xf2   :  { %1060 = vmatpush.msra.mxu1 %v3724_v4  ;;  %1161 = vmatpush.msra.mxu3 %v3724_v4 }
  0xf3   :  { %v601_v18 = vpop.f32.mrf.mxu2 }
  0xf4   :  { %v621_v19 = vpop.f32.mrf.mxu3  ;;  %v602_v20 = vadd.f32 %v601_v18, %v366_v14  ;;  %v720_v22 = vpop.f32.mrf.mxu0  ;;  %1061 = vmatpush.msra.mxu1 %v3734_v5  ;;  %1162 = vmatpush.msra.mxu3 %v3734_v5  ;;  %v3778_v14 = vld [vmem:[#allocation20 + $0x18] sm:$0xff] }
  0xf5   :  { %v622_v21 = vadd.f32 %v621_v19, %v367_v15  ;;  %v740_v23 = vpop.f32.mrf.mxu1  ;;  %v721_v24 = vadd.f32 %v720_v22, %v676_v16  ;;  %v3782_v15 = vld [vmem:[#allocation20 + $0x10] sm:$0xff]  ;;  %v3784_v16 = vld [vmem:[#allocation20 + $0x8] sm:$0xff] }
  0xf6   :  { %v741_v25 = vadd.f32 %v740_v23, %v677_v17  ;;  %963 = vst [vmem:[#allocation2 + $0x28] sm:$0xf] %v602_v20  ;;  %1062 = vmatpush.msra.mxu1 %v3738_v6  ;;  %1163 = vmatpush.msra.mxu3 %v3738_v6  ;;  %v3790_v17 = vld [vmem:[#allocation20] sm:$0xff] }
  0xf7   :  { %965 = vst [vmem:[#allocation2 + $0x2c] sm:$0xf] %v622_v21  ;;  %v3828_v20 = vld [vmem:[#allocation2] sm:$0xff] }
  0xf8   :  { %944 = vst [vmem:[#allocation3] sm:$0xf] %v721_v24  ;;  %1063 = vmatpush.msra.mxu1 %v3740_v8  ;;  %1164 = vmatpush.msra.mxu3 %v3740_v8 }
  0xf9   :  { %946 = vst [vmem:[#allocation3 + $0x4] sm:$0xf] %v741_v25  ;;  %v3838_v25 = vld [vmem:[#allocation2 + $0x8] sm:$0xff] }
  0xfa   :  { %1064 = vmatpush.msra.mxu1 %v3746_v9  ;;  %1165 = vmatpush.msra.mxu3 %v3746_v9 }
  0xfc   :  { %1065 = vmatpush.msra.mxu1 %v3756_v10  ;;  %1166 = vmatpush.msra.mxu3 %v3756_v10 }
  0xfd   :  { %v760_v30 = vpop.f32.mrf.mxu2 }
  0xfe   :  { %v780_v31 = vpop.f32.mrf.mxu3  ;;  %v761_v32 = vadd.f32 %v760_v30, %v678_v26  ;;  %v800_v34 = vpop.f32.mrf.mxu0  ;;  %1066 = vmatpush.msra.mxu1 %v3760_v11  ;;  %1167 = vmatpush.msra.mxu3 %v3760_v11 }
  0xff   :  { %v781_v33 = vadd.f32 %v780_v31, %v679_v27  ;;  %v820_v35 = vpop.f32.mrf.mxu1  ;;  %v801_v36 = vadd.f32 %v800_v34, %v680_v28 }
 0x100   :  { %v821_v37 = vadd.f32 %v820_v35, %v681_v29  ;;  %948 = vst [vmem:[#allocation3 + $0x8] sm:$0xf] %v761_v32  ;;  %v3646_v38 = vld [vmem:[#allocation3] sm:$0xff]  ;;  %1067 = vmatpush.msra.mxu1 %v3762_v12  ;;  %1168 = vmatpush.msra.mxu3 %v3762_v12 }
 0x101   :  { %950 = vst [vmem:[#allocation3 + $0xc] sm:$0xf] %v781_v33  ;;  %1093 = vrot.lane.b32.xlu0 %v3646_v38, %s3388_s13  ;;  %2838 = vmatmul.msk.f32.vlgmr.msra.gmra.mxu0 %vm997_vm1, %v3646_v38  ;;  %v3845_v29 = vld [vmem:[#allocation2 + $0x10] sm:$0xff]  ;;  %v3853_v33 = vld [vmem:[#allocation2 + $0x18] sm:$0xff] }
 0x102   :  { %952 = vst [vmem:[#allocation3 + $0x10] sm:$0xf] %v801_v36  ;;  %1068 = vmatpush.msra.mxu1 %v3768_v13  ;;  %1169 = vmatpush.msra.mxu3 %v3768_v13 }
 0x103   :  { %954 = vst [vmem:[#allocation3 + $0x14] sm:$0xf] %v821_v37  ;;  %v3861_v37 = vld [vmem:[#allocation2 + $0x20] sm:$0xff] }
 0x104   :  { %1069 = vmatpush.msra.mxu1 %v3778_v14  ;;  %1170 = vmatpush.msra.mxu3 %v3778_v14 }
 0x106   :  { %1070 = vmatpush.msra.mxu1 %v3782_v15  ;;  %1171 = vmatpush.msra.mxu3 %v3782_v15 }
 0x107   :  { %v840_v44 = vpop.f32.mrf.mxu2 }
 0x108   :  { %v860_v45 = vpop.f32.mrf.mxu3  ;;  %v841_v46 = vadd.f32 %v840_v44, %v682_v40  ;;  %v880_v50 = vpop.f32.mrf.mxu0  ;;  %v3652_v52 = vld [vmem:[#allocation3 + $0x8] sm:$0xff]  ;;  %1071 = vmatpush.msra.mxu1 %v3784_v16  ;;  %1172 = vmatpush.msra.mxu3 %v3784_v16  ;;  %v3867_v40 = vld [vmem:[#allocation2 + $0x28] sm:$0xff] }
 0x109   :  { %v861_v49 = vadd.f32 %v860_v45, %v683_v41  ;;  %v900_v51 = vpop.f32.mrf.mxu1  ;;  %v881_v53 = vadd.f32 %v880_v50, %v684_v42  ;;  %1095 = vrot.lane.b32.xlu0 %v3652_v52, %s3388_s13  ;;  %2839 = vmatmul.msk.f32.gmra.mxu0 %vm997_vm1, %v3652_v52 }
 0x10a   :  { %v901_v54 = vadd.f32 %v900_v51, %v685_v43  ;;  %956 = vst [vmem:[#allocation3 + $0x18] sm:$0xf] %v841_v46  ;;  %v3658_v55 = vld [vmem:[#allocation3 + $0x10] sm:$0xff]  ;;  %1072 = vmatpush.msra.mxu1 %v3790_v17  ;;  %1173 = vmatpush.msra.mxu3 %v3790_v17 }
 0x10b   :  { %958 = vst [vmem:[#allocation3 + $0x1c] sm:$0xf] %v861_v49  ;;  %1097 = vrot.lane.b32.xlu1 %v3658_v55, %s3388_s13  ;;  %v1092_v43 = vld [vmem:[#allocation22] sm:$0xff] }
 0x10c   :  { %960 = vst [vmem:[#allocation3 + $0x20] sm:$0xf] %v881_v53  ;;  %1340 = vmatpush.msrb.mxu1 %v3638_v47  ;;  %1367 = vmatpush.msrb.mxu3 %v3712_v1 }
 0x10d   :  { %962 = vst [vmem:[#allocation3 + $0x24] sm:$0xf] %v901_v54  ;;  %1282 = vmatpush.msrb.mxu2 %v1092_v43 }
 0x10e   :  { %1341 = vmatpush.msrb.mxu1 %v3640_v48  ;;  %1368 = vmatpush.msrb.mxu3 %v3714_v2 }
 0x110   :  { %v920_v58 = vpop.f32.mrf.mxu2  ;;  %1369 = vmatpush.msrb.mxu3 %v3718_v3 }
 0x111   :  { %v940_v59 = vpop.f32.mrf.mxu3  ;;  %v921_v60 = vadd.f32 %v920_v58, %v686_v56  ;;  %1463 = vrot.lane.b32.xlu0 %v3646_v38, %s3389_s3  ;;  %2840 = vmatmul.msk.f32.gmra.mxu0 %vm997_vm1, %v3658_v55 }
 0x112   :  { %v941_v61 = vadd.f32 %v940_v59, %v687_v57  ;;  %v3665_v62 = vld [vmem:[#allocation3 + $0x18] sm:$0xff]  ;;  %1370 = vmatpush.msrb.mxu3 %v3724_v4 }
 0x113   :  { %964 = vst [vmem:[#allocation3 + $0x28] sm:$0xf] %v921_v60  ;;  %1099 = vrot.lane.b32.xlu1 %v3665_v62, %s3388_s13 }
 0x114   :  { %966 = vst [vmem:[#allocation3 + $0x2c] sm:$0xf] %v941_v61  ;;  %v3669_v63 = vld [vmem:[#allocation3 + $0x20] sm:$0xff]  ;;  %1371 = vmatpush.msrb.mxu3 %v3734_v5 }
 0x115   :  { %1101 = vrot.lane.b32.xlu2 %v3669_v63, %s3388_s13 }
 0x116   :  { %1372 = vmatpush.msrb.mxu3 %v3738_v6 }
 0x118   :  { %1373 = vmatpush.msrb.mxu3 %v3740_v8 }
 0x119   :  { %1304 = vrot.lane.b32.xlu0 %v3652_v52, %s3382_s2  ;;  %2841 = vmatmul.msk.f32.gmra.mxu0 %vm997_vm1, %v3665_v62 }
 0x11a   :  { %1374 = vmatpush.msrb.mxu3 %v3746_v9 }
 0x11b   :  { %v3677_v0 = vld [vmem:[#allocation3 + $0x28] sm:$0xff]  ;;  %1302 = vrot.lane.b32.xlu1 %v3646_v38, %s3382_s2 }
 0x11c   :  { %1375 = vmatpush.msrb.mxu3 %v3756_v10 }
 0x11d   :  { %1103 = vrot.lane.b32.xlu2 %v3677_v0, %s3388_s13 }
 0x11e   :  { %1376 = vmatpush.msrb.mxu3 %v3760_v11 }
 0x120   :  { %1377 = vmatpush.msrb.mxu3 %v3762_v12 }
 0x121   :  { %1469 = vrot.lane.b32.xlu0 %v3665_v62, %s3389_s3  ;;  %2842 = vmatmul.msk.f32.gmra.mxu0 %vm997_vm1, %v3669_v63 }
 0x122   :  { %1378 = vmatpush.msrb.mxu3 %v3768_v13 }
 0x123   :  { %1467 = vrot.lane.b32.xlu1 %v3658_v55, %s3389_s3 }
 0x124   :  { %1379 = vmatpush.msrb.mxu3 %v3778_v14 }
 0x125   :  { %1465 = vrot.lane.b32.xlu2 %v3652_v52, %s3389_s3 }
 0x126   :  { %1380 = vmatpush.msrb.mxu3 %v3782_v15 }
 0x128   :  { %1381 = vmatpush.msrb.mxu3 %v3784_v16 }
 0x129   :  { %1310 = vrot.lane.b32.xlu0 %v3669_v63, %s3382_s2  ;;  %2843 = vmatmul.msk.f32.gmra.mxu0 %vm997_vm1, %v3677_v0 }
 0x12a   :  { %1382 = vmatpush.msrb.mxu3 %v3790_v17 }
 0x12b   :  { %1308 = vrot.lane.b32.xlu1 %v3665_v62, %s3382_s2 }
 0x12d   :  { %1306 = vrot.lane.b32.xlu2 %v3658_v55, %s3382_s2 }
 0x131   :  { %1785 = vrot.lane.b32.xlu0 %v3646_v38, %s3390_s25 }
 0x133   :  { %1473 = vrot.lane.b32.xlu1 %v3677_v0, %s3389_s3 }
 0x135   :  { %1471 = vrot.lane.b32.xlu2 %v3669_v63, %s3389_s3 }
 0x139   :  { %1626 = vrot.lane.b32.xlu0 %v3652_v52, %s3391_s8 }
 0x13b   :  { %1624 = vrot.lane.b32.xlu1 %v3646_v38, %s3391_s8 }
 0x13d   :  { %1312 = vrot.lane.b32.xlu2 %v3677_v0, %s3382_s2  ;;  %s3392_s2 = smov 16  }
 0x141   :  { %1791 = vrot.lane.b32.xlu0 %v3665_v62, %s3390_s25 }
 0x143   :  { %1789 = vrot.lane.b32.xlu1 %v3658_v55, %s3390_s25 }
 0x145   :  { %1787 = vrot.lane.b32.xlu2 %v3652_v52, %s3390_s25 }
 0x149   :  { %1632 = vrot.lane.b32.xlu0 %v3669_v63, %s3391_s8 }
 0x14b   :  { %1630 = vrot.lane.b32.xlu1 %v3665_v62, %s3391_s8 }
 0x14d   :  { %1628 = vrot.lane.b32.xlu2 %v3658_v55, %s3391_s8 }
 0x151   :  { %2107 = vrot.lane.b32.xlu0 %v3646_v38, %s3392_s2 }
 0x153   :  { %1795 = vrot.lane.b32.xlu1 %v3677_v0, %s3390_s25 }
 0x155   :  { %1793 = vrot.lane.b32.xlu2 %v3669_v63, %s3390_s25 }
 0x159   :  { %1948 = vrot.lane.b32.xlu0 %v3652_v52, %s3393_s5 }
 0x15b   :  { %1946 = vrot.lane.b32.xlu1 %v3646_v38, %s3393_s5 }
 0x15d   :  { %1634 = vrot.lane.b32.xlu2 %v3677_v0, %s3391_s8 }
 0x161   :  { %2113 = vrot.lane.b32.xlu0 %v3665_v62, %s3392_s2 }
 0x163   :  { %2111 = vrot.lane.b32.xlu1 %v3658_v55, %s3392_s2 }
 0x165   :  { %2109 = vrot.lane.b32.xlu2 %v3652_v52, %s3392_s2 }
 0x169   :  { %1954 = vrot.lane.b32.xlu0 %v3669_v63, %s3393_s5 }
 0x16b   :  { %1952 = vrot.lane.b32.xlu1 %v3665_v62, %s3393_s5 }
 0x16d   :  { %1950 = vrot.lane.b32.xlu2 %v3658_v55, %s3393_s5 }
 0x16f   :  { %v1102_v31 = vpop.permute.xlu2 %1101 }
 0x173   :  { %2117 = vrot.lane.b32.xlu1 %v3677_v0, %s3392_s2  ;;  %v1094_v18 = vpop.permute.xlu0 %1093 }
 0x174   :  { %2844 = vmatmul.msk.f32.vlgmr.msra.gmra.mxu2 %vm997_vm1, %v1094_v18 }
 0x175   :  { %2115 = vrot.lane.b32.xlu2 %v3669_v63, %s3392_s2  ;;  %1501 = vmatpush.msra.mxu2 %v3638_v47 }
 0x177   :  { %v1104_v35 = vpop.permute.xlu2 %1103  ;;  %1502 = vmatpush.msra.mxu2 %v3640_v48 }
 0x17b   :  { %v1096_v19 = vpop.permute.xlu0 %1095 }
 0x17c   :  { %2845 = vmatmul.msk.f32.gmra.mxu2 %vm997_vm1, %v1096_v19 }
 0x17d   :  { %1956 = vrot.lane.b32.xlu2 %v3677_v0, %s3393_s5  ;;  %v1098_v23 = vpop.permute.xlu1 %1097 }
 0x17e   :  { %v1033_v21 = vpop.f32.mrf.mxu0 }
 0x17f   :  { %v1051_v22 = vmul.f32 %v1033_v21, %v3828_v20  ;;  %v3875_v45 = vpop.permute.xlu2 %1465 }
 0x181   :  { %1073 = vmatmul.f32.vlgmr.msra.gmra.mxu1 %v1051_v22 }
 0x182   :  { %1528 = vmatpush.msra.mxu1 %v3712_v1 }
 0x183   :  { %v3870_v42 = vpop.permute.xlu0 %1463 }
 0x184   :  { %2846 = vmatmul.msk.f32.gmra.mxu2 %vm997_vm1, %v1098_v23  ;;  %1529 = vmatpush.msra.mxu1 %v3714_v2 }
 0x185   :  { %v1100_v27 = vpop.permute.xlu1 %1099 }
 0x186   :  { %v1036_v24 = vpop.f32.mrf.mxu0  ;;  %1530 = vmatpush.msra.mxu1 %v3718_v3 }
 0x187   :  { %v1052_v26 = vmul.f32 %v1036_v24, %v3838_v25  ;;  %v1307_v50 = vpop.permute.xlu2 %1306 }
 0x188   :  { %1531 = vmatpush.msra.mxu1 %v3724_v4 }
 0x189   :  { %1076 = vmatmul.f32.gmra.mxu1 %v1052_v26 }
 0x18a   :  { %1532 = vmatpush.msra.mxu1 %v3734_v5 }
 0x18b   :  { %v1305_v46 = vpop.permute.xlu0 %1304 }
 0x18c   :  { %2847 = vmatmul.msk.f32.gmra.mxu2 %vm997_vm1, %v1100_v27  ;;  %1533 = vmatpush.msra.mxu1 %v3738_v6 }
 0x18d   :  { %v1303_v44 = vpop.permute.xlu1 %1302 }
 0x18e   :  { %v1039_v28 = vpop.f32.mrf.mxu0  ;;  %1534 = vmatpush.msra.mxu1 %v3740_v8 }
 0x18f   :  { %v1053_v30 = vmul.f32 %v1039_v28, %v3845_v29  ;;  %v3884_v53 = vpop.permute.xlu2 %1471 }
 0x190   :  { %1535 = vmatpush.msra.mxu1 %v3746_v9 }
 0x191   :  { %1079 = vmatmul.f32.gmra.mxu1 %v1053_v30 }
 0x192   :  { %1536 = vmatpush.msra.mxu1 %v3756_v10 }
 0x193   :  { %v3881_v51 = vpop.permute.xlu0 %1469 }
 0x194   :  { %2848 = vmatmul.msk.f32.gmra.mxu2 %vm997_vm1, %v1102_v31  ;;  %1537 = vmatpush.msra.mxu1 %v3760_v11 }
 0x195   :  { %v3878_v49 = vpop.permute.xlu1 %1467 }
 0x196   :  { %v1042_v32 = vpop.f32.mrf.mxu0  ;;  %1538 = vmatpush.msra.mxu1 %v3762_v12 }
 0x197   :  { %v1054_v34 = vmul.f32 %v1042_v32, %v3853_v33  ;;  %v1313_v55 = vpop.permute.xlu2 %1312 }
 0x198   :  { %1539 = vmatpush.msra.mxu1 %v3768_v13 }
 0x199   :  { %1082 = vmatmul.f32.gmra.mxu1 %v1054_v34 }
 0x19a   :  { %1540 = vmatpush.msra.mxu1 %v3778_v14 }
 0x19b   :  { %v1311_v54 = vpop.permute.xlu0 %1310 }
 0x19c   :  { %2849 = vmatmul.msk.f32.gmra.mxu2 %vm997_vm1, %v1104_v35  ;;  %1541 = vmatpush.msra.mxu1 %v3782_v15 }
 0x19d   :  { %v1309_v52 = vpop.permute.xlu1 %1308 }
 0x19e   :  { %v1045_v36 = vpop.f32.mrf.mxu0  ;;  %1542 = vmatpush.msra.mxu1 %v3784_v16 }
 0x19f   :  { %v1055_v38 = vmul.f32 %v1045_v36, %v3861_v37 }
 0x1a0   :  { %1543 = vmatpush.msra.mxu1 %v3790_v17 }
 0x1a1   :  { %1085 = vmatmul.f32.gmra.mxu1 %v1055_v38 }
 0x1a5   :  { %v1474_v43 = vpop.permute.xlu1 %1473 }
 0x1a6   :  { %v1048_v39 = vpop.f32.mrf.mxu0 }
 0x1a7   :  { %v1056_v41 = vmul.f32 %v1048_v39, %v3867_v40 }
 0x1a9   :  { %1088 = vmatmul.f32.gmra.mxu1 %v1056_v41 }
 0x1b1   :  { %2862 = vmatmul.msk.f32.vlgmr.msrb.gmra.mxu1 %vm997_vm1, %v1303_v44 }
 0x1b9   :  { %2863 = vmatmul.msk.f32.gmra.mxu1 %vm997_vm1, %v1305_v46  ;;  %v1194_v46 = vld [vmem:[#allocation22 + $0x8] sm:$0xff] }
 0x1ba   :  { %1229 = vmatpush.msrb.mxu0 %v1194_v46 }
 0x1c1   :  { %2864 = vmatmul.msk.f32.gmra.mxu1 %vm997_vm1, %v1307_v50 }
 0x1c9   :  { %2865 = vmatmul.msk.f32.gmra.mxu1 %vm997_vm1, %v1309_v52 }
 0x1d1   :  { %2866 = vmatmul.msk.f32.gmra.mxu1 %vm997_vm1, %v1311_v54 }
 0x1d9   :  { %2867 = vmatmul.msk.f32.gmra.mxu1 %vm997_vm1, %v1313_v55  ;;  %v1403_v55 = vld [vmem:[#allocation22 + $0x10] sm:$0xff] }
 0x1da   :  { %1437 = vmatpush.msra.mxu0 %v1403_v55 }
 0x1f7   :  { %v1134_v56 = vpop.f32.mrf.mxu2 }
 0x1f8   :  { %v1152_v57 = vmul.f32 %v1134_v56, %v3828_v20 }
 0x1fa   :  { %1174 = vmatmul.f32.vlgmr.msra.gmra.mxu3 %v1152_v57 }
 0x1fe   :  { %v1074_v58 = vpop.f32.mrf.mxu1 }
 0x1ff   :  { %v1137_v59 = vpop.f32.mrf.mxu2  ;;  %2856 = vmatmul.msk.f32.vlgmr.msrb.gmra.mxu2 %vm1195_vm2, %v1074_v58 }
 0x200   :  { %v1153_v60 = vmul.f32 %v1137_v59, %v3838_v25  ;;  %1689 = vmatpush.msrb.mxu2 %v3712_v1 }
 0x202   :  { %1177 = vmatmul.f32.gmra.mxu3 %v1153_v60  ;;  %1690 = vmatpush.msrb.mxu2 %v3714_v2 }
 0x204   :  { %1691 = vmatpush.msrb.mxu2 %v3718_v3 }
 0x206   :  { %v1077_v61 = vpop.f32.mrf.mxu1  ;;  %1692 = vmatpush.msrb.mxu2 %v3724_v4 }
 0x207   :  { %v1140_v62 = vpop.f32.mrf.mxu2  ;;  %2857 = vmatmul.msk.f32.gmra.mxu2 %vm1195_vm2, %v1077_v61 }
 0x208   :  { %v1154_v63 = vmul.f32 %v1140_v62, %v3845_v29  ;;  %1693 = vmatpush.msrb.mxu2 %v3734_v5 }
 0x20a   :  { %1180 = vmatmul.f32.gmra.mxu3 %v1154_v63  ;;  %1694 = vmatpush.msrb.mxu2 %v3738_v6 }
 0x20c   :  { %1695 = vmatpush.msrb.mxu2 %v3740_v8 }
 0x20e   :  { %v1080_v0 = vpop.f32.mrf.mxu1  ;;  %1696 = vmatpush.msrb.mxu2 %v3746_v9 }
 0x20f   :  { %v1143_v18 = vpop.f32.mrf.mxu2  ;;  %2858 = vmatmul.msk.f32.gmra.mxu2 %vm1195_vm2, %v1080_v0 }
 0x210   :  { %v1155_v19 = vmul.f32 %v1143_v18, %v3853_v33  ;;  %1697 = vmatpush.msrb.mxu2 %v3756_v10 }
 0x212   :  { %1183 = vmatmul.f32.gmra.mxu3 %v1155_v19  ;;  %1698 = vmatpush.msrb.mxu2 %v3760_v11 }
 0x214   :  { %1699 = vmatpush.msrb.mxu2 %v3762_v12 }
 0x216   :  { %v1083_v21 = vpop.f32.mrf.mxu1  ;;  %1700 = vmatpush.msrb.mxu2 %v3768_v13 }
 0x217   :  { %v1146_v22 = vpop.f32.mrf.mxu2  ;;  %2859 = vmatmul.msk.f32.gmra.mxu2 %vm1195_vm2, %v1083_v21 }
 0x218   :  { %v1156_v23 = vmul.f32 %v1146_v22, %v3861_v37  ;;  %1701 = vmatpush.msrb.mxu2 %v3778_v14 }
 0x21a   :  { %1186 = vmatmul.f32.gmra.mxu3 %v1156_v23  ;;  %1702 = vmatpush.msrb.mxu2 %v3782_v15 }
 0x21c   :  { %1703 = vmatpush.msrb.mxu2 %v3784_v16 }
 0x21e   :  { %v1086_v24 = vpop.f32.mrf.mxu1  ;;  %1704 = vmatpush.msrb.mxu2 %v3790_v17 }
 0x21f   :  { %v1149_v26 = vpop.f32.mrf.mxu2  ;;  %2860 = vmatmul.msk.f32.gmra.mxu2 %vm1195_vm2, %v1086_v24 }
 0x220   :  { %v1157_v27 = vmul.f32 %v1149_v26, %v3867_v40 }
 0x222   :  { %1189 = vmatmul.f32.gmra.mxu3 %v1157_v27 }
 0x226   :  { %v1089_v28 = vpop.f32.mrf.mxu1 }
 0x227   :  { %2861 = vmatmul.msk.f32.gmra.mxu2 %vm1195_vm2, %v1089_v28 }
 0x22e   :  { %v1343_v30 = vpop.f32.mrf.mxu1 }
 0x22f   :  { %v1361_v31 = vmul.f32 %v1343_v30, %v3828_v20  ;;  %2874 = vmatmul.msk.f32.vlgmr.msra.gmra.mxu2 %vm997_vm1, %v3870_v42 }
 0x231   :  { %1383 = vmatmul.f32.vlgmr.msrb.gmra.mxu3 %v1361_v31 }
 0x236   :  { %v1346_v32 = vpop.f32.mrf.mxu1 }
 0x237   :  { %2875 = vmatmul.msk.f32.gmra.mxu2 %vm997_vm1, %v3875_v45  ;;  %v1362_v34 = vmul.f32 %v1346_v32, %v3838_v25 }
 0x239   :  { %1386 = vmatmul.f32.gmra.mxu3 %v1362_v34 }
 0x23e   :  { %v1349_v35 = vpop.f32.mrf.mxu1 }
 0x23f   :  { %2876 = vmatmul.msk.f32.gmra.mxu2 %vm997_vm1, %v3878_v49  ;;  %v1363_v36 = vmul.f32 %v1349_v35, %v3845_v29 }
 0x241   :  { %1389 = vmatmul.f32.gmra.mxu3 %v1363_v36 }
 0x246   :  { %v1352_v38 = vpop.f32.mrf.mxu1 }
 0x247   :  { %2877 = vmatmul.msk.f32.gmra.mxu2 %vm997_vm1, %v3881_v51  ;;  %v1364_v39 = vmul.f32 %v1352_v38, %v3853_v33  ;;  %v3981_v38 = vpop.permute.xlu0 %1785 }
 0x249   :  { %1392 = vmatmul.f32.gmra.mxu3 %v1364_v39  ;;  %v1625_v39 = vpop.permute.xlu1 %1624 }
 0x24e   :  { %v1355_v41 = vpop.f32.mrf.mxu1 }
 0x24f   :  { %2878 = vmatmul.msk.f32.gmra.mxu2 %vm997_vm1, %v3884_v53  ;;  %v1365_v42 = vmul.f32 %v1355_v41, %v3861_v37  ;;  %v1564_v41 = vld [vmem:[#allocation22 + $0x18] sm:$0xff] }
 0x250   :  { %1598 = vmatpush.msra.mxu3 %v1564_v41 }
 0x251   :  { %1395 = vmatmul.f32.gmra.mxu3 %v1365_v42  ;;  %v1788_v42 = vpop.permute.xlu2 %1787 }
 0x252   :  { %1823 = vmatpush.msrb.mxu3 %v3638_v47 }
 0x254   :  { %1824 = vmatpush.msrb.mxu3 %v3640_v48 }
 0x256   :  { %v1358_v44 = vpop.f32.mrf.mxu1 }
 0x257   :  { %2879 = vmatmul.msk.f32.gmra.mxu2 %vm997_vm1, %v1474_v43  ;;  %v1366_v45 = vmul.f32 %v1358_v44, %v3867_v40  ;;  %v1627_v43 = vpop.permute.xlu0 %1626  ;;  %v1790_v44 = vpop.permute.xlu1 %1789 }
 0x259   :  { %1398 = vmatmul.f32.gmra.mxu3 %v1366_v45  ;;  %v1629_v45 = vpop.permute.xlu2 %1628 }
 0x25f   :  { %v1792_v46 = vpop.permute.xlu0 %1791 }
 0x27d   :  { %v1175_v49 = vpop.f32.mrf.mxu3 }
 0x27e   :  { %2850 = vmatmul.msk.f32.vlgmr.msrb.gmra.mxu0 %vm1195_vm2, %v1175_v49 }
 0x27f   :  { %1662 = vmatpush.msrb.mxu0 %v3638_v47  ;;  %v1633_v47 = vpop.permute.xlu0 %1632 }
 0x281   :  { %1663 = vmatpush.msrb.mxu0 %v3640_v48 }
 0x282   :  { %v3934_v50 = vpop.f32.mrf.mxu2 }
 0x285   :  { %v1178_v51 = vpop.f32.mrf.mxu3 }
 0x286   :  { %2851 = vmatmul.msk.f32.gmra.mxu0 %vm1195_vm2, %v1178_v51  ;;  %v1631_v51 = vpop.permute.xlu1 %1630 }
 0x28a   :  { %v3937_v52 = vpop.f32.mrf.mxu2 }
 0x28d   :  { %v1181_v53 = vpop.f32.mrf.mxu3 }
 0x28e   :  { %2852 = vmatmul.msk.f32.gmra.mxu0 %vm1195_vm2, %v1181_v53  ;;  %v1794_v53 = vpop.permute.xlu2 %1793 }
 0x292   :  { %v3940_v54 = vpop.f32.mrf.mxu2 }
 0x295   :  { %v1184_v56 = vpop.f32.mrf.mxu3 }
 0x296   :  { %2853 = vmatmul.msk.f32.gmra.mxu0 %vm1195_vm2, %v1184_v56  ;;  %v1635_v48 = vpop.permute.xlu2 %1634 }
 0x29a   :  { %v3945_v57 = vpop.f32.mrf.mxu2 }
 0x29d   :  { %v1187_v58 = vpop.f32.mrf.mxu3 }
 0x29e   :  { %2854 = vmatmul.msk.f32.gmra.mxu0 %vm1195_vm2, %v1187_v58 }
 0x2a2   :  { %v3948_v59 = vpop.f32.mrf.mxu2 }
 0x2a5   :  { %v1190_v60 = vpop.f32.mrf.mxu3 }
 0x2a6   :  { %2855 = vmatmul.msk.f32.gmra.mxu0 %vm1195_vm2, %v1190_v60 }
 0x2aa   :  { %v3951_v61 = vpop.f32.mrf.mxu2 }
 0x2b2   :  { %v1504_v62 = vpop.f32.mrf.mxu2 }
 0x2b3   :  { %v1522_v63 = vmul.f32 %v1504_v62, %v3828_v20 }
 0x2b4   :  { %v1384_v0 = vpop.f32.mrf.mxu3 }
 0x2b5   :  { %2868 = vmatmul.msk.f32.vlgmr.msra.gmra.mxu0 %vm1195_vm2, %v1384_v0  ;;  %1544 = vmatmul.f32.vlgmr.msra.gmra.mxu1 %v1522_v63 }
 0x2b6   :  { %1850 = vmatpush.msra.mxu0 %v3712_v1 }
 0x2b8   :  { %1851 = vmatpush.msra.mxu0 %v3714_v2 }
 0x2ba   :  { %v1507_v18 = vpop.f32.mrf.mxu2  ;;  %1852 = vmatpush.msra.mxu0 %v3718_v3 }
 0x2bb   :  { %v1523_v19 = vmul.f32 %v1507_v18, %v3838_v25 }
 0x2bc   :  { %v1387_v21 = vpop.f32.mrf.mxu3  ;;  %1853 = vmatpush.msra.mxu0 %v3724_v4 }
 0x2bd   :  { %2869 = vmatmul.msk.f32.gmra.mxu0 %vm1195_vm2, %v1387_v21  ;;  %1547 = vmatmul.f32.gmra.mxu1 %v1523_v19 }
 0x2be   :  { %1854 = vmatpush.msra.mxu0 %v3734_v5 }
 0x2c0   :  { %1855 = vmatpush.msra.mxu0 %v3738_v6 }
 0x2c2   :  { %v1510_v22 = vpop.f32.mrf.mxu2  ;;  %1856 = vmatpush.msra.mxu0 %v3740_v8 }
 0x2c3   :  { %v1524_v23 = vmul.f32 %v1510_v22, %v3845_v29 }
 0x2c4   :  { %v1390_v24 = vpop.f32.mrf.mxu3  ;;  %1857 = vmatpush.msra.mxu0 %v3746_v9 }
 0x2c5   :  { %2870 = vmatmul.msk.f32.gmra.mxu0 %vm1195_vm2, %v1390_v24  ;;  %1550 = vmatmul.f32.gmra.mxu1 %v1524_v23 }
 0x2c6   :  { %1858 = vmatpush.msra.mxu0 %v3756_v10 }
 0x2c8   :  { %1859 = vmatpush.msra.mxu0 %v3760_v11 }
 0x2ca   :  { %v1513_v26 = vpop.f32.mrf.mxu2  ;;  %1860 = vmatpush.msra.mxu0 %v3762_v12 }
 0x2cb   :  { %v1525_v27 = vmul.f32 %v1513_v26, %v3853_v33 }
 0x2cc   :  { %v1393_v28 = vpop.f32.mrf.mxu3  ;;  %1861 = vmatpush.msra.mxu0 %v3768_v13 }
 0x2cd   :  { %2871 = vmatmul.msk.f32.gmra.mxu0 %vm1195_vm2, %v1393_v28  ;;  %1553 = vmatmul.f32.gmra.mxu1 %v1525_v27 }
 0x2ce   :  { %1862 = vmatpush.msra.mxu0 %v3778_v14 }
 0x2d0   :  { %1863 = vmatpush.msra.mxu0 %v3782_v15 }
 0x2d2   :  { %v1516_v30 = vpop.f32.mrf.mxu2  ;;  %1864 = vmatpush.msra.mxu0 %v3784_v16 }
 0x2d3   :  { %v1526_v31 = vmul.f32 %v1516_v30, %v3861_v37 }
 0x2d4   :  { %v1396_v32 = vpop.f32.mrf.mxu3  ;;  %1865 = vmatpush.msra.mxu0 %v3790_v17 }
 0x2d5   :  { %2872 = vmatmul.msk.f32.gmra.mxu0 %vm1195_vm2, %v1396_v32  ;;  %1556 = vmatmul.f32.gmra.mxu1 %v1526_v31 }
 0x2da   :  { %v1519_v34 = vpop.f32.mrf.mxu2 }
 0x2db   :  { %v1527_v35 = vmul.f32 %v1519_v34, %v3867_v40 }
 0x2dc   :  { %v1399_v36 = vpop.f32.mrf.mxu3 }
 0x2dd   :  { %2873 = vmatmul.msk.f32.gmra.mxu0 %vm1195_vm2, %v1399_v36  ;;  %1559 = vmatmul.f32.gmra.mxu1 %v1527_v35 }
 0x2e5   :  { %2886 = vmatmul.msk.f32.vlgmr.msrb.gmra.mxu0 %vm997_vm1, %v1625_v39 }
 0x2ed   :  { %2887 = vmatmul.msk.f32.gmra.mxu0 %vm997_vm1, %v1627_v43 }
 0x2f5   :  { %2888 = vmatmul.msk.f32.gmra.mxu0 %vm997_vm1, %v1629_v45 }
 0x2fb   :  { %v3988_v49 = vpop.f32.mrf.mxu0 }
 0x2fd   :  { %2889 = vmatmul.msk.f32.gmra.mxu0 %vm997_vm1, %v1631_v51 }
 0x303   :  { %v3991_v55 = vpop.f32.mrf.mxu0 }
 0x305   :  { %2890 = vmatmul.msk.f32.gmra.mxu0 %vm997_vm1, %v1633_v47 }
 0x30b   :  { %v3994_v56 = vpop.f32.mrf.mxu0 }
 0x30d   :  { %2891 = vmatmul.msk.f32.gmra.mxu0 %vm997_vm1, %v1635_v48 }
 0x313   :  { %v3997_v58 = vpop.f32.mrf.mxu0 }
 0x31b   :  { %v3999_v60 = vpop.f32.mrf.mxu0 }
 0x323   :  { %v4001_v62 = vpop.f32.mrf.mxu0 }
 0x332   :  { %v4003_v63 = vpop.f32.mrf.mxu0  ;;  %v1545_v0 = vpop.f32.mrf.mxu1 }
 0x333   :  { %2880 = vmatmul.msk.f32.vlgmr.msra.gmra.mxu3 %vm1195_vm2, %v1545_v0 }
 0x334   :  { %2011 = vmatpush.msra.mxu3 %v3712_v1 }
 0x336   :  { %2012 = vmatpush.msra.mxu3 %v3714_v2 }
 0x338   :  { %2013 = vmatpush.msra.mxu3 %v3718_v3 }
 0x33a   :  { %v4009_v18 = vpop.f32.mrf.mxu0  ;;  %v1548_v19 = vpop.f32.mrf.mxu1  ;;  %2014 = vmatpush.msra.mxu3 %v3724_v4 }
 0x33b   :  { %2881 = vmatmul.msk.f32.gmra.mxu3 %vm1195_vm2, %v1548_v19  ;;  %v2990_v19 = vld [vmem:[#allocation19 + $0x8] sm:$0xff] }
 0x33c   :  { %2015 = vmatpush.msra.mxu3 %v3734_v5 }
 0x33e   :  { %2016 = vmatpush.msra.mxu3 %v3738_v6 }
 0x340   :  { %2017 = vmatpush.msra.mxu3 %v3740_v8 }
 0x342   :  { %v4016_v21 = vpop.f32.mrf.mxu0  ;;  %v1551_v22 = vpop.f32.mrf.mxu1  ;;  %2018 = vmatpush.msra.mxu3 %v3746_v9 }
 0x343   :  { %2882 = vmatmul.msk.f32.gmra.mxu3 %vm1195_vm2, %v1551_v22  ;;  %v2991_v22 = vld [vmem:[#allocation19] sm:$0xff] }
 0x344   :  { %2019 = vmatpush.msra.mxu3 %v3756_v10 }
 0x346   :  { %2020 = vmatpush.msra.mxu3 %v3760_v11 }
 0x348   :  { %2021 = vmatpush.msra.mxu3 %v3762_v12 }
 0x34a   :  { %v4023_v23 = vpop.f32.mrf.mxu0  ;;  %v1554_v24 = vpop.f32.mrf.mxu1  ;;  %2022 = vmatpush.msra.mxu3 %v3768_v13 }
 0x34b   :  { %2883 = vmatmul.msk.f32.gmra.mxu3 %vm1195_vm2, %v1554_v24 }
 0x34c   :  { %2023 = vmatpush.msra.mxu3 %v3778_v14 }
 0x34e   :  { %2024 = vmatpush.msra.mxu3 %v3782_v15 }
 0x350   :  { %2025 = vmatpush.msra.mxu3 %v3784_v16 }
 0x352   :  { %v4030_v26 = vpop.f32.mrf.mxu0  ;;  %v1557_v27 = vpop.f32.mrf.mxu1  ;;  %2026 = vmatpush.msra.mxu3 %v3790_v17 }
 0x353   :  { %2884 = vmatmul.msk.f32.gmra.mxu3 %vm1195_vm2, %v1557_v27 }
 0x35a   :  { %v4034_v28 = vpop.f32.mrf.mxu0  ;;  %v1560_v30 = vpop.f32.mrf.mxu1 }
 0x35b   :  { %2885 = vmatmul.msk.f32.gmra.mxu3 %vm1195_vm2, %v1560_v30 }
 0x362   :  { %v1665_v31 = vpop.f32.mrf.mxu0 }
 0x363   :  { %v1683_v32 = vmul.f32 %v1665_v31, %v3828_v20  ;;  %2898 = vmatmul.msk.f32.vlgmr.msrb.gmra.mxu3 %vm997_vm1, %v3981_v38 }
 0x365   :  { %1705 = vmatmul.f32.vlgmr.msrb.gmra.mxu2 %v1683_v32 }
 0x36a   :  { %v1668_v34 = vpop.f32.mrf.mxu0 }
 0x36b   :  { %v1684_v35 = vmul.f32 %v1668_v34, %v3838_v25  ;;  %2899 = vmatmul.msk.f32.gmra.mxu3 %vm997_vm1, %v1788_v42  ;;  %v1796_v42 = vpop.permute.xlu1 %1795 }
 0x36d   :  { %1708 = vmatmul.f32.gmra.mxu2 %v1684_v35 }
 0x372   :  { %v1671_v36 = vpop.f32.mrf.mxu0 }
 0x373   :  { %v1685_v39 = vmul.f32 %v1671_v36, %v3845_v29  ;;  %2900 = vmatmul.msk.f32.gmra.mxu3 %vm997_vm1, %v1790_v44 }
 0x375   :  { %1711 = vmatmul.f32.gmra.mxu2 %v1685_v39 }
 0x37a   :  { %v1674_v41 = vpop.f32.mrf.mxu0 }
 0x37b   :  { %v1686_v43 = vmul.f32 %v1674_v41, %v3853_v33  ;;  %2901 = vmatmul.msk.f32.gmra.mxu3 %vm997_vm1, %v1792_v46  ;;  %v1725_v46 = vld [vmem:[#allocation22 + $0x20] sm:$0xff] }
 0x37c   :  { %1759 = vmatpush.msrb.mxu1 %v1725_v46 }
 0x37d   :  { %1714 = vmatmul.f32.gmra.mxu2 %v1686_v43 }
 0x37e   :  { %1984 = vmatpush.msra.mxu1 %v2990_v19 }
 0x380   :  { %1985 = vmatpush.msra.mxu1 %v2991_v22 }
 0x382   :  { %v1677_v38 = vpop.f32.mrf.mxu0 }
 0x383   :  { %v1687_v45 = vmul.f32 %v1677_v38, %v3861_v37  ;;  %2902 = vmatmul.msk.f32.gmra.mxu3 %vm997_vm1, %v1794_v53 }
 0x385   :  { %1717 = vmatmul.f32.gmra.mxu2 %v1687_v45 }
 0x38a   :  { %v1680_v51 = vpop.f32.mrf.mxu0 }
 0x38b   :  { %v1688_v47 = vmul.f32 %v1680_v51, %v3867_v40  ;;  %2903 = vmatmul.msk.f32.gmra.mxu3 %vm997_vm1, %v1796_v42 }
 0x38d   :  { %1720 = vmatmul.f32.gmra.mxu2 %v1688_v47 }
 0x3b6   :  { %v4050_v44 = vpop.f32.mrf.mxu3 }
 0x3be   :  { %v4052_v48 = vpop.f32.mrf.mxu3 }
 0x3c6   :  { %v4054_v0 = vpop.f32.mrf.mxu3 }
 0x3ce   :  { %v4056_v53 = vpop.f32.mrf.mxu3 }
 0x3d6   :  { %v4058_v24 = vpop.f32.mrf.mxu3 }
 0x3de   :  { %v4060_v27 = vpop.f32.mrf.mxu3 }
 0x3e6   :  { %v1826_v30 = vpop.f32.mrf.mxu3 }
 0x3e7   :  { %v1844_v31 = vmul.f32 %v1826_v30, %v3828_v20 }
 0x3e8   :  { %v1706_v32 = vpop.f32.mrf.mxu2 }
 0x3e9   :  { %2892 = vmatmul.msk.f32.vlgmr.msrb.gmra.mxu1 %vm1195_vm2, %v1706_v32  ;;  %1866 = vmatmul.f32.vlgmr.msra.gmra.mxu0 %v1844_v31  ;;  %v1291_v31 = vadd.f32 %v3940_v54, %v3994_v56  ;;  %v1297_v54 = vadd.f32 %v3948_v59, %v3999_v60 }
 0x3ea   :  { %2172 = vmatpush.msrb.mxu1 %v3712_v1 }
 0x3eb   :  { %v1459_v32 = vadd.f32 %v4016_v21, %v1291_v31  ;;  %v1461_v56 = vadd.f32 %v4030_v26, %v1297_v54 }
 0x3ec   :  { %2173 = vmatpush.msrb.mxu1 %v3714_v2 }
 0x3ed   :  { %v1622_v21 = vadd.f32 %v4058_v24, %v1461_v56 }
 0x3ee   :  { %v1829_v34 = vpop.f32.mrf.mxu3  ;;  %2174 = vmatpush.msrb.mxu1 %v3718_v3 }
 0x3ef   :  { %v1845_v35 = vmul.f32 %v1829_v34, %v3838_v25  ;;  %v1620_v34 = vadd.f32 %v4054_v0, %v1459_v32 }
 0x3f0   :  { %v1709_v36 = vpop.f32.mrf.mxu2  ;;  %2175 = vmatpush.msrb.mxu1 %v3724_v4 }
 0x3f1   :  { %2893 = vmatmul.msk.f32.gmra.mxu1 %vm1195_vm2, %v1709_v36  ;;  %1869 = vmatmul.f32.gmra.mxu0 %v1845_v35 }
 0x3f2   :  { %2176 = vmatpush.msrb.mxu1 %v3734_v5 }
 0x3f4   :  { %2177 = vmatpush.msrb.mxu1 %v3738_v6 }
 0x3f6   :  { %v1832_v39 = vpop.f32.mrf.mxu3  ;;  %2178 = vmatpush.msrb.mxu1 %v3740_v8 }
 0x3f7   :  { %v1846_v1 = vmul.f32 %v1832_v39, %v3845_v29 }
 0x3f8   :  { %v1712_v2 = vpop.f32.mrf.mxu2  ;;  %2179 = vmatpush.msrb.mxu1 %v3746_v9 }
 0x3f9   :  { %2894 = vmatmul.msk.f32.gmra.mxu1 %vm1195_vm2, %v1712_v2  ;;  %1872 = vmatmul.f32.gmra.mxu0 %v1846_v1  ;;  %v1294_v1 = vadd.f32 %v3945_v57, %v3997_v58  ;;  %v1300_v57 = vadd.f32 %v3951_v61, %v4001_v62 }
 0x3fa   :  { %2180 = vmatpush.msrb.mxu1 %v3756_v10 }
 0x3fb   :  { %v1460_v2 = vadd.f32 %v4023_v23, %v1294_v1  ;;  %v1462_v58 = vadd.f32 %v4034_v28, %v1300_v57  ;;  %v2323_v57 = vld [vmem:[#allocation25 + $0x38] sm:$0xff] }
 0x3fc   :  { %2181 = vmatpush.msrb.mxu1 %v3760_v11 }
 0x3fd   :  { %v1623_v23 = vadd.f32 %v4060_v27, %v1462_v58  ;;  %v2293_v58 = vld [vmem:[#allocation25 + $0x18] sm:$0xff] }
 0x3fe   :  { %v1835_v3 = vpop.f32.mrf.mxu3  ;;  %2182 = vmatpush.msrb.mxu1 %v3762_v12 }
 0x3ff   :  { %v1847_v4 = vmul.f32 %v1835_v3, %v3853_v33  ;;  %v1621_v3 = vadd.f32 %v4056_v53, %v1460_v2  ;;  %v2208_v2 = vld [vmem:[#allocation22 + $0x38] sm:$0xff] }
 0x400   :  { %v1715_v5 = vpop.f32.mrf.mxu2  ;;  %2183 = vmatpush.msrb.mxu1 %v3768_v13  ;;  %v1886_v13 = vld [vmem:[#allocation22 + $0x28] sm:$0xff]  ;;  %2242 = vmatpush.msrb.mxu3 %v2208_v2 }
 0x401   :  { %2895 = vmatmul.msk.f32.gmra.mxu1 %vm1195_vm2, %v1715_v5  ;;  %1875 = vmatmul.f32.gmra.mxu0 %v1847_v4 }
 0x402   :  { %2184 = vmatpush.msrb.mxu1 %v3778_v14  ;;  %1920 = vmatpush.msra.mxu2 %v1886_v13  ;;  %v2108_v14 = vpop.permute.xlu0 %2107 }
 0x404   :  { %2185 = vmatpush.msrb.mxu1 %v3782_v15  ;;  %2145 = vmatpush.msrb.mxu2 %v2990_v19  ;;  %v1947_v15 = vpop.permute.xlu1 %1946 }
 0x406   :  { %v1838_v6 = vpop.f32.mrf.mxu3  ;;  %2186 = vmatpush.msrb.mxu1 %v3784_v16  ;;  %2146 = vmatpush.msrb.mxu2 %v2991_v22  ;;  %v2110_v16 = vpop.permute.xlu2 %2109 }
 0x407   :  { %v1848_v8 = vmul.f32 %v1838_v6, %v3861_v37 }
 0x408   :  { %v1718_v9 = vpop.f32.mrf.mxu2  ;;  %2187 = vmatpush.msrb.mxu1 %v3790_v17 }
 0x409   :  { %2896 = vmatmul.msk.f32.gmra.mxu1 %vm1195_vm2, %v1718_v9  ;;  %1878 = vmatmul.f32.gmra.mxu0 %v1848_v8 }
 0x40a   :  { %v1949_v17 = vpop.permute.xlu0 %1948 }
 0x40c   :  { %v2112_v41 = vpop.permute.xlu1 %2111 }
 0x40e   :  { %v1841_v10 = vpop.f32.mrf.mxu3  ;;  %v1951_v43 = vpop.permute.xlu2 %1950 }
 0x40f   :  { %v1849_v11 = vmul.f32 %v1841_v10, %v3867_v40 }
 0x410   :  { %v1721_v12 = vpop.f32.mrf.mxu2 }
 0x411   :  { %2897 = vmatmul.msk.f32.gmra.mxu1 %vm1195_vm2, %v1721_v12  ;;  %1881 = vmatmul.f32.gmra.mxu0 %v1849_v11 }
 0x412   :  { %v2114_v38 = vpop.permute.xlu0 %2113 }
 0x414   :  { %v1953_v45 = vpop.permute.xlu1 %1952 }
 0x416   :  { %v2116_v42 = vpop.permute.xlu2 %2115 }
 0x419   :  { %2910 = vmatmul.msk.f32.vlgmr.msra.gmra.mxu1 %vm997_vm1, %v1947_v15 }
 0x41a   :  { %v1955_v51 = vpop.permute.xlu0 %1954 }
 0x41e   :  { %v1957_v47 = vpop.permute.xlu2 %1956 }
 0x421   :  { %2911 = vmatmul.msk.f32.gmra.mxu1 %vm997_vm1, %v1949_v17  ;;  %v1285_v17 = vadd.f32 %v3934_v50, %v3988_v49 }
 0x429   :  { %2912 = vmatmul.msk.f32.gmra.mxu1 %vm997_vm1, %v1951_v43 }
 0x431   :  { %2913 = vmatmul.msk.f32.gmra.mxu1 %vm997_vm1, %v1953_v45 }
 0x439   :  { %2914 = vmatmul.msk.f32.gmra.mxu1 %vm997_vm1, %v1955_v51 }
 0x441   :  { %2915 = vmatmul.msk.f32.gmra.mxu1 %vm997_vm1, %v1957_v47 }
 0x466   :  { %v1761_v46 = vpop.f32.mrf.mxu1  ;;  %v1867_v19 = vpop.f32.mrf.mxu0 }
 0x467   :  { %2904 = vmatmul.msk.f32.vlgmr.msra.gmra.mxu2 %vm1195_vm2, %v1867_v19 }
 0x468   :  { %2339 = vmatpush.msra.mxu2 %v2323_v57  ;;  %v2533_v57 = vld [vmem:[#allocation25 + $0x118] sm:$0xff] }
 0x46e   :  { %v4097_v22 = vpop.f32.mrf.mxu1  ;;  %v1870_v30 = vpop.f32.mrf.mxu0 }
 0x46f   :  { %2905 = vmatmul.msk.f32.gmra.mxu2 %vm1195_vm2, %v1870_v30 }
 0x476   :  { %v1767_v35 = vpop.f32.mrf.mxu1  ;;  %v1873_v36 = vpop.f32.mrf.mxu0 }
 0x477   :  { %v1781_v39 = vadd.f32 %v1767_v35, %v1620_v34  ;;  %2906 = vmatmul.msk.f32.gmra.mxu2 %vm1195_vm2, %v1873_v36 }
 0x47e   :  { %v1770_v4 = vpop.f32.mrf.mxu1  ;;  %v1876_v5 = vpop.f32.mrf.mxu0 }
 0x47f   :  { %v1782_v6 = vadd.f32 %v1770_v4, %v1621_v3  ;;  %2907 = vmatmul.msk.f32.gmra.mxu2 %vm1195_vm2, %v1876_v5 }
 0x486   :  { %v1773_v0 = vpop.f32.mrf.mxu1  ;;  %v1879_v8 = vpop.f32.mrf.mxu0 }
 0x487   :  { %v1783_v9 = vadd.f32 %v1773_v0, %v1622_v21  ;;  %2908 = vmatmul.msk.f32.gmra.mxu2 %vm1195_vm2, %v1879_v8 }
 0x48e   :  { %v1776_v53 = vpop.f32.mrf.mxu1  ;;  %v1882_v10 = vpop.f32.mrf.mxu0 }
 0x48f   :  { %v1784_v11 = vadd.f32 %v1776_v53, %v1623_v23  ;;  %2909 = vmatmul.msk.f32.gmra.mxu2 %vm1195_vm2, %v1882_v10  ;;  %v2292_v23 = vld [vmem:[#allocation25 + $0x10] sm:$0xff]  ;;  %v2321_v53 = vld [vmem:[#allocation25 + $0x28] sm:$0xff] }
 0x490   :  { %v2291_v10 = vld [vmem:[#allocation25 + $0x8] sm:$0xff] }
 0x496   :  { %v1987_v59 = vpop.f32.mrf.mxu1 }
 0x497   :  { %v2005_v60 = vmul.f32 %v1987_v59, %v3828_v20  ;;  %2922 = vmatmul.msk.f32.vlgmr.msrb.gmra.mxu2 %vm997_vm1, %v2108_v14  ;;  %v2118_v14 = vpop.permute.xlu1 %2117 }
 0x499   :  { %2027 = vmatmul.f32.vlgmr.msra.gmra.mxu3 %v2005_v60 }
 0x49e   :  { %v1990_v26 = vpop.f32.mrf.mxu1 }
 0x49f   :  { %v2006_v24 = vmul.f32 %v1990_v26, %v3838_v25  ;;  %2923 = vmatmul.msk.f32.gmra.mxu2 %vm997_vm1, %v2110_v16 }
 0x4a1   :  { %2030 = vmatmul.f32.gmra.mxu3 %v2006_v24  ;;  %v2503_v24 = vld [vmem:[#allocation25 + $0xf8] sm:$0xff] }
 0x4a2   :  { %2519 = vmatpush.msra.mxu1 %v2503_v24  ;;  %v2530_v24 = vld [vmem:[#allocation25 + $0x100] sm:$0xff] }
 0x4a6   :  { %v1993_v61 = vpop.f32.mrf.mxu1 }
 0x4a7   :  { %v2007_v62 = vmul.f32 %v1993_v61, %v3845_v29  ;;  %2924 = vmatmul.msk.f32.gmra.mxu2 %vm997_vm1, %v2112_v41  ;;  %v1457_v41 = vadd.f32 %v4003_v63, %v1285_v17  ;;  %v2047_v63 = vld [vmem:[#allocation22 + $0x30] sm:$0xff]  ;;  %v2320_v61 = vld [vmem:[#allocation25 + $0x20] sm:$0xff] }
 0x4a8   :  { %2081 = vmatpush.msrb.mxu0 %v2047_v63  ;;  %v2351_v17 = vld [vmem:[#allocation25 + $0x48] sm:$0xff] }
 0x4a9   :  { %2033 = vmatmul.f32.gmra.mxu3 %v2007_v62  ;;  %v1618_v43 = vadd.f32 %v4050_v44, %v1457_v41  ;;  %v2290_v62 = vld [vmem:[#allocation25] sm:$0xff]  ;;  %v2381_v41 = vld [vmem:[#allocation25 + $0x68] sm:$0xff] }
 0x4aa   :  { %2309 = vmatpush.msra.mxu0 %v2293_v58 }
 0x4ac   :  { %2310 = vmatpush.msra.mxu0 %v2292_v23  ;;  %v2472_v23 = vld [vmem:[#allocation25 + $0xd0] sm:$0xff] }
 0x4ae   :  { %v1996_v28 = vpop.f32.mrf.mxu1  ;;  %2311 = vmatpush.msra.mxu0 %v2291_v10 }
 0x4af   :  { %v2008_v27 = vmul.f32 %v1996_v28, %v3853_v33  ;;  %2925 = vmatmul.msk.f32.gmra.mxu2 %vm997_vm1, %v2114_v38  ;;  %v1779_v38 = vadd.f32 %v1761_v46, %v1618_v43  ;;  %v2562_v28 = vld [vmem:[#allocation25 + $0x130] sm:$0xff]  ;;  %v2350_v43 = vld [vmem:[#allocation25 + $0x40] sm:$0xff] }
 0x4b0   :  { %2312 = vmatpush.msra.mxu0 %v2290_v62 }
 0x4b1   :  { %2036 = vmatmul.f32.gmra.mxu3 %v2008_v27  ;;  %v2502_v27 = vld [vmem:[#allocation25 + $0xf0] sm:$0xff] }
 0x4b2   :  { %2520 = vmatpush.msra.mxu1 %v2502_v27 }
 0x4b6   :  { %v1999_v12 = vpop.f32.mrf.mxu1 }
 0x4b7   :  { %v2009_v13 = vmul.f32 %v1999_v12, %v3861_v37  ;;  %2926 = vmatmul.msk.f32.gmra.mxu2 %vm997_vm1, %v2116_v42  ;;  %v1288_v42 = vadd.f32 %v3937_v52, %v3991_v55  ;;  %v2353_v12 = vld [vmem:[#allocation25 + $0x58] sm:$0xff] }
 0x4b9   :  { %2039 = vmatmul.f32.gmra.mxu3 %v2009_v13  ;;  %v1458_v47 = vadd.f32 %v4009_v18, %v1288_v42  ;;  %v2383_v13 = vld [vmem:[#allocation25 + $0x78] sm:$0xff] }
 0x4bb   :  { %v1619_v19 = vadd.f32 %v4052_v48, %v1458_v47  ;;  %v2501_v47 = vld [vmem:[#allocation25 + $0xe8] sm:$0xff] }
 0x4bc   :  { %2521 = vmatpush.msra.mxu1 %v2501_v47 }
 0x4bd   :  { %v1780_v30 = vadd.f32 %v4097_v22, %v1619_v19 }
 0x4be   :  { %v2002_v15 = vpop.f32.mrf.mxu1 }
 0x4bf   :  { %v2010_v16 = vmul.f32 %v2002_v15, %v3867_v40  ;;  %2927 = vmatmul.msk.f32.gmra.mxu2 %vm997_vm1, %v2118_v14  ;;  %v2352_v15 = vld [vmem:[#allocation25 + $0x50] sm:$0xff] }
 0x4c1   :  { %2042 = vmatmul.f32.gmra.mxu3 %v2010_v16  ;;  %v2382_v16 = vld [vmem:[#allocation25 + $0x70] sm:$0xff] }
 0x4ea   :  { %v1922_v45 = vpop.f32.mrf.mxu2 }
 0x4eb   :  { %v4138_v51 = vadd.f32 %v1922_v45, %v1779_v38  ;;  %v2380_v38 = vld [vmem:[#allocation25 + $0x60] sm:$0xff]  ;;  %v2561_v45 = vld [vmem:[#allocation25 + $0x128] sm:$0xff] }
 0x4f2   :  { %v1925_v31 = vpop.f32.mrf.mxu2 }
 0x4f3   :  { %v4143_v32 = vadd.f32 %v1925_v31, %v1780_v30  ;;  %v4172_v30 = vld [vmem:[#allocation23] ss:$0 sm:$0xff] }
 0x4fa   :  { %v1928_v50 = vpop.f32.mrf.mxu2 }
 0x4fb   :  { %v4145_v49 = vadd.f32 %v1928_v50, %v1781_v39 }
 0x502   :  { %v1931_v44 = vpop.f32.mrf.mxu2 }
 0x503   :  { %v4147_v46 = vadd.f32 %v1931_v44, %v1782_v6  ;;  %v2560_v44 = vld [vmem:[#allocation25 + $0x120] sm:$0xff] }
 0x50a   :  { %v1934_v52 = vpop.f32.mrf.mxu2 }
 0x50b   :  { %v4149_v55 = vadd.f32 %v1934_v52, %v1783_v9 }
 0x512   :  { %v1937_v34 = vpop.f32.mrf.mxu2 }
 0x513   :  { %v4151_v18 = vadd.f32 %v1937_v34, %v1784_v11  ;;  %v2563_v11 = vld [vmem:[#allocation25 + $0x138] sm:$0xff]  ;;  %v2500_v34 = vld [vmem:[#allocation25 + $0xe0] sm:$0xff] }
 0x514   :  { %2579 = vmatpush.msra.mxu3 %v2563_v11  ;;  %2522 = vmatpush.msra.mxu1 %v2500_v34  ;;  %v2471_v11 = vld [vmem:[#allocation25 + $0xc8] sm:$0xff] }
 0x516   :  { %2580 = vmatpush.msra.mxu3 %v2562_v28  ;;  %v2593_v28 = vld [vmem:[#allocation25 + $0x158] sm:$0xff] }
 0x518   :  { %2581 = vmatpush.msra.mxu3 %v2561_v45 }
 0x51a   :  { %v2148_v48 = vpop.f32.mrf.mxu2  ;;  %2582 = vmatpush.msra.mxu3 %v2560_v44 }
 0x51b   :  { %v2166_v22 = vmul.f32 %v2148_v48, %v3828_v20 }
 0x51c   :  { %v2028_v35 = vpop.f32.mrf.mxu3 }
 0x51d   :  { %2916 = vmatmul.msk.f32.vlgmr.msrb.gmra.mxu0 %vm1195_vm2, %v2028_v35  ;;  %2188 = vmatmul.f32.vlgmr.msrb.gmra.mxu1 %v2166_v22 }
 0x51e   :  { %2369 = vmatpush.msrb.mxu0 %v2353_v12 }
 0x520   :  { %2370 = vmatpush.msrb.mxu0 %v2352_v15 }
 0x522   :  { %v2151_v36 = vpop.f32.mrf.mxu2  ;;  %2371 = vmatpush.msrb.mxu0 %v2351_v17  ;;  %v2590_v17 = vld [vmem:[#allocation25 + $0x140] sm:$0xff] }
 0x523   :  { %v2167_v39 = vmul.f32 %v2151_v36, %v3838_v25 }
 0x524   :  { %v2031_v1 = vpop.f32.mrf.mxu3  ;;  %2372 = vmatpush.msrb.mxu0 %v2350_v43 }
 0x525   :  { %2917 = vmatmul.msk.f32.gmra.mxu0 %vm1195_vm2, %v2031_v1  ;;  %2191 = vmatmul.f32.gmra.mxu1 %v2167_v39  ;;  %v2443_v39 = vld [vmem:[#allocation25 + $0xb8] sm:$0xff] }
 0x52a   :  { %v2154_v3 = vpop.f32.mrf.mxu2 }
 0x52b   :  { %v2168_v4 = vmul.f32 %v2154_v3, %v3845_v29  ;;  %v2412_v3 = vld [vmem:[#allocation25 + $0x90] sm:$0xff] }
 0x52c   :  { %v2034_v5 = vpop.f32.mrf.mxu3 }
 0x52d   :  { %2918 = vmatmul.msk.f32.gmra.mxu0 %vm1195_vm2, %v2034_v5  ;;  %2194 = vmatmul.f32.gmra.mxu1 %v2168_v4  ;;  %v2442_v4 = vld [vmem:[#allocation25 + $0xb0] sm:$0xff] }
 0x52e   :  { %v2622_v5 = vld [vmem:[#allocation25 + $0x170] sm:$0xff] }
 0x532   :  { %v2157_v20 = vpop.f32.mrf.mxu2 }
 0x533   :  { %v2169_v6 = vmul.f32 %v2157_v20, %v3853_v33 }
 0x534   :  { %v2037_v54 = vpop.f32.mrf.mxu3 }
 0x535   :  { %2919 = vmatmul.msk.f32.gmra.mxu0 %vm1195_vm2, %v2037_v54  ;;  %2197 = vmatmul.f32.gmra.mxu1 %v2169_v6  ;;  %v2411_v6 = vld [vmem:[#allocation25 + $0x88] sm:$0xff] }
 0x536   :  { %v2441_v54 = vld [vmem:[#allocation25 + $0xa8] sm:$0xff] }
 0x53a   :  { %v2160_v25 = vpop.f32.mrf.mxu2 }
 0x53b   :  { %v2170_v56 = vmul.f32 %v2160_v25, %v3861_v37  ;;  %v2322_v37 = vld [vmem:[#allocation25 + $0x30] sm:$0xff] }
 0x53c   :  { %v2040_v21 = vpop.f32.mrf.mxu3  ;;  %2340 = vmatpush.msra.mxu2 %v2322_v37  ;;  %v2620_v37 = vld [vmem:[#allocation25 + $0x160] sm:$0xff] }
 0x53d   :  { %2920 = vmatmul.msk.f32.gmra.mxu0 %vm1195_vm2, %v2040_v21  ;;  %2200 = vmatmul.f32.gmra.mxu1 %v2170_v56  ;;  %v2621_v21 = vld [vmem:[#allocation25 + $0x168] sm:$0xff] }
 0x53e   :  { %2341 = vmatpush.msra.mxu2 %v2321_v53  ;;  %v2532_v53 = vld [vmem:[#allocation25 + $0x110] sm:$0xff] }
 0x540   :  { %2342 = vmatpush.msra.mxu2 %v2320_v61 }
 0x542   :  { %v2163_v0 = vpop.f32.mrf.mxu2  ;;  %2399 = vmatpush.msrb.mxu2 %v2383_v13 }
 0x543   :  { %v2171_v29 = vmul.f32 %v2163_v0, %v3867_v40 }
 0x544   :  { %v2043_v8 = vpop.f32.mrf.mxu3  ;;  %2400 = vmatpush.msrb.mxu2 %v2382_v16 }
 0x545   :  { %2921 = vmatmul.msk.f32.gmra.mxu0 %vm1195_vm2, %v2043_v8  ;;  %2203 = vmatmul.f32.gmra.mxu1 %v2171_v29  ;;  %v2410_v29 = vld [vmem:[#allocation25 + $0x80] sm:$0xff] }
 0x546   :  { %2401 = vmatpush.msrb.mxu2 %v2381_v41  ;;  %v2440_v8 = vld [vmem:[#allocation25 + $0xa0] sm:$0xff] }
 0x548   :  { %2402 = vmatpush.msrb.mxu2 %v2380_v38 }
 0x59a   :  { %v2189_v9 = vpop.f32.mrf.mxu1  ;;  %v2083_v14 = vpop.f32.mrf.mxu0 }
 0x59b   :  { %2928 = vmatmul.msk.f32.vlgmr.msrb.gmra.mxu3 %vm1195_vm2, %v2189_v9  ;;  %v2101_v19 = vadd.f32 %v2083_v14, %v4138_v51  ;;  %v2413_v51 = vld [vmem:[#allocation25 + $0x98] sm:$0xff]  ;;  %v2591_v14 = vld [vmem:[#allocation25 + $0x148] sm:$0xff] }
 0x5a2   :  { %v2192_v33 = vpop.f32.mrf.mxu1  ;;  %v2086_v42 = vpop.f32.mrf.mxu0 }
 0x5a3   :  { %2929 = vmatmul.msk.f32.gmra.mxu3 %vm1195_vm2, %v2192_v33  ;;  %v2102_v48 = vadd.f32 %v2086_v42, %v4143_v32  ;;  %v2623_v32 = vld [vmem:[#allocation25 + $0x178] sm:$0xff] }
 0x5a4   :  { %2639 = vmatpush.msrb.mxu1 %v2623_v32  ;;  %v2473_v33 = vld [vmem:[#allocation25 + $0xd8] sm:$0xff] }
 0x5a6   :  { %2640 = vmatpush.msrb.mxu1 %v2622_v5 }
 0x5a8   :  { %2641 = vmatpush.msrb.mxu1 %v2621_v21 }
 0x5aa   :  { %v2195_v40 = vpop.f32.mrf.mxu1  ;;  %v2089_v52 = vpop.f32.mrf.mxu0  ;;  %2642 = vmatpush.msrb.mxu1 %v2620_v37 }
 0x5ab   :  { %2930 = vmatmul.msk.f32.gmra.mxu3 %vm1195_vm2, %v2195_v40  ;;  %v2103_v20 = vadd.f32 %v2089_v52, %v4145_v49  ;;  %v2531_v40 = vld [vmem:[#allocation25 + $0x108] sm:$0xff] }
 0x5b2   :  { %v2198_v59 = vpop.f32.mrf.mxu1  ;;  %v2092_v25 = vpop.f32.mrf.mxu0 }
 0x5b3   :  { %2931 = vmatmul.msk.f32.gmra.mxu3 %vm1195_vm2, %v2198_v59  ;;  %v2104_v10 = vadd.f32 %v2092_v25, %v4147_v46  ;;  %v2592_v46 = vld [vmem:[#allocation25 + $0x150] sm:$0xff] }
 0x5ba   :  { %v2201_v60 = vpop.f32.mrf.mxu1  ;;  %v2095_v61 = vpop.f32.mrf.mxu0 }
 0x5bb   :  { %2932 = vmatmul.msk.f32.gmra.mxu3 %vm1195_vm2, %v2201_v60  ;;  %v2105_v13 = vadd.f32 %v2095_v61, %v4149_v55  ;;  %v2689_v61 = vld [vmem:[#allocation26 + $0x8] sm:$0xff] }
 0x5c2   :  { %v2204_v26 = vpop.f32.mrf.mxu1  ;;  %v2098_v43 = vpop.f32.mrf.mxu0 }
 0x5c3   :  { %2933 = vmatmul.msk.f32.gmra.mxu3 %vm1195_vm2, %v2204_v26  ;;  %v2470_v26 = vld [vmem:[#allocation25 + $0xc0] sm:$0xff]  ;;  %v2106_v55 = vadd.f32 %v2098_v43, %v4151_v18 }
 0x61e   :  { %v2244_v31 = vpop.f32.mrf.mxu3 }
 0x61f   :  { %v2262_v50 = vadd.f32 %v2244_v31, %v2101_v19 }
 0x621   :  { %v2272_v63 = vadd.f32 %v4172_v30, %v2262_v50 }
 0x623   :  { %2278 = vst.msk [vmem:[#allocation4] sm:$0xff] %vm380_vm0, %v2272_v63 }
 0x626   :  { %v2247_v22 = vpop.f32.mrf.mxu3 }
 0x627   :  { %v2263_v35 = vadd.f32 %v2247_v22, %v2102_v48 }
 0x629   :  { %v2273_v36 = vadd.f32 %v4172_v30, %v2263_v35 }
 0x62a   :  { %v2289_v1 = vld [vmem:[#allocation4] sm:$0xf]  ;;  %v2318_v2 = vld [vmem:[#allocation4 + $0x4] sm:$0xf] }
 0x62b   :  { %2279 = vst.msk [vmem:[#allocation4 + $0x8] sm:$0xff] %vm380_vm0, %v2273_v36  ;;  %2934 = vmatmul.msk.f32.vlgmr.msra.gmra.mxu0 %vm380_vm0, %v2289_v1  ;;  %2935 = vmatmul.msk.f32.vlgmr.msra.gmra.mxu2 %vm380_vm0, %v2318_v2 }
 0x62c   :  { %2429 = vmatpush.msra.mxu0 %v2413_v51  ;;  %2459 = vmatpush.msra.mxu2 %v2443_v39 }
 0x62e   :  { %v2250_v56 = vpop.f32.mrf.mxu3  ;;  %2430 = vmatpush.msra.mxu0 %v2412_v3  ;;  %2460 = vmatpush.msra.mxu2 %v2442_v4 }
 0x62f   :  { %v2264_v0 = vadd.f32 %v2250_v56, %v2103_v20 }
 0x630   :  { %2431 = vmatpush.msra.mxu0 %v2411_v6  ;;  %2461 = vmatpush.msra.mxu2 %v2441_v54 }
 0x631   :  { %v2274_v9 = vadd.f32 %v4172_v30, %v2264_v0 }
 0x632   :  { %v2348_v49 = vld [vmem:[#allocation4 + $0x8] sm:$0xf]  ;;  %v2378_v58 = vld [vmem:[#allocation4 + $0xc] sm:$0xf]  ;;  %2432 = vmatpush.msra.mxu0 %v2410_v29  ;;  %2462 = vmatpush.msra.mxu2 %v2440_v8 }
 0x633   :  { %2280 = vst.msk [vmem:[#allocation4 + $0x10] sm:$0xff] %vm380_vm0, %v2274_v9  ;;  %2936 = vmatmul.msk.f32.vlgmr.msrb.gmra.mxu0 %vm380_vm0, %v2348_v49  ;;  %2937 = vmatmul.msk.f32.vlgmr.msrb.gmra.mxu2 %vm380_vm0, %v2378_v58 }
 0x634   :  { %2489 = vmatpush.msrb.mxu0 %v2473_v33  ;;  %2549 = vmatpush.msrb.mxu2 %v2533_v57  ;;  %v3394_v33 = vmov 32.0  }
 0x635   :  { %2986 = vrcp.f32 %v3394_v33 }
 0x636   :  { %v2253_v59 = vpop.f32.mrf.mxu3  ;;  %2490 = vmatpush.msrb.mxu0 %v2472_v23  ;;  %2550 = vmatpush.msrb.mxu2 %v2532_v53 }
 0x637   :  { %v2265_v60 = vadd.f32 %v2253_v59, %v2104_v10 }
 0x638   :  { %2491 = vmatpush.msrb.mxu0 %v2471_v11  ;;  %2551 = vmatpush.msrb.mxu2 %v2531_v40 }
 0x639   :  { %v2275_v62 = vadd.f32 %v4172_v30, %v2265_v60 }
 0x63a   :  { %v2408_v27 = vld [vmem:[#allocation4 + $0x10] sm:$0xf]  ;;  %v2438_v12 = vld [vmem:[#allocation4 + $0x14] sm:$0xf]  ;;  %2492 = vmatpush.msrb.mxu0 %v2470_v26  ;;  %2552 = vmatpush.msrb.mxu2 %v2530_v24  ;;  %v2691_v26 = vld [vmem:[#allocation26 + $0x18] sm:$0xff] }
 0x63b   :  { %2281 = vst.msk [vmem:[#allocation4 + $0x18] sm:$0xff] %vm380_vm0, %v2275_v62  ;;  %2938 = vmatmul.msk.f32.vlgmr.msra.gmra.mxu0 %vm380_vm0, %v2408_v27  ;;  %2939 = vmatmul.msk.f32.vlgmr.msra.gmra.mxu2 %vm380_vm0, %v2438_v12  ;;  %v2987_v57 = vpop.eup %2986  ;;  %v2690_v24 = vld [vmem:[#allocation26 + $0x10] sm:$0xff]  ;;  %v2688_v62 = vld [vmem:[#allocation26] sm:$0xff] }
 0x63c   :  { %2609 = vmatpush.msra.mxu0 %v2593_v28  ;;  %v2653_v49 = vmul.f32 32.0, %v2987_v57  ;;  %vm2657_vm4 = vweird.f32 %v2987_v57  ;;  %2711 = vmatpush.msra.mxu2 %v2691_v26  ;;  %v2727_v28 = vld [vmem:[%s4285_s20 + $0x38] sm:$0xff]  ;;  %v2726_v27 = vld [vmem:[%s4285_s20 + $0x30] sm:$0xff]  ;;  %v2725_v12 = vld [vmem:[%s4285_s20 + $0x28] sm:$0xff] }
 0x63d   :  { %2744 = vmatpush.msrb.mxu3 %v2727_v28 }
 0x63e   :  { %v2256_v15 = vpop.f32.mrf.mxu3  ;;  %2610 = vmatpush.msra.mxu0 %v2592_v46  ;;  %v2654_v58 = vsub.f32 1.0, %v2653_v49  ;;  %2712 = vmatpush.msra.mxu2 %v2690_v24 }
 0x63f   :  { %v2266_v16 = vadd.f32 %v2256_v15, %v2105_v13  ;;  %2745 = vmatpush.msrb.mxu3 %v2726_v27 }
 0x640   :  { %2611 = vmatpush.msra.mxu0 %v2591_v14  ;;  %v2655_v37 = vmul.f32 %v2987_v57, %v2654_v58  ;;  %2713 = vmatpush.msra.mxu2 %v2689_v61  ;;  %v2724_v14 = vld [vmem:[%s4285_s20 + $0x20] sm:$0xff] }
 0x641   :  { %v2276_v41 = vadd.f32 %v4172_v30, %v2266_v16  ;;  %2746 = vmatpush.msrb.mxu3 %v2725_v12  ;;  %v2723_v16 = vld [vmem:[%s4285_s20 + $0x18] sm:$0xff] }
 0x642   :  { %v2468_v38 = vld [vmem:[#allocation4 + $0x18] sm:$0xf]  ;;  %v2498_v45 = vld [vmem:[#allocation4 + $0x1c] sm:$0xf]  ;;  %2612 = vmatpush.msra.mxu0 %v2590_v17  ;;  %v2656_v23 = vadd.f32 %v2987_v57, %v2655_v37  ;;  %2714 = vmatpush.msra.mxu2 %v2688_v62 }
 0x643   :  { %2282 = vst.msk [vmem:[#allocation4 + $0x20] sm:$0xff] %vm380_vm0, %v2276_v41  ;;  %2940 = vmatmul.msk.f32.vlgmr.msrb.gmra.mxu0 %vm380_vm0, %v2468_v38  ;;  %2941 = vmatmul.msk.f32.vlgmr.msra.gmra.mxu1 %vm380_vm0, %v2498_v45 }
 0x644   :  { %v2658_v53 = vsel %vm2657_vm4, %v2987_v57, %v2656_v23  ;;  %2747 = vmatpush.msrb.mxu3 %v2724_v14 }
 0x646   :  { %v2259_v42 = vpop.f32.mrf.mxu3  ;;  %2748 = vmatpush.msrb.mxu3 %v2723_v16 }
 0x647   :  { %v2267_v47 = vadd.f32 %v2259_v42, %v2106_v55  ;;  %v2981_v42 = vld [vmem:[%s4281_s16] ss:$0 sm:$0xff] }
 0x649   :  { %v2277_v19 = vadd.f32 %v4172_v30, %v2267_v47  ;;  %v2980_v30 = vld [vmem:[%s4280_s15] ss:$0 sm:$0xff] }
 0x64a   :  { %v2528_v31 = vld [vmem:[#allocation4 + $0x20] sm:$0xf]  ;;  %v2558_v50 = vld [vmem:[#allocation4 + $0x24] sm:$0xf]  ;;  %v2288_v48 = vadd.f32 %v2980_v30, %v3612_v7  ;;  %v2760_v30 = vld [vmem:[%s4287_s22 + $0x18] sm:$0xff] }
 0x64b   :  { %2283 = vst.msk [vmem:[#allocation4 + $0x28] sm:$0xff] %vm380_vm0, %v2277_v19  ;;  %2942 = vmatmul.msk.f32.vlgmr.msrb.gmra.mxu2 %vm380_vm0, %v2528_v31  ;;  %2943 = vmatmul.msk.f32.vlgmr.msra.gmra.mxu3 %vm380_vm0, %v2558_v50  ;;  %v2982_v19 = vld [vmem:[%s4282_s17] ss:$0 sm:$0xff] }
 0x64c   :  { %2780 = vmatpush.msrb.mxu0 %v2760_v30 }
 0x652   :  { %v2588_v63 = vld [vmem:[#allocation4 + $0x28] sm:$0xf]  ;;  %v2618_v44 = vld [vmem:[#allocation4 + $0x2c] sm:$0xf] }
 0x653   :  { %2944 = vmatmul.msk.f32.vlgmr.msra.gmra.mxu0 %vm380_vm0, %v2588_v63  ;;  %2945 = vmatmul.msk.f32.vlgmr.msrb.gmra.mxu1 %vm380_vm0, %v2618_v44  ;;  %v2722_v44 = vld [vmem:[%s4285_s20 + $0x10] sm:$0xff] }
 0x654   :  { %2749 = vmatpush.msrb.mxu3 %v2722_v44 }
 0x6a8   :  { %v2314_v52 = vpop.f32.mrf.mxu0 }
 0x6a9   :  { %v2317_v22 = vadd.f32 %v2314_v52, %v2288_v48  ;;  %v2721_v52 = vld [vmem:[%s4285_s20 + $0x8] sm:$0xff]  ;;  %v2983_v48 = vld [vmem:[%s4284_s19] ss:$0 sm:$0xff] }
 0x6aa   :  { %2750 = vmatpush.msrb.mxu3 %v2721_v52 }
 0x6ae   :  { %v2344_v18 = vpop.f32.mrf.mxu2 }
 0x6af   :  { %v2347_v36 = vadd.f32 %v2344_v18, %v2317_v22  ;;  %v2720_v18 = vld [vmem:[%s4285_s20] sm:$0xff] }
 0x6b0   :  { %v2374_v34 = vpop.f32.mrf.mxu0  ;;  %2751 = vmatpush.msrb.mxu3 %v2720_v18 }
 0x6b1   :  { %v2377_v39 = vadd.f32 %v2374_v34, %v2347_v36  ;;  %v2759_v34 = vld [vmem:[%s4287_s22 + $0x10] sm:$0xff] }
 0x6b2   :  { %2781 = vmatpush.msrb.mxu0 %v2759_v34 }
 0x6b6   :  { %v2404_v35 = vpop.f32.mrf.mxu2 }
 0x6b7   :  { %v2407_v1 = vadd.f32 %v2404_v35, %v2377_v39  ;;  %v2757_v39 = vld [vmem:[%s4287_s22] sm:$0xff] }
 0x6b8   :  { %v2434_v51 = vpop.f32.mrf.mxu0 }
 0x6b9   :  { %v2437_v3 = vadd.f32 %v2434_v51, %v2407_v1  ;;  %v2758_v51 = vld [vmem:[%s4287_s22 + $0x8] sm:$0xff]  ;;  %v2984_v1 = vld [vmem:[%s4286_s21] ss:$0 sm:$0xff]  ;;  %s4311_s22 = sld [smem:[#allocation48_spill]] }
 0x6ba   :  { %2782 = vmatpush.msrb.mxu0 %v2758_v51 }
 0x6bc   :  { %2783 = vmatpush.msrb.mxu0 %v2757_v39 }
 0x6be   :  { %v2464_v2 = vpop.f32.mrf.mxu2 }
 0x6bf   :  { %v2467_v4 = vadd.f32 %v2464_v2, %v2437_v3  ;;  %s2797_s14 = sshll.u32 %s4311_s22, 4  ;;  %s2798_s14 = int_to_ptr.hbm [resolvable:$true] %s2797_s14 }
 0x6c0   :  { %v2494_v32 = vpop.f32.mrf.mxu0  ;;  %v2524_v20 = vpop.f32.mrf.mxu1 }
 0x6c1   :  { %v2497_v5 = vadd.f32 %v2494_v32, %v2467_v4  ;;  %v2985_v32 = vld [vmem:[%s4310_s11] ss:$0 sm:$0xff] }
 0x6c3   :  { %v2527_v6 = vadd.f32 %v2524_v20, %v2497_v5 }
 0x6ce   :  { %v2554_v54 = vpop.f32.mrf.mxu2  ;;  %v2584_v56 = vpop.f32.mrf.mxu3 }
 0x6cf   :  { %v2557_v25 = vadd.f32 %v2554_v54, %v2527_v6 }
 0x6d0   :  { %v2614_v0 = vpop.f32.mrf.mxu0  ;;  %v2644_v7 = vpop.f32.mrf.mxu1 }
 0x6d1   :  { %v2587_v21 = vadd.f32 %v2584_v56, %v2557_v25 }
 0x6d3   :  { %v2617_v29 = vadd.f32 %v2614_v0, %v2587_v21 }
 0x6d5   :  { %v2647_v8 = vadd.f32 %v2644_v7, %v2617_v29 }
 0x6d7   :  { %v2649_v9 = vsel %vm2648_vm3, %v2647_v8, 0.0 }
 0x6d8   :  { %2650 = vadd.xlane.f32.xlu0 %v2649_v9 }
 0x74b   :  { %v2651_v10 = vpop.xlane.xlu0 %2650 }
 0x74c   :  { %v2659_v11 = vmul.f32 %v2658_v53, %v2651_v10 }
 0x74e   :  { %v2660_v40 = vsub.f32 %v2647_v8, %v2659_v11 }
 0x750   :  { %v2661_v59 = vmul.f32 %v2660_v40, %v2660_v40 }
 0x752   :  { %v2662_v60 = vsel %vm2648_vm3, %v2661_v59, 0.0 }
 0x753   :  { %2663 = vadd.xlane.f32.xlu1 %v2662_v60 }
 0x7c6   :  { %v2664_v46 = vpop.xlane.xlu1 %2663 }
 0x7c7   :  { %v2665_v13 = vmul.f32 %v2664_v46, %v2658_v53 }
 0x7c9   :  { %v2666_v15 = vadd.f32 1e-05, %v2665_v13 }
 0x7cb   :  { %2988 = vrsqrt.f32 %v2666_v15  ;;  %vm2673_vm6 = vweird.f32 %v2666_v15 }
 0x7d1   :  { %v2989_v17 = vpop.eup %2988 }
 0x7d2   :  { %v2668_v41 = vmul.f32 %v2989_v17, %v2666_v15  ;;  %vm2674_vm5 = vweird.f32 %v2989_v17 }
 0x7d3   :  { %vm2675_vm7 = vmor %vm2673_vm6, %vm2674_vm5 }
 0x7d4   :  { %v2669_v43 = vmul.f32 %v2989_v17, %v2668_v41 }
 0x7d6   :  { %v2670_v38 = vmul.f32 0.5, %v2669_v43 }
 0x7d8   :  { %v2671_v45 = vsub.f32 1.5, %v2670_v38 }
 0x7da   :  { %v2672_v55 = vmul.f32 %v2989_v17, %v2671_v45 }
 0x7dc   :  { %v2676_v47 = vsel %vm2675_vm7, %v2989_v17, %v2672_v55 }
 0x7dd   :  { %v2677_v31 = vmul.f32 %v2676_v47, %v2660_v40 }
 0x7df   :  { %v2682_v50 = vmul.f32 %v2981_v42, %v2677_v31 }
 0x7e1   :  { %v2687_v63 = vadd.f32 %v2982_v19, %v2682_v50 }
 0x7e3   :  { %2946 = vmatmul.msk.f32.vlgmr.msra.gmra.mxu2 %vm380_vm0, %v2687_v63 }
 0x866   :  { %v2716_v22 = vpop.f32.mrf.mxu2 }
 0x867   :  { %v2717_v35 = vadd.f32 %v2983_v48, %v2716_v22 }
 0x869   :  { %v2719_v36 = vmax.f32 %v2717_v35, 0.0 }
 0x86b   :  { %2947 = vmatmul.msk.f32.vlgmr.msrb.gmra.mxu3 %vm2732_vm8, %v2719_v36 }
 0x8ee   :  { %v2753_v2 = vpop.f32.mrf.mxu3 }
 0x8ef   :  { %v2754_v3 = vadd.f32 %v2984_v1, %v2753_v2 }
 0x8f1   :  { %v2756_v4 = vadd.f32 %v2754_v3, %v2687_v63 }
 0x8f3   :  { %2948 = vmatmul.msk.f32.vlgmr.msrb.gmra.mxu0 %vm380_vm0, %v2756_v4 }
 0x970   :  { %v2785_v5 = vpop.f32.mrf.mxu0 }
 0x971   :  { %v2786_v20 = vadd.f32 %v2985_v32, %v2785_v5 }
 0x973   :  { %2789 = vst.msk [vmem:[#allocation28] sm:$0xf] %vm2788_vm9, %v2786_v20 }
 0x974   :  { %2800 = dma.vmem_to_hbm [thread:$0]  %s2796_s28, 64, %s2798_s14, [#allocation7]  }
 0x975   :  { %3368 = dma.done.wait [#allocation7], 64  }
 0x976   :  { %3369 = vsyncadd [#allocation7], 4294967232 }
 0x977   :  { %2805 = vsyncpa [#allocation6], 1 }
 0x978   :  { %2806 = vsyncpa [#allocation9], 1 }
 0x979   :  { %2807 = vsyncpa [#allocation12], 1 }
 0x97a   :  { %2808 = vsyncpa [#allocation15], 1 }
 0x97b   :  { %2809 = vsyncpa [#allocation18], 1 }
 0x97c   :  { %2810 = vsyncpa [#allocation21], 1 }
 0x97d   :  { %2811 = vsyncpa [#allocation24], 1 }
 0x97e   :  { %2812 = vsyncpa [#allocation27], 1 }
 0x97f   :  { %2813 = vsyncpa [#allocation7], 1 }

</bundles_post_ra>
